<compile_context>
chip_gen: v7x
topology: tpu7x:2x2x1
jax: 0.10.0
libtpu: 0.0.40
codegen_flags: <defaults>
</compile_context>

<pallas_src>
import functools
import math

import jax
import jax.numpy as jnp
from jax import lax
from jax.experimental import pallas as pl
from jax.experimental.pallas import tpu as pltpu


def _round_up(n, m):
    return ((n + m - 1) // m) * m


# ----------------------------------------------------------------------------
# Fused Pallas kernel: one (batch-tile, time-chunk) grid step.
# ----------------------------------------------------------------------------
def _fused_lstm_kernel(num_layers, hidden_p, unroll,
                       x_ref, wih0_ref, wihr_ref, whh_ref, b_ref,
                       wfc_ref, bfc_ref, out_ref,
                       gx_scr, seq_scr, h_state, c_state):
    """
    x_ref    : (TC, BT, DP)            bf16  time-major input chunk
    wih0_ref : (DP, 4*HP)              bf16  layer-0 input weights (gate-padded)
    wihr_ref : (max(L-1,1), HP, 4*HP)  bf16  input weights of layers >= 1
    whh_ref  : (L, HP, 4*HP)           bf16
    b_ref    : (L, 1, 4*HP)            f32   bias_ih + bias_hh
    wfc_ref  : (HP, OP)                bf16
    bfc_ref  : (1, OP)                 f32
    out_ref  : (TC, BT, OP)            f32
    gx_scr   : (TC, BT, 4*HP)          f32   hoisted input-projection gates
    seq_scr  : (TC, BT, HP)            bf16  hidden-sequence slab (current layer)
    h_state  : (L, BT, HP)             f32   persistent recurrent state
    c_state  : (L, BT, HP)             f32   persistent recurrent state
    """
    t_chunk = pl.program_id(1)
    TC, bt, DP = x_ref.shape
    HP = hidden_p
    GP = 4 * HP

    @pl.when(t_chunk == 0)
    def _():
        h_state[...] = jnp.zeros_like(h_state)
        c_state[...] = jnp.zeros_like(c_state)

    for l in range(num_layers):
        # ---- hoisted input projection: ONE big MXU matmul per layer/chunk ----
        if l == 0:
            inp = x_ref[...].reshape(TC * bt, DP)
            w_in = wih0_ref[...]
        else:
            inp = seq_scr[...].reshape(TC * bt, HP)
            w_in = wihr_ref[l - 1]
        gx_scr[...] = jnp.dot(
            inp, w_in, preferred_element_type=jnp.float32).reshape(TC, bt, GP)

        whh_l = whh_ref[l]                                     # (HP, GP) bf16
        bias_l = jnp.broadcast_to(b_ref[l], (bt, GP))          # hoisted broadcast

        # ---- serial recurrence: one small matmul + elementwise per step ----
        def step(t, carry):
            h_prev, c_prev = carry                             # f32 (bt, HP)
            gates = (gx_scr[t] + bias_l
                     + jnp.dot(h_prev.astype(whh_l.dtype), whh_l,
                               preferred_element_type=jnp.float32))
            # gate order [i, f, o, g]: one sigmoid pass, one tanh pass (EUP)
            sig = jax.nn.sigmoid(gates[:, 0:3 * HP])
            i_g = sig[:, 0:HP]
            f_g = sig[:, HP:2 * HP]
            o_g = sig[:, 2 * HP:3 * HP]
            g_g = jnp.tanh(gates[:, 3 * HP:4 * HP])
            c_new = f_g * c_prev + i_g * g_g
            h_new = o_g * jnp.tanh(c_new)
            seq_scr[t] = h_new.astype(seq_scr.dtype)           # lane-dense store
            return (h_new, c_new)

        h_fin, c_fin = lax.fori_loop(0, TC, step,
                                     (h_state[l], c_state[l]), unroll=unroll)
        h_state[l] = h_fin
        c_state[l] = c_fin

    # ---- FC head, fused, on the whole chunk (wrapper slices last T_keep) ----
    y = jnp.dot(seq_scr[...].reshape(TC * bt, HP), wfc_ref[...],
                preferred_element_type=jnp.float32)
    out_ref[...] = (y.reshape(TC, bt, -1) + bfc_ref[...]).astype(out_ref.dtype)


# ----------------------------------------------------------------------------
# Parameter preparation (pad / reorder / stack into lane-aligned kernel layout)
# ----------------------------------------------------------------------------
def _pad_gate_cols(w, H, HP):
    """w: (rows, 4H) with torch gate order [i,f,g,o] along columns ->
    reorder to [i,f,o,g] and zero-pad each gate block to HP lanes."""
    order = (0, 1, 3, 2)
    parts = [jnp.pad(w[:, k * H:(k + 1) * H], ((0, 0), (0, HP - H)))
             for k in order]
    return jnp.concatenate(parts, axis=1)


def prepare_params(params, input_dim, hidden_dim, output_dim,
                   mxu_dtype=jnp.bfloat16):
    H = hidden_dim
    HP = _round_up(H, 128)
    DP = _round_up(input_dim, 128)
    OP = _round_up(output_dim, 128)
    GP = 4 * HP
    layers = params["lstm"]
    L = len(layers)

    # layer-0 input weights: (input_dim, 4H) -> (DP, GP)
    wih0 = jnp.pad(_pad_gate_cols(layers[0][0], H, HP),
                   ((0, DP - input_dim), (0, 0))).astype(mxu_dtype)

    # layers >= 1 input weights: (H, 4H) -> (L-1, HP, GP) (dummy zeros if L == 1)
    if L > 1:
        wihr = jnp.stack([jnp.pad(_pad_gate_cols(layers[l][0], H, HP),
                                  ((0, HP - H), (0, 0))) for l in range(1, L)])
    else:
        wihr = jnp.zeros((1, HP, GP), jnp.float32)
    wihr = wihr.astype(mxu_dtype)

    whh = jnp.stack([jnp.pad(_pad_gate_cols(layers[l][1], H, HP),
                             ((0, HP - H), (0, 0)))
                     for l in range(L)]).astype(mxu_dtype)

    # biases (bias_ih + bias_hh), gate-aligned, NOT replicated (broadcast in-kernel)
    bias = jnp.stack([_pad_gate_cols(layers[l][2], H, HP)
                      for l in range(L)]).astype(jnp.float32)     # (L, 1, GP)

    w_fc_t, b_fc = params["fc"]                                   # (H, O), (1, O)
    wfc = jnp.pad(w_fc_t, ((0, HP - H), (0, OP - output_dim))).astype(mxu_dtype)
    bfc = jnp.pad(b_fc, ((0, 0), (0, OP - output_dim))).astype(jnp.float32)

    return dict(wih0=wih0, wihr=wihr, whh=whh, bias=bias, wfc=wfc, bfc=bfc,
                mxu_dtype=mxu_dtype,
                dims=dict(H=H, HP=HP, DP=DP, OP=OP, GP=GP, L=L,
                          input_dim=input_dim, output_dim=output_dim))


# ----------------------------------------------------------------------------
# Forward wrapper (single fused pallas_call)
# ----------------------------------------------------------------------------
def lstm_forward(kp, x, output_sequence_length=60):
    """x: (B, T, D_in) float32, batch-first like the PyTorch module."""
    d = kp["dims"]
    HP, DP, OP, GP, L = d["HP"], d["DP"], d["OP"], d["GP"], d["L"]
    mxu_dtype = kp["mxu_dtype"]
    B, T, Din = x.shape
    T_keep = min(T, output_sequence_length)
    LR = kp["wihr"].shape[0]

    # Batch tile: as large as possible (feed the MXU / amortize grid overhead),
    # but keep >= 2 grid steps on the "parallel" axis when the batch is large
    # (v7x has 2 TensorCores).
    B8 = _round_up(B, 8)
    bt = min(128, B8)
    if B8 // bt < 2 and B8 >= 32:
        bt = _round_up(B8 // 2, 8)
    BP = _round_up(B, bt)

    # Time chunk: bound per-chunk VMEM slabs (mandatory for long T on v7x).
    per_step_bytes = bt * (GP * 4 + HP * 2 + 2 * DP * 2 + 2 * OP * 4)
    tc = max(1, min(T, 128, (24 << 20) // per_step_bytes))
    NC = pl.cdiv(T, tc)
    TP = NC * tc

    # time-major; pad time -> TP, batch -> BP, features -> DP (lane-aligned)
    x_tm = jnp.transpose(x.astype(jnp.float32), (1, 0, 2))
    x_tm = jnp.pad(x_tm, ((0, TP - T), (0, BP - B),
                          (0, DP - Din))).astype(mxu_dtype)

    kernel = functools.partial(_fused_lstm_kernel, L, HP, min(tc, 8))

    flops = int(2 * TP * BP * GP * (DP + (2 * L - 1) * HP)
                + 2 * TP * BP * HP * OP)
    transcendentals = int(L * TP * BP * 5 * HP)
    weight_bytes = sum(kp[k].size * kp[k].dtype.itemsize
                       for k in ("wih0", "wihr", "whh", "bias", "wfc", "bfc"))
    bytes_accessed = int(x_tm.size * x_tm.dtype.itemsize + weight_bytes
                         + TP * BP * OP * 4)

    # Explicit scoped-VMEM budget (scratch slabs + double-buffered blocks).
    vmem_need = (2 * tc * bt * DP * x_tm.dtype.itemsize      # x block (2 bufs)
                 + 2 * tc * bt * OP * 4                      # out block (2 bufs)
                 + 2 * weight_bytes                          # weights (2 bufs)
                 + tc * bt * GP * 4                          # gx scratch
                 + tc * bt * HP * 2                          # hidden-seq scratch
                 + 2 * L * bt * HP * 4)                      # h/c state
    vmem_limit = int(min(max(vmem_need * 5 // 4 + (4 << 20), 32 << 20), 64 << 20))

    out = pl.pallas_call(
        kernel,
        out_shape=jax.ShapeDtypeStruct((TP, BP, OP), jnp.float32),
        grid_spec=pltpu.PrefetchScalarGridSpec(
            num_scalar_prefetch=0,
            grid=(BP // bt, NC),                             # (batch tile, T chunk)
            in_specs=[
                pl.BlockSpec((tc, bt, DP), lambda b, t: (t, b, 0)),   # x chunk
                pl.BlockSpec((DP, GP), lambda b, t: (0, 0)),          # wih0
                pl.BlockSpec((LR, HP, GP), lambda b, t: (0, 0, 0)),   # wih rest
                pl.BlockSpec((L, HP, GP), lambda b, t: (0, 0, 0)),    # whh
                pl.BlockSpec((L, 1, GP), lambda b, t: (0, 0, 0)),     # bias
                pl.BlockSpec((HP, OP), lambda b, t: (0, 0)),          # fc weight
                pl.BlockSpec((1, OP), lambda b, t: (0, 0)),           # fc bias
            ],
            out_specs=pl.BlockSpec((tc, bt, OP), lambda b, t: (t, b, 0)),
            scratch_shapes=[
                pltpu.VMEM((tc, bt, GP), jnp.float32),   # hoisted gates_x chunk
                pltpu.VMEM((tc, bt, HP), mxu_dtype),     # hidden-seq chunk slab
                pltpu.VMEM((L, bt, HP), jnp.float32),    # h state (persists)
                pltpu.VMEM((L, bt, HP), jnp.float32),    # c state (persists)
            ]),
        compiler_params=pltpu.CompilerParams(
            dimension_semantics=("parallel", "arbitrary"),
            vmem_limit_bytes=vmem_limit),
        cost_estimate=pl.CostEstimate(flops=flops,
                                      transcendentals=transcendentals,
                                      bytes_accessed=bytes_accessed),
    )(x_tm, kp["wih0"], kp["wihr"], kp["whh"], kp["bias"], kp["wfc"], kp["bfc"])

    # drop time/batch/feature padding, keep last T_keep steps, back to batch-first
    out = out[T - T_keep:T, :B, :d["output_dim"]]
    return jnp.transpose(out, (1, 0, 2))


# ----------------------------------------------------------------------------
# Deterministic parameter init (matches torch.nn.LSTM / nn.Linear shapes)
# ----------------------------------------------------------------------------
def init_params(key, input_dim, hidden_dim, num_layers, output_dim):
    scale = 1.0 / math.sqrt(hidden_dim)
    layers = []
    for layer in range(num_layers):
        in_dim = input_dim if layer == 0 else hidden_dim
        key, k1, k2, k3, k4 = jax.random.split(key, 5)
        w_ih = jax.random.uniform(k1, (4 * hidden_dim, in_dim),
                                  minval=-scale, maxval=scale, dtype=jnp.float32)
        w_hh = jax.random.uniform(k2, (4 * hidden_dim, hidden_dim),
                                  minval=-scale, maxval=scale, dtype=jnp.float32)
        b_ih = jax.random.uniform(k3, (4 * hidden_dim,), minval=-scale,
                                  maxval=scale, dtype=jnp.float32)
        b_hh = jax.random.uniform(k4, (4 * hidden_dim,), minval=-scale,
                                  maxval=scale, dtype=jnp.float32)
        layers.append((w_ih.T, w_hh.T, (b_ih + b_hh)[None, :]))

    key, k1, k2 = jax.random.split(key, 3)
    w_fc = jax.random.uniform(k1, (output_dim, hidden_dim), minval=-scale,
                              maxval=scale, dtype=jnp.float32)
    b_fc = jax.random.uniform(k2, (output_dim,), minval=-scale, maxval=scale,
                              dtype=jnp.float32)
    return {"lstm": layers, "fc": (w_fc.T, b_fc[None, :])}


# ----------------------------------------------------------------------------
# Pure-JAX reference (for the correctness check)
# ----------------------------------------------------------------------------
def lstm_forward_ref(params, x, hidden_dim, output_sequence_length=60):
    x = x.astype(jnp.float32)
    B = x.shape[0]
    h_seq = jnp.transpose(x, (1, 0, 2))
    for (w_ih_t, w_hh_t, bias) in params["lstm"]:
        def step(carry, x_t):
            h_prev, c_prev = carry
            gates = x_t @ w_ih_t + h_prev @ w_hh_t + bias
            i, f, g, o = jnp.split(gates, 4, axis=-1)
            c = jax.nn.sigmoid(f) * c_prev + jax.nn.sigmoid(i) * jnp.tanh(g)
            h = jax.nn.sigmoid(o) * jnp.tanh(c)
            return (h, c), h
        init = (jnp.zeros((B, hidden_dim), jnp.float32),
                jnp.zeros((B, hidden_dim), jnp.float32))
        _, h_seq = lax.scan(step, init, h_seq)
    w_fc_t, b_fc = params["fc"]
    out = h_seq @ w_fc_t + b_fc
    out = jnp.transpose(out, (1, 0, 2))
    if out.shape[1] > output_sequence_length:
        out = out[:, -output_sequence_length:, :]
    return out


# ----------------------------------------------------------------------------
if __name__ == "__main__":
    input_dim = 4
    hidden_dim = 32
    num_layers = 2
    output_dim = 4
    batch = 2
    seq = 8

    key = jax.random.PRNGKey(0)
    pkey, xkey = jax.random.split(key)
    params = init_params(pkey, input_dim, hidden_dim, num_layers, output_dim)
    kparams = prepare_params(params, input_dim, hidden_dim, output_dim)
    x = jax.random.normal(xkey, (batch, seq, input_dim), dtype=jnp.float32)

    out = lstm_forward(kparams, x, output_sequence_length=60)
    out = jax.block_until_ready(out)
    assert out.shape == (batch, seq, output_dim), out.shape

    # Reference with the same bf16 rounding applied to the MXU operands
    # (bf16 MXU inputs => tolerance loosened per the perf review).
    def _q(a):
        return a.astype(jnp.bfloat16).astype(jnp.float32)
    params_q = {"lstm": [(_q(w), _q(u), b) for (w, u, b) in params["lstm"]],
                "fc": (_q(params["fc"][0]), params["fc"][1])}
    ref = lstm_forward_ref(params_q, _q(x), hidden_dim, output_sequence_length=60)

    err = float(jnp.max(jnp.abs(out - ref)))
    assert jnp.allclose(out, ref, atol=5e-2, rtol=5e-2), err

    print("KERNEL_OK")
</pallas_src>

<mosaic_0001>
module attributes {stable_mosaic.version = 11 : i64} {
  func.func @_fused_lstm_kernel(%arg0: i32, %arg1: i32, %arg2: memref<8x8x128xbf16, #tpu.memory_space<vmem>>, %arg3: memref<128x512xbf16, #tpu.memory_space<vmem>>, %arg4: memref<1x128x512xbf16, #tpu.memory_space<vmem>>, %arg5: memref<2x128x512xbf16, #tpu.memory_space<vmem>>, %arg6: memref<2x1x512xf32, #tpu.memory_space<vmem>>, %arg7: memref<128x128xbf16, #tpu.memory_space<vmem>>, %arg8: memref<1x128xf32, #tpu.memory_space<vmem>>, %arg9: memref<8x8x128xf32, #tpu.memory_space<vmem>>, %arg10: memref<8x8x512xf32, #tpu.memory_space<vmem>>, %arg11: memref<8x8x128xbf16, #tpu.memory_space<vmem>>, %arg12: memref<2x8x128xf32, #tpu.memory_space<vmem>>, %arg13: memref<2x8x128xf32, #tpu.memory_space<vmem>>) attributes {dimension_semantics = [#tpu.dimension_semantics<parallel>, #tpu.dimension_semantics<arbitrary>], iteration_bounds = array<i64: 1, 1>, scalar_prefetch = 0 : i64, scratch_operands = 4 : i64, tpu.core_type = #tpu.core_type<tc>, window_params = [{transform_indices = @transform_0, window_bounds = array<i64: 8, 8, 128>}, {pipeline_mode = #tpu.pipeline_mode<synchronous>, transform_indices = @transform_1, window_bounds = array<i64: 128, 512>}, {pipeline_mode = #tpu.pipeline_mode<synchronous>, transform_indices = @transform_2, window_bounds = array<i64: 1, 128, 512>}, {pipeline_mode = #tpu.pipeline_mode<synchronous>, transform_indices = @transform_3, window_bounds = array<i64: 2, 128, 512>}, {pipeline_mode = #tpu.pipeline_mode<synchronous>, transform_indices = @transform_4, window_bounds = array<i64: 2, 1, 512>}, {pipeline_mode = #tpu.pipeline_mode<synchronous>, transform_indices = @transform_5, window_bounds = array<i64: 128, 128>}, {pipeline_mode = #tpu.pipeline_mode<synchronous>, transform_indices = @transform_6, window_bounds = array<i64: 1, 128>}, {transform_indices = @transform_7, window_bounds = array<i64: 8, 8, 128>}]} {
    %c0_i32 = arith.constant 0 : i32
    %0 = arith.cmpi eq, %arg1, %c0_i32 : i32
    %1 = arith.extui %0 : i1 to i32
    %c0_i32_0 = arith.constant 0 : i32
    %2 = arith.cmpi ne, %1, %c0_i32_0 : i32
    scf.if %2 {
      %cst_170 = arith.constant 0.000000e+00 : f32
      %506 = vector.broadcast %cst_170 : f32 to vector<2x8x128xf32>
      %c0_171 = arith.constant 0 : index
      %c0_172 = arith.constant 0 : index
      %c0_173 = arith.constant 0 : index
      %507 = vector.load %arg12[%c0_171, %c0_172, %c0_173] : memref<2x8x128xf32, #tpu.memory_space<vmem>>, vector<2x8x128xf32>
      tpu.vector_store %arg12[%c0_171, %c0_172, %c0_173], %506 {strides = array<i32>} : memref<2x8x128xf32, #tpu.memory_space<vmem>>, vector<2x8x128xf32>,
      %cst_174 = arith.constant 0.000000e+00 : f32
      %508 = vector.broadcast %cst_174 : f32 to vector<2x8x128xf32>
      %c0_175 = arith.constant 0 : index
      %c0_176 = arith.constant 0 : index
      %c0_177 = arith.constant 0 : index
      %509 = vector.load %arg13[%c0_175, %c0_176, %c0_177] : memref<2x8x128xf32, #tpu.memory_space<vmem>>, vector<2x8x128xf32>
      tpu.vector_store %arg13[%c0_175, %c0_176, %c0_177], %508 {strides = array<i32>} : memref<2x8x128xf32, #tpu.memory_space<vmem>>, vector<2x8x128xf32>,
    } else {
    }
    %c0 = arith.constant 0 : index
    %c0_1 = arith.constant 0 : index
    %c0_2 = arith.constant 0 : index
    %3 = vector.load %arg2[%c0, %c0_1, %c0_2] : memref<8x8x128xbf16, #tpu.memory_space<vmem>>, vector<8x8x128xbf16>
    %4 = vector.shape_cast %3 : vector<8x8x128xbf16> to vector<64x128xbf16>
    %c0_3 = arith.constant 0 : index
    %c0_4 = arith.constant 0 : index
    %5 = vector.load %arg3[%c0_3, %c0_4] : memref<128x512xbf16, #tpu.memory_space<vmem>>, vector<128x512xbf16>
    %cst = arith.constant dense<0.000000e+00> : vector<64x512xf32>
    %6 = tpu.matmul %4, %5, %cst {dimension_numbers = #tpu.dot_dimension_numbers<[1], [0], [0], [1], [0, 0, 1, 1], [], []>} : vector<64x128xbf16>, vector<128x512xbf16>, vector<64x512xf32> -> vector<64x512xf32>
    %7 = vector.shape_cast %6 : vector<64x512xf32> to vector<8x8x512xf32>
    %c0_5 = arith.constant 0 : index
    %c0_6 = arith.constant 0 : index
    %c0_7 = arith.constant 0 : index
    %8 = vector.load %arg10[%c0_5, %c0_6, %c0_7] : memref<8x8x512xf32, #tpu.memory_space<vmem>>, vector<8x8x512xf32>
    tpu.vector_store %arg10[%c0_5, %c0_6, %c0_7], %7 {strides = array<i32>} : memref<8x8x512xf32, #tpu.memory_space<vmem>>, vector<8x8x512xf32>,
    %c0_8 = arith.constant 0 : index
    %c0_9 = arith.constant 0 : index
    %c0_10 = arith.constant 0 : index
    %9 = vector.load %arg5[%c0_8, %c0_9, %c0_10] : memref<2x128x512xbf16, #tpu.memory_space<vmem>>, vector<1x128x512xbf16>
    %10 = vector.shape_cast %9 : vector<1x128x512xbf16> to vector<128x512xbf16>
    %c0_11 = arith.constant 0 : index
    %c0_12 = arith.constant 0 : index
    %c0_13 = arith.constant 0 : index
    %11 = vector.load %arg6[%c0_11, %c0_12, %c0_13] : memref<2x1x512xf32, #tpu.memory_space<vmem>>, vector<1x1x512xf32>
    %12 = vector.shape_cast %11 : vector<1x1x512xf32> to vector<1x512xf32>
    %13 = vector.shape_cast %12 : vector<1x512xf32> to vector<1x512xf32>
    %14 = vector.broadcast %13 : vector<1x512xf32> to vector<8x512xf32>
    %c0_14 = arith.constant 0 : index
    %c0_15 = arith.constant 0 : index
    %c0_16 = arith.constant 0 : index
    %15 = vector.load %arg12[%c0_14, %c0_15, %c0_16] : memref<2x8x128xf32, #tpu.memory_space<vmem>>, vector<1x8x128xf32>
    %16 = vector.shape_cast %15 : vector<1x8x128xf32> to vector<8x128xf32>
    %c0_17 = arith.constant 0 : index
    %c0_18 = arith.constant 0 : index
    %c0_19 = arith.constant 0 : index
    %17 = vector.load %arg13[%c0_17, %c0_18, %c0_19] : memref<2x8x128xf32, #tpu.memory_space<vmem>>, vector<1x8x128xf32>
    %18 = vector.shape_cast %17 : vector<1x8x128xf32> to vector<8x128xf32>
    %c0_i32_20 = arith.constant 0 : i32
    %19 = arith.index_cast %c0_i32_20 : i32 to index
    %c0_21 = arith.constant 0 : index
    %c0_22 = arith.constant 0 : index
    %20 = vector.load %arg10[%19, %c0_21, %c0_22] : memref<8x8x512xf32, #tpu.memory_space<vmem>>, vector<1x8x512xf32>
    %21 = vector.shape_cast %20 : vector<1x8x512xf32> to vector<8x512xf32>
    %22 = arith.addf %21, %14 : vector<8x512xf32>
    %23 = arith.truncf %16 : vector<8x128xf32> to vector<8x128xbf16>
    %cst_23 = arith.constant dense<0.000000e+00> : vector<8x512xf32>
    %24 = tpu.matmul %23, %10, %cst_23 {dimension_numbers = #tpu.dot_dimension_numbers<[1], [0], [0], [1], [0, 0, 1, 1], [], []>} : vector<8x128xbf16>, vector<128x512xbf16>, vector<8x512xf32> -> vector<8x512xf32>
    %25 = arith.addf %22, %24 : vector<8x512xf32>
    %26 = vector.extract_strided_slice %25 {offsets = [0, 0], sizes = [8, 384], strides = [1, 1]} : vector<8x512xf32> to vector<8x384xf32>
    %27 = arith.negf %26 : vector<8x384xf32>
    %28 = math.exp %27 : vector<8x384xf32>
    %cst_24 = arith.constant 1.000000e+00 : f32
    %29 = vector.broadcast %cst_24 : f32 to vector<8x384xf32>
    %30 = arith.addf %29, %28 : vector<8x384xf32>
    %31 = arith.divf %29, %30 : vector<8x384xf32>
    %32 = vector.extract_strided_slice %31 {offsets = [0, 0], sizes = [8, 128], strides = [1, 1]} : vector<8x384xf32> to vector<8x128xf32>
    %33 = vector.extract_strided_slice %31 {offsets = [0, 128], sizes = [8, 128], strides = [1, 1]} : vector<8x384xf32> to vector<8x128xf32>
    %34 = vector.extract_strided_slice %31 {offsets = [0, 256], sizes = [8, 128], strides = [1, 1]} : vector<8x384xf32> to vector<8x128xf32>
    %35 = vector.extract_strided_slice %25 {offsets = [0, 384], sizes = [8, 128], strides = [1, 1]} : vector<8x512xf32> to vector<8x128xf32>
    %36 = math.tanh %35 : vector<8x128xf32>
    %37 = arith.mulf %33, %18 : vector<8x128xf32>
    %38 = arith.mulf %32, %36 : vector<8x128xf32>
    %39 = arith.addf %37, %38 : vector<8x128xf32>
    %40 = math.tanh %39 : vector<8x128xf32>
    %41 = arith.mulf %34, %40 : vector<8x128xf32>
    %42 = arith.truncf %41 : vector<8x128xf32> to vector<8x128xbf16>
    %43 = arith.index_cast %c0_i32_20 : i32 to index
    %c0_25 = arith.constant 0 : index
    %c0_26 = arith.constant 0 : index
    %44 = vector.load %arg11[%43, %c0_25, %c0_26] : memref<8x8x128xbf16, #tpu.memory_space<vmem>>, vector<1x8x128xbf16>
    %45 = vector.shape_cast %44 : vector<1x8x128xbf16> to vector<8x128xbf16>
    %46 = vector.shape_cast %42 : vector<8x128xbf16> to vector<1x8x128xbf16>
    tpu.vector_store %arg11[%43, %c0_25, %c0_26], %46 {strides = array<i32>} : memref<8x8x128xbf16, #tpu.memory_space<vmem>>, vector<1x8x128xbf16>,
    %c1_i32 = arith.constant 1 : i32
    %47 = arith.index_cast %c1_i32 : i32 to index
    %c0_27 = arith.constant 0 : index
    %c0_28 = arith.constant 0 : index
    %48 = vector.load %arg10[%47, %c0_27, %c0_28] : memref<8x8x512xf32, #tpu.memory_space<vmem>>, vector<1x8x512xf32>
    %49 = vector.shape_cast %48 : vector<1x8x512xf32> to vector<8x512xf32>
    %50 = arith.addf %49, %14 : vector<8x512xf32>
    %51 = arith.truncf %41 : vector<8x128xf32> to vector<8x128xbf16>
    %cst_29 = arith.constant dense<0.000000e+00> : vector<8x512xf32>
    %52 = tpu.matmul %51, %10, %cst_29 {dimension_numbers = #tpu.dot_dimension_numbers<[1], [0], [0], [1], [0, 0, 1, 1], [], []>} : vector<8x128xbf16>, vector<128x512xbf16>, vector<8x512xf32> -> vector<8x512xf32>
    %53 = arith.addf %50, %52 : vector<8x512xf32>
    %54 = vector.extract_strided_slice %53 {offsets = [0, 0], sizes = [8, 384], strides = [1, 1]} : vector<8x512xf32> to vector<8x384xf32>
    %55 = arith.negf %54 : vector<8x384xf32>
    %56 = math.exp %55 : vector<8x384xf32>
    %cst_30 = arith.constant 1.000000e+00 : f32
    %57 = vector.broadcast %cst_30 : f32 to vector<8x384xf32>
    %58 = arith.addf %57, %56 : vector<8x384xf32>
    %59 = arith.divf %57, %58 : vector<8x384xf32>
    %60 = vector.extract_strided_slice %59 {offsets = [0, 0], sizes = [8, 128], strides = [1, 1]} : vector<8x384xf32> to vector<8x128xf32>
    %61 = vector.extract_strided_slice %59 {offsets = [0, 128], sizes = [8, 128], strides = [1, 1]} : vector<8x384xf32> to vector<8x128xf32>
    %62 = vector.extract_strided_slice %59 {offsets = [0, 256], sizes = [8, 128], strides = [1, 1]} : vector<8x384xf32> to vector<8x128xf32>
    %63 = vector.extract_strided_slice %53 {offsets = [0, 384], sizes = [8, 128], strides = [1, 1]} : vector<8x512xf32> to vector<8x128xf32>
    %64 = math.tanh %63 : vector<8x128xf32>
    %65 = arith.mulf %61, %39 : vector<8x128xf32>
    %66 = arith.mulf %60, %64 : vector<8x128xf32>
    %67 = arith.addf %65, %66 : vector<8x128xf32>
    %68 = math.tanh %67 : vector<8x128xf32>
    %69 = arith.mulf %62, %68 : vector<8x128xf32>
    %70 = arith.truncf %69 : vector<8x128xf32> to vector<8x128xbf16>
    %71 = arith.index_cast %c1_i32 : i32 to index
    %c0_31 = arith.constant 0 : index
    %c0_32 = arith.constant 0 : index
    %72 = vector.load %arg11[%71, %c0_31, %c0_32] : memref<8x8x128xbf16, #tpu.memory_space<vmem>>, vector<1x8x128xbf16>
    %73 = vector.shape_cast %72 : vector<1x8x128xbf16> to vector<8x128xbf16>
    %74 = vector.shape_cast %70 : vector<8x128xbf16> to vector<1x8x128xbf16>
    tpu.vector_store %arg11[%71, %c0_31, %c0_32], %74 {strides = array<i32>} : memref<8x8x128xbf16, #tpu.memory_space<vmem>>, vector<1x8x128xbf16>,
    %c2_i32 = arith.constant 2 : i32
    %75 = arith.index_cast %c2_i32 : i32 to index
    %c0_33 = arith.constant 0 : index
    %c0_34 = arith.constant 0 : index
    %76 = vector.load %arg10[%75, %c0_33, %c0_34] : memref<8x8x512xf32, #tpu.memory_space<vmem>>, vector<1x8x512xf32>
    %77 = vector.shape_cast %76 : vector<1x8x512xf32> to vector<8x512xf32>
    %78 = arith.addf %77, %14 : vector<8x512xf32>
    %79 = arith.truncf %69 : vector<8x128xf32> to vector<8x128xbf16>
    %cst_35 = arith.constant dense<0.000000e+00> : vector<8x512xf32>
    %80 = tpu.matmul %79, %10, %cst_35 {dimension_numbers = #tpu.dot_dimension_numbers<[1], [0], [0], [1], [0, 0, 1, 1], [], []>} : vector<8x128xbf16>, vector<128x512xbf16>, vector<8x512xf32> -> vector<8x512xf32>
    %81 = arith.addf %78, %80 : vector<8x512xf32>
    %82 = vector.extract_strided_slice %81 {offsets = [0, 0], sizes = [8, 384], strides = [1, 1]} : vector<8x512xf32> to vector<8x384xf32>
    %83 = arith.negf %82 : vector<8x384xf32>
    %84 = math.exp %83 : vector<8x384xf32>
    %cst_36 = arith.constant 1.000000e+00 : f32
    %85 = vector.broadcast %cst_36 : f32 to vector<8x384xf32>
    %86 = arith.addf %85, %84 : vector<8x384xf32>
    %87 = arith.divf %85, %86 : vector<8x384xf32>
    %88 = vector.extract_strided_slice %87 {offsets = [0, 0], sizes = [8, 128], strides = [1, 1]} : vector<8x384xf32> to vector<8x128xf32>
    %89 = vector.extract_strided_slice %87 {offsets = [0, 128], sizes = [8, 128], strides = [1, 1]} : vector<8x384xf32> to vector<8x128xf32>
    %90 = vector.extract_strided_slice %87 {offsets = [0, 256], sizes = [8, 128], strides = [1, 1]} : vector<8x384xf32> to vector<8x128xf32>
    %91 = vector.extract_strided_slice %81 {offsets = [0, 384], sizes = [8, 128], strides = [1, 1]} : vector<8x512xf32> to vector<8x128xf32>
    %92 = math.tanh %91 : vector<8x128xf32>
    %93 = arith.mulf %89, %67 : vector<8x128xf32>
    %94 = arith.mulf %88, %92 : vector<8x128xf32>
    %95 = arith.addf %93, %94 : vector<8x128xf32>
    %96 = math.tanh %95 : vector<8x128xf32>
    %97 = arith.mulf %90, %96 : vector<8x128xf32>
    %98 = arith.truncf %97 : vector<8x128xf32> to vector<8x128xbf16>
    %99 = arith.index_cast %c2_i32 : i32 to index
    %c0_37 = arith.constant 0 : index
    %c0_38 = arith.constant 0 : index
    %100 = vector.load %arg11[%99, %c0_37, %c0_38] : memref<8x8x128xbf16, #tpu.memory_space<vmem>>, vector<1x8x128xbf16>
    %101 = vector.shape_cast %100 : vector<1x8x128xbf16> to vector<8x128xbf16>
    %102 = vector.shape_cast %98 : vector<8x128xbf16> to vector<1x8x128xbf16>
    tpu.vector_store %arg11[%99, %c0_37, %c0_38], %102 {strides = array<i32>} : memref<8x8x128xbf16, #tpu.memory_space<vmem>>, vector<1x8x128xbf16>,
    %c3_i32 = arith.constant 3 : i32
    %103 = arith.index_cast %c3_i32 : i32 to index
    %c0_39 = arith.constant 0 : index
    %c0_40 = arith.constant 0 : index
    %104 = vector.load %arg10[%103, %c0_39, %c0_40] : memref<8x8x512xf32, #tpu.memory_space<vmem>>, vector<1x8x512xf32>
    %105 = vector.shape_cast %104 : vector<1x8x512xf32> to vector<8x512xf32>
    %106 = arith.addf %105, %14 : vector<8x512xf32>
    %107 = arith.truncf %97 : vector<8x128xf32> to vector<8x128xbf16>
    %cst_41 = arith.constant dense<0.000000e+00> : vector<8x512xf32>
    %108 = tpu.matmul %107, %10, %cst_41 {dimension_numbers = #tpu.dot_dimension_numbers<[1], [0], [0], [1], [0, 0, 1, 1], [], []>} : vector<8x128xbf16>, vector<128x512xbf16>, vector<8x512xf32> -> vector<8x512xf32>
    %109 = arith.addf %106, %108 : vector<8x512xf32>
    %110 = vector.extract_strided_slice %109 {offsets = [0, 0], sizes = [8, 384], strides = [1, 1]} : vector<8x512xf32> to vector<8x384xf32>
    %111 = arith.negf %110 : vector<8x384xf32>
    %112 = math.exp %111 : vector<8x384xf32>
    %cst_42 = arith.constant 1.000000e+00 : f32
    %113 = vector.broadcast %cst_42 : f32 to vector<8x384xf32>
    %114 = arith.addf %113, %112 : vector<8x384xf32>
    %115 = arith.divf %113, %114 : vector<8x384xf32>
    %116 = vector.extract_strided_slice %115 {offsets = [0, 0], sizes = [8, 128], strides = [1, 1]} : vector<8x384xf32> to vector<8x128xf32>
    %117 = vector.extract_strided_slice %115 {offsets = [0, 128], sizes = [8, 128], strides = [1, 1]} : vector<8x384xf32> to vector<8x128xf32>
    %118 = vector.extract_strided_slice %115 {offsets = [0, 256], sizes = [8, 128], strides = [1, 1]} : vector<8x384xf32> to vector<8x128xf32>
    %119 = vector.extract_strided_slice %109 {offsets = [0, 384], sizes = [8, 128], strides = [1, 1]} : vector<8x512xf32> to vector<8x128xf32>
    %120 = math.tanh %119 : vector<8x128xf32>
    %121 = arith.mulf %117, %95 : vector<8x128xf32>
    %122 = arith.mulf %116, %120 : vector<8x128xf32>
    %123 = arith.addf %121, %122 : vector<8x128xf32>
    %124 = math.tanh %123 : vector<8x128xf32>
    %125 = arith.mulf %118, %124 : vector<8x128xf32>
    %126 = arith.truncf %125 : vector<8x128xf32> to vector<8x128xbf16>
    %127 = arith.index_cast %c3_i32 : i32 to index
    %c0_43 = arith.constant 0 : index
    %c0_44 = arith.constant 0 : index
    %128 = vector.load %arg11[%127, %c0_43, %c0_44] : memref<8x8x128xbf16, #tpu.memory_space<vmem>>, vector<1x8x128xbf16>
    %129 = vector.shape_cast %128 : vector<1x8x128xbf16> to vector<8x128xbf16>
    %130 = vector.shape_cast %126 : vector<8x128xbf16> to vector<1x8x128xbf16>
    tpu.vector_store %arg11[%127, %c0_43, %c0_44], %130 {strides = array<i32>} : memref<8x8x128xbf16, #tpu.memory_space<vmem>>, vector<1x8x128xbf16>,
    %c4_i32 = arith.constant 4 : i32
    %131 = arith.index_cast %c4_i32 : i32 to index
    %c0_45 = arith.constant 0 : index
    %c0_46 = arith.constant 0 : index
    %132 = vector.load %arg10[%131, %c0_45, %c0_46] : memref<8x8x512xf32, #tpu.memory_space<vmem>>, vector<1x8x512xf32>
    %133 = vector.shape_cast %132 : vector<1x8x512xf32> to vector<8x512xf32>
    %134 = arith.addf %133, %14 : vector<8x512xf32>
    %135 = arith.truncf %125 : vector<8x128xf32> to vector<8x128xbf16>
    %cst_47 = arith.constant dense<0.000000e+00> : vector<8x512xf32>
    %136 = tpu.matmul %135, %10, %cst_47 {dimension_numbers = #tpu.dot_dimension_numbers<[1], [0], [0], [1], [0, 0, 1, 1], [], []>} : vector<8x128xbf16>, vector<128x512xbf16>, vector<8x512xf32> -> vector<8x512xf32>
    %137 = arith.addf %134, %136 : vector<8x512xf32>
    %138 = vector.extract_strided_slice %137 {offsets = [0, 0], sizes = [8, 384], strides = [1, 1]} : vector<8x512xf32> to vector<8x384xf32>
    %139 = arith.negf %138 : vector<8x384xf32>
    %140 = math.exp %139 : vector<8x384xf32>
    %cst_48 = arith.constant 1.000000e+00 : f32
    %141 = vector.broadcast %cst_48 : f32 to vector<8x384xf32>
    %142 = arith.addf %141, %140 : vector<8x384xf32>
    %143 = arith.divf %141, %142 : vector<8x384xf32>
    %144 = vector.extract_strided_slice %143 {offsets = [0, 0], sizes = [8, 128], strides = [1, 1]} : vector<8x384xf32> to vector<8x128xf32>
    %145 = vector.extract_strided_slice %143 {offsets = [0, 128], sizes = [8, 128], strides = [1, 1]} : vector<8x384xf32> to vector<8x128xf32>
    %146 = vector.extract_strided_slice %143 {offsets = [0, 256], sizes = [8, 128], strides = [1, 1]} : vector<8x384xf32> to vector<8x128xf32>
    %147 = vector.extract_strided_slice %137 {offsets = [0, 384], sizes = [8, 128], strides = [1, 1]} : vector<8x512xf32> to vector<8x128xf32>
    %148 = math.tanh %147 : vector<8x128xf32>
    %149 = arith.mulf %145, %123 : vector<8x128xf32>
    %150 = arith.mulf %144, %148 : vector<8x128xf32>
    %151 = arith.addf %149, %150 : vector<8x128xf32>
    %152 = math.tanh %151 : vector<8x128xf32>
    %153 = arith.mulf %146, %152 : vector<8x128xf32>
    %154 = arith.truncf %153 : vector<8x128xf32> to vector<8x128xbf16>
    %155 = arith.index_cast %c4_i32 : i32 to index
    %c0_49 = arith.constant 0 : index
    %c0_50 = arith.constant 0 : index
    %156 = vector.load %arg11[%155, %c0_49, %c0_50] : memref<8x8x128xbf16, #tpu.memory_space<vmem>>, vector<1x8x128xbf16>
    %157 = vector.shape_cast %156 : vector<1x8x128xbf16> to vector<8x128xbf16>
    %158 = vector.shape_cast %154 : vector<8x128xbf16> to vector<1x8x128xbf16>
    tpu.vector_store %arg11[%155, %c0_49, %c0_50], %158 {strides = array<i32>} : memref<8x8x128xbf16, #tpu.memory_space<vmem>>, vector<1x8x128xbf16>,
    %c5_i32 = arith.constant 5 : i32
    %159 = arith.index_cast %c5_i32 : i32 to index
    %c0_51 = arith.constant 0 : index
    %c0_52 = arith.constant 0 : index
    %160 = vector.load %arg10[%159, %c0_51, %c0_52] : memref<8x8x512xf32, #tpu.memory_space<vmem>>, vector<1x8x512xf32>
    %161 = vector.shape_cast %160 : vector<1x8x512xf32> to vector<8x512xf32>
    %162 = arith.addf %161, %14 : vector<8x512xf32>
    %163 = arith.truncf %153 : vector<8x128xf32> to vector<8x128xbf16>
    %cst_53 = arith.constant dense<0.000000e+00> : vector<8x512xf32>
    %164 = tpu.matmul %163, %10, %cst_53 {dimension_numbers = #tpu.dot_dimension_numbers<[1], [0], [0], [1], [0, 0, 1, 1], [], []>} : vector<8x128xbf16>, vector<128x512xbf16>, vector<8x512xf32> -> vector<8x512xf32>
    %165 = arith.addf %162, %164 : vector<8x512xf32>
    %166 = vector.extract_strided_slice %165 {offsets = [0, 0], sizes = [8, 384], strides = [1, 1]} : vector<8x512xf32> to vector<8x384xf32>
    %167 = arith.negf %166 : vector<8x384xf32>
    %168 = math.exp %167 : vector<8x384xf32>
    %cst_54 = arith.constant 1.000000e+00 : f32
    %169 = vector.broadcast %cst_54 : f32 to vector<8x384xf32>
    %170 = arith.addf %169, %168 : vector<8x384xf32>
    %171 = arith.divf %169, %170 : vector<8x384xf32>
    %172 = vector.extract_strided_slice %171 {offsets = [0, 0], sizes = [8, 128], strides = [1, 1]} : vector<8x384xf32> to vector<8x128xf32>
    %173 = vector.extract_strided_slice %171 {offsets = [0, 128], sizes = [8, 128], strides = [1, 1]} : vector<8x384xf32> to vector<8x128xf32>
    %174 = vector.extract_strided_slice %171 {offsets = [0, 256], sizes = [8, 128], strides = [1, 1]} : vector<8x384xf32> to vector<8x128xf32>
    %175 = vector.extract_strided_slice %165 {offsets = [0, 384], sizes = [8, 128], strides = [1, 1]} : vector<8x512xf32> to vector<8x128xf32>
    %176 = math.tanh %175 : vector<8x128xf32>
    %177 = arith.mulf %173, %151 : vector<8x128xf32>
    %178 = arith.mulf %172, %176 : vector<8x128xf32>
    %179 = arith.addf %177, %178 : vector<8x128xf32>
    %180 = math.tanh %179 : vector<8x128xf32>
    %181 = arith.mulf %174, %180 : vector<8x128xf32>
    %182 = arith.truncf %181 : vector<8x128xf32> to vector<8x128xbf16>
    %183 = arith.index_cast %c5_i32 : i32 to index
    %c0_55 = arith.constant 0 : index
    %c0_56 = arith.constant 0 : index
    %184 = vector.load %arg11[%183, %c0_55, %c0_56] : memref<8x8x128xbf16, #tpu.memory_space<vmem>>, vector<1x8x128xbf16>
    %185 = vector.shape_cast %184 : vector<1x8x128xbf16> to vector<8x128xbf16>
    %186 = vector.shape_cast %182 : vector<8x128xbf16> to vector<1x8x128xbf16>
    tpu.vector_store %arg11[%183, %c0_55, %c0_56], %186 {strides = array<i32>} : memref<8x8x128xbf16, #tpu.memory_space<vmem>>, vector<1x8x128xbf16>,
    %c6_i32 = arith.constant 6 : i32
    %187 = arith.index_cast %c6_i32 : i32 to index
    %c0_57 = arith.constant 0 : index
    %c0_58 = arith.constant 0 : index
    %188 = vector.load %arg10[%187, %c0_57, %c0_58] : memref<8x8x512xf32, #tpu.memory_space<vmem>>, vector<1x8x512xf32>
    %189 = vector.shape_cast %188 : vector<1x8x512xf32> to vector<8x512xf32>
    %190 = arith.addf %189, %14 : vector<8x512xf32>
    %191 = arith.truncf %181 : vector<8x128xf32> to vector<8x128xbf16>
    %cst_59 = arith.constant dense<0.000000e+00> : vector<8x512xf32>
    %192 = tpu.matmul %191, %10, %cst_59 {dimension_numbers = #tpu.dot_dimension_numbers<[1], [0], [0], [1], [0, 0, 1, 1], [], []>} : vector<8x128xbf16>, vector<128x512xbf16>, vector<8x512xf32> -> vector<8x512xf32>
    %193 = arith.addf %190, %192 : vector<8x512xf32>
    %194 = vector.extract_strided_slice %193 {offsets = [0, 0], sizes = [8, 384], strides = [1, 1]} : vector<8x512xf32> to vector<8x384xf32>
    %195 = arith.negf %194 : vector<8x384xf32>
    %196 = math.exp %195 : vector<8x384xf32>
    %cst_60 = arith.constant 1.000000e+00 : f32
    %197 = vector.broadcast %cst_60 : f32 to vector<8x384xf32>
    %198 = arith.addf %197, %196 : vector<8x384xf32>
    %199 = arith.divf %197, %198 : vector<8x384xf32>
    %200 = vector.extract_strided_slice %199 {offsets = [0, 0], sizes = [8, 128], strides = [1, 1]} : vector<8x384xf32> to vector<8x128xf32>
    %201 = vector.extract_strided_slice %199 {offsets = [0, 128], sizes = [8, 128], strides = [1, 1]} : vector<8x384xf32> to vector<8x128xf32>
    %202 = vector.extract_strided_slice %199 {offsets = [0, 256], sizes = [8, 128], strides = [1, 1]} : vector<8x384xf32> to vector<8x128xf32>
    %203 = vector.extract_strided_slice %193 {offsets = [0, 384], sizes = [8, 128], strides = [1, 1]} : vector<8x512xf32> to vector<8x128xf32>
    %204 = math.tanh %203 : vector<8x128xf32>
    %205 = arith.mulf %201, %179 : vector<8x128xf32>
    %206 = arith.mulf %200, %204 : vector<8x128xf32>
    %207 = arith.addf %205, %206 : vector<8x128xf32>
    %208 = math.tanh %207 : vector<8x128xf32>
    %209 = arith.mulf %202, %208 : vector<8x128xf32>
    %210 = arith.truncf %209 : vector<8x128xf32> to vector<8x128xbf16>
    %211 = arith.index_cast %c6_i32 : i32 to index
    %c0_61 = arith.constant 0 : index
    %c0_62 = arith.constant 0 : index
    %212 = vector.load %arg11[%211, %c0_61, %c0_62] : memref<8x8x128xbf16, #tpu.memory_space<vmem>>, vector<1x8x128xbf16>
    %213 = vector.shape_cast %212 : vector<1x8x128xbf16> to vector<8x128xbf16>
    %214 = vector.shape_cast %210 : vector<8x128xbf16> to vector<1x8x128xbf16>
    tpu.vector_store %arg11[%211, %c0_61, %c0_62], %214 {strides = array<i32>} : memref<8x8x128xbf16, #tpu.memory_space<vmem>>, vector<1x8x128xbf16>,
    %c7_i32 = arith.constant 7 : i32
    %215 = arith.index_cast %c7_i32 : i32 to index
    %c0_63 = arith.constant 0 : index
    %c0_64 = arith.constant 0 : index
    %216 = vector.load %arg10[%215, %c0_63, %c0_64] : memref<8x8x512xf32, #tpu.memory_space<vmem>>, vector<1x8x512xf32>
    %217 = vector.shape_cast %216 : vector<1x8x512xf32> to vector<8x512xf32>
    %218 = arith.addf %217, %14 : vector<8x512xf32>
    %219 = arith.truncf %209 : vector<8x128xf32> to vector<8x128xbf16>
    %cst_65 = arith.constant dense<0.000000e+00> : vector<8x512xf32>
    %220 = tpu.matmul %219, %10, %cst_65 {dimension_numbers = #tpu.dot_dimension_numbers<[1], [0], [0], [1], [0, 0, 1, 1], [], []>} : vector<8x128xbf16>, vector<128x512xbf16>, vector<8x512xf32> -> vector<8x512xf32>
    %221 = arith.addf %218, %220 : vector<8x512xf32>
    %222 = vector.extract_strided_slice %221 {offsets = [0, 0], sizes = [8, 384], strides = [1, 1]} : vector<8x512xf32> to vector<8x384xf32>
    %223 = arith.negf %222 : vector<8x384xf32>
    %224 = math.exp %223 : vector<8x384xf32>
    %cst_66 = arith.constant 1.000000e+00 : f32
    %225 = vector.broadcast %cst_66 : f32 to vector<8x384xf32>
    %226 = arith.addf %225, %224 : vector<8x384xf32>
    %227 = arith.divf %225, %226 : vector<8x384xf32>
    %228 = vector.extract_strided_slice %227 {offsets = [0, 0], sizes = [8, 128], strides = [1, 1]} : vector<8x384xf32> to vector<8x128xf32>
    %229 = vector.extract_strided_slice %227 {offsets = [0, 128], sizes = [8, 128], strides = [1, 1]} : vector<8x384xf32> to vector<8x128xf32>
    %230 = vector.extract_strided_slice %227 {offsets = [0, 256], sizes = [8, 128], strides = [1, 1]} : vector<8x384xf32> to vector<8x128xf32>
    %231 = vector.extract_strided_slice %221 {offsets = [0, 384], sizes = [8, 128], strides = [1, 1]} : vector<8x512xf32> to vector<8x128xf32>
    %232 = math.tanh %231 : vector<8x128xf32>
    %233 = arith.mulf %229, %207 : vector<8x128xf32>
    %234 = arith.mulf %228, %232 : vector<8x128xf32>
    %235 = arith.addf %233, %234 : vector<8x128xf32>
    %236 = math.tanh %235 : vector<8x128xf32>
    %237 = arith.mulf %230, %236 : vector<8x128xf32>
    %238 = arith.truncf %237 : vector<8x128xf32> to vector<8x128xbf16>
    %239 = arith.index_cast %c7_i32 : i32 to index
    %c0_67 = arith.constant 0 : index
    %c0_68 = arith.constant 0 : index
    %240 = vector.load %arg11[%239, %c0_67, %c0_68] : memref<8x8x128xbf16, #tpu.memory_space<vmem>>, vector<1x8x128xbf16>
    %241 = vector.shape_cast %240 : vector<1x8x128xbf16> to vector<8x128xbf16>
    %242 = vector.shape_cast %238 : vector<8x128xbf16> to vector<1x8x128xbf16>
    tpu.vector_store %arg11[%239, %c0_67, %c0_68], %242 {strides = array<i32>} : memref<8x8x128xbf16, #tpu.memory_space<vmem>>, vector<1x8x128xbf16>,
    %c8_i32 = arith.constant 8 : i32
    %c0_69 = arith.constant 0 : index
    %c0_70 = arith.constant 0 : index
    %c0_71 = arith.constant 0 : index
    %243 = vector.load %arg12[%c0_69, %c0_70, %c0_71] : memref<2x8x128xf32, #tpu.memory_space<vmem>>, vector<1x8x128xf32>
    %244 = vector.shape_cast %243 : vector<1x8x128xf32> to vector<8x128xf32>
    %245 = vector.shape_cast %237 : vector<8x128xf32> to vector<1x8x128xf32>
    tpu.vector_store %arg12[%c0_69, %c0_70, %c0_71], %245 {strides = array<i32>} : memref<2x8x128xf32, #tpu.memory_space<vmem>>, vector<1x8x128xf32>,
    %c0_72 = arith.constant 0 : index
    %c0_73 = arith.constant 0 : index
    %c0_74 = arith.constant 0 : index
    %246 = vector.load %arg13[%c0_72, %c0_73, %c0_74] : memref<2x8x128xf32, #tpu.memory_space<vmem>>, vector<1x8x128xf32>
    %247 = vector.shape_cast %246 : vector<1x8x128xf32> to vector<8x128xf32>
    %248 = vector.shape_cast %235 : vector<8x128xf32> to vector<1x8x128xf32>
    tpu.vector_store %arg13[%c0_72, %c0_73, %c0_74], %248 {strides = array<i32>} : memref<2x8x128xf32, #tpu.memory_space<vmem>>, vector<1x8x128xf32>,
    %c0_75 = arith.constant 0 : index
    %c0_76 = arith.constant 0 : index
    %c0_77 = arith.constant 0 : index
    %249 = vector.load %arg11[%c0_75, %c0_76, %c0_77] : memref<8x8x128xbf16, #tpu.memory_space<vmem>>, vector<8x8x128xbf16>
    %250 = vector.shape_cast %249 : vector<8x8x128xbf16> to vector<64x128xbf16>
    %c0_78 = arith.constant 0 : index
    %c0_79 = arith.constant 0 : index
    %c0_80 = arith.constant 0 : index
    %251 = vector.load %arg4[%c0_78, %c0_79, %c0_80] : memref<1x128x512xbf16, #tpu.memory_space<vmem>>, vector<1x128x512xbf16>
    %252 = vector.shape_cast %251 : vector<1x128x512xbf16> to vector<128x512xbf16>
    %cst_81 = arith.constant dense<0.000000e+00> : vector<64x512xf32>
    %253 = tpu.matmul %250, %252, %cst_81 {dimension_numbers = #tpu.dot_dimension_numbers<[1], [0], [0], [1], [0, 0, 1, 1], [], []>} : vector<64x128xbf16>, vector<128x512xbf16>, vector<64x512xf32> -> vector<64x512xf32>
    %254 = vector.shape_cast %253 : vector<64x512xf32> to vector<8x8x512xf32>
    %c0_82 = arith.constant 0 : index
    %c0_83 = arith.constant 0 : index
    %c0_84 = arith.constant 0 : index
    %255 = vector.load %arg10[%c0_82, %c0_83, %c0_84] : memref<8x8x512xf32, #tpu.memory_space<vmem>>, vector<8x8x512xf32>
    tpu.vector_store %arg10[%c0_82, %c0_83, %c0_84], %254 {strides = array<i32>} : memref<8x8x512xf32, #tpu.memory_space<vmem>>, vector<8x8x512xf32>,
    %c1 = arith.constant 1 : index
    %c0_85 = arith.constant 0 : index
    %c0_86 = arith.constant 0 : index
    %256 = vector.load %arg5[%c1, %c0_85, %c0_86] : memref<2x128x512xbf16, #tpu.memory_space<vmem>>, vector<1x128x512xbf16>
    %257 = vector.shape_cast %256 : vector<1x128x512xbf16> to vector<128x512xbf16>
    %c1_87 = arith.constant 1 : index
    %c0_88 = arith.constant 0 : index
    %c0_89 = arith.constant 0 : index
    %258 = vector.load %arg6[%c1_87, %c0_88, %c0_89] : memref<2x1x512xf32, #tpu.memory_space<vmem>>, vector<1x1x512xf32>
    %259 = vector.shape_cast %258 : vector<1x1x512xf32> to vector<1x512xf32>
    %260 = vector.shape_cast %259 : vector<1x512xf32> to vector<1x512xf32>
    %261 = vector.broadcast %260 : vector<1x512xf32> to vector<8x512xf32>
    %c1_90 = arith.constant 1 : index
    %c0_91 = arith.constant 0 : index
    %c0_92 = arith.constant 0 : index
    %262 = vector.load %arg12[%c1_90, %c0_91, %c0_92] : memref<2x8x128xf32, #tpu.memory_space<vmem>>, vector<1x8x128xf32>
    %263 = vector.shape_cast %262 : vector<1x8x128xf32> to vector<8x128xf32>
    %c1_93 = arith.constant 1 : index
    %c0_94 = arith.constant 0 : index
    %c0_95 = arith.constant 0 : index
    %264 = vector.load %arg13[%c1_93, %c0_94, %c0_95] : memref<2x8x128xf32, #tpu.memory_space<vmem>>, vector<1x8x128xf32>
    %265 = vector.shape_cast %264 : vector<1x8x128xf32> to vector<8x128xf32>
    %c0_i32_96 = arith.constant 0 : i32
    %266 = arith.index_cast %c0_i32_96 : i32 to index
    %c0_97 = arith.constant 0 : index
    %c0_98 = arith.constant 0 : index
    %267 = vector.load %arg10[%266, %c0_97, %c0_98] : memref<8x8x512xf32, #tpu.memory_space<vmem>>, vector<1x8x512xf32>
    %268 = vector.shape_cast %267 : vector<1x8x512xf32> to vector<8x512xf32>
    %269 = arith.addf %268, %261 : vector<8x512xf32>
    %270 = arith.truncf %263 : vector<8x128xf32> to vector<8x128xbf16>
    %cst_99 = arith.constant dense<0.000000e+00> : vector<8x512xf32>
    %271 = tpu.matmul %270, %257, %cst_99 {dimension_numbers = #tpu.dot_dimension_numbers<[1], [0], [0], [1], [0, 0, 1, 1], [], []>} : vector<8x128xbf16>, vector<128x512xbf16>, vector<8x512xf32> -> vector<8x512xf32>
    %272 = arith.addf %269, %271 : vector<8x512xf32>
    %273 = vector.extract_strided_slice %272 {offsets = [0, 0], sizes = [8, 384], strides = [1, 1]} : vector<8x512xf32> to vector<8x384xf32>
    %274 = arith.negf %273 : vector<8x384xf32>
    %275 = math.exp %274 : vector<8x384xf32>
    %cst_100 = arith.constant 1.000000e+00 : f32
    %276 = vector.broadcast %cst_100 : f32 to vector<8x384xf32>
    %277 = arith.addf %276, %275 : vector<8x384xf32>
    %278 = arith.divf %276, %277 : vector<8x384xf32>
    %279 = vector.extract_strided_slice %278 {offsets = [0, 0], sizes = [8, 128], strides = [1, 1]} : vector<8x384xf32> to vector<8x128xf32>
    %280 = vector.extract_strided_slice %278 {offsets = [0, 128], sizes = [8, 128], strides = [1, 1]} : vector<8x384xf32> to vector<8x128xf32>
    %281 = vector.extract_strided_slice %278 {offsets = [0, 256], sizes = [8, 128], strides = [1, 1]} : vector<8x384xf32> to vector<8x128xf32>
    %282 = vector.extract_strided_slice %272 {offsets = [0, 384], sizes = [8, 128], strides = [1, 1]} : vector<8x512xf32> to vector<8x128xf32>
    %283 = math.tanh %282 : vector<8x128xf32>
    %284 = arith.mulf %280, %265 : vector<8x128xf32>
    %285 = arith.mulf %279, %283 : vector<8x128xf32>
    %286 = arith.addf %284, %285 : vector<8x128xf32>
    %287 = math.tanh %286 : vector<8x128xf32>
    %288 = arith.mulf %281, %287 : vector<8x128xf32>
    %289 = arith.truncf %288 : vector<8x128xf32> to vector<8x128xbf16>
    %290 = arith.index_cast %c0_i32_96 : i32 to index
    %c0_101 = arith.constant 0 : index
    %c0_102 = arith.constant 0 : index
    %291 = vector.load %arg11[%290, %c0_101, %c0_102] : memref<8x8x128xbf16, #tpu.memory_space<vmem>>, vector<1x8x128xbf16>
    %292 = vector.shape_cast %291 : vector<1x8x128xbf16> to vector<8x128xbf16>
    %293 = vector.shape_cast %289 : vector<8x128xbf16> to vector<1x8x128xbf16>
    tpu.vector_store %arg11[%290, %c0_101, %c0_102], %293 {strides = array<i32>} : memref<8x8x128xbf16, #tpu.memory_space<vmem>>, vector<1x8x128xbf16>,
    %c1_i32_103 = arith.constant 1 : i32
    %294 = arith.index_cast %c1_i32_103 : i32 to index
    %c0_104 = arith.constant 0 : index
    %c0_105 = arith.constant 0 : index
    %295 = vector.load %arg10[%294, %c0_104, %c0_105] : memref<8x8x512xf32, #tpu.memory_space<vmem>>, vector<1x8x512xf32>
    %296 = vector.shape_cast %295 : vector<1x8x512xf32> to vector<8x512xf32>
    %297 = arith.addf %296, %261 : vector<8x512xf32>
    %298 = arith.truncf %288 : vector<8x128xf32> to vector<8x128xbf16>
    %cst_106 = arith.constant dense<0.000000e+00> : vector<8x512xf32>
    %299 = tpu.matmul %298, %257, %cst_106 {dimension_numbers = #tpu.dot_dimension_numbers<[1], [0], [0], [1], [0, 0, 1, 1], [], []>} : vector<8x128xbf16>, vector<128x512xbf16>, vector<8x512xf32> -> vector<8x512xf32>
    %300 = arith.addf %297, %299 : vector<8x512xf32>
    %301 = vector.extract_strided_slice %300 {offsets = [0, 0], sizes = [8, 384], strides = [1, 1]} : vector<8x512xf32> to vector<8x384xf32>
    %302 = arith.negf %301 : vector<8x384xf32>
    %303 = math.exp %302 : vector<8x384xf32>
    %cst_107 = arith.constant 1.000000e+00 : f32
    %304 = vector.broadcast %cst_107 : f32 to vector<8x384xf32>
    %305 = arith.addf %304, %303 : vector<8x384xf32>
    %306 = arith.divf %304, %305 : vector<8x384xf32>
    %307 = vector.extract_strided_slice %306 {offsets = [0, 0], sizes = [8, 128], strides = [1, 1]} : vector<8x384xf32> to vector<8x128xf32>
    %308 = vector.extract_strided_slice %306 {offsets = [0, 128], sizes = [8, 128], strides = [1, 1]} : vector<8x384xf32> to vector<8x128xf32>
    %309 = vector.extract_strided_slice %306 {offsets = [0, 256], sizes = [8, 128], strides = [1, 1]} : vector<8x384xf32> to vector<8x128xf32>
    %310 = vector.extract_strided_slice %300 {offsets = [0, 384], sizes = [8, 128], strides = [1, 1]} : vector<8x512xf32> to vector<8x128xf32>
    %311 = math.tanh %310 : vector<8x128xf32>
    %312 = arith.mulf %308, %286 : vector<8x128xf32>
    %313 = arith.mulf %307, %311 : vector<8x128xf32>
    %314 = arith.addf %312, %313 : vector<8x128xf32>
    %315 = math.tanh %314 : vector<8x128xf32>
    %316 = arith.mulf %309, %315 : vector<8x128xf32>
    %317 = arith.truncf %316 : vector<8x128xf32> to vector<8x128xbf16>
    %318 = arith.index_cast %c1_i32_103 : i32 to index
    %c0_108 = arith.constant 0 : index
    %c0_109 = arith.constant 0 : index
    %319 = vector.load %arg11[%318, %c0_108, %c0_109] : memref<8x8x128xbf16, #tpu.memory_space<vmem>>, vector<1x8x128xbf16>
    %320 = vector.shape_cast %319 : vector<1x8x128xbf16> to vector<8x128xbf16>
    %321 = vector.shape_cast %317 : vector<8x128xbf16> to vector<1x8x128xbf16>
    tpu.vector_store %arg11[%318, %c0_108, %c0_109], %321 {strides = array<i32>} : memref<8x8x128xbf16, #tpu.memory_space<vmem>>, vector<1x8x128xbf16>,
    %c2_i32_110 = arith.constant 2 : i32
    %322 = arith.index_cast %c2_i32_110 : i32 to index
    %c0_111 = arith.constant 0 : index
    %c0_112 = arith.constant 0 : index
    %323 = vector.load %arg10[%322, %c0_111, %c0_112] : memref<8x8x512xf32, #tpu.memory_space<vmem>>, vector<1x8x512xf32>
    %324 = vector.shape_cast %323 : vector<1x8x512xf32> to vector<8x512xf32>
    %325 = arith.addf %324, %261 : vector<8x512xf32>
    %326 = arith.truncf %316 : vector<8x128xf32> to vector<8x128xbf16>
    %cst_113 = arith.constant dense<0.000000e+00> : vector<8x512xf32>
    %327 = tpu.matmul %326, %257, %cst_113 {dimension_numbers = #tpu.dot_dimension_numbers<[1], [0], [0], [1], [0, 0, 1, 1], [], []>} : vector<8x128xbf16>, vector<128x512xbf16>, vector<8x512xf32> -> vector<8x512xf32>
    %328 = arith.addf %325, %327 : vector<8x512xf32>
    %329 = vector.extract_strided_slice %328 {offsets = [0, 0], sizes = [8, 384], strides = [1, 1]} : vector<8x512xf32> to vector<8x384xf32>
    %330 = arith.negf %329 : vector<8x384xf32>
    %331 = math.exp %330 : vector<8x384xf32>
    %cst_114 = arith.constant 1.000000e+00 : f32
    %332 = vector.broadcast %cst_114 : f32 to vector<8x384xf32>
    %333 = arith.addf %332, %331 : vector<8x384xf32>
    %334 = arith.divf %332, %333 : vector<8x384xf32>
    %335 = vector.extract_strided_slice %334 {offsets = [0, 0], sizes = [8, 128], strides = [1, 1]} : vector<8x384xf32> to vector<8x128xf32>
    %336 = vector.extract_strided_slice %334 {offsets = [0, 128], sizes = [8, 128], strides = [1, 1]} : vector<8x384xf32> to vector<8x128xf32>
    %337 = vector.extract_strided_slice %334 {offsets = [0, 256], sizes = [8, 128], strides = [1, 1]} : vector<8x384xf32> to vector<8x128xf32>
    %338 = vector.extract_strided_slice %328 {offsets = [0, 384], sizes = [8, 128], strides = [1, 1]} : vector<8x512xf32> to vector<8x128xf32>
    %339 = math.tanh %338 : vector<8x128xf32>
    %340 = arith.mulf %336, %314 : vector<8x128xf32>
    %341 = arith.mulf %335, %339 : vector<8x128xf32>
    %342 = arith.addf %340, %341 : vector<8x128xf32>
    %343 = math.tanh %342 : vector<8x128xf32>
    %344 = arith.mulf %337, %343 : vector<8x128xf32>
    %345 = arith.truncf %344 : vector<8x128xf32> to vector<8x128xbf16>
    %346 = arith.index_cast %c2_i32_110 : i32 to index
    %c0_115 = arith.constant 0 : index
    %c0_116 = arith.constant 0 : index
    %347 = vector.load %arg11[%346, %c0_115, %c0_116] : memref<8x8x128xbf16, #tpu.memory_space<vmem>>, vector<1x8x128xbf16>
    %348 = vector.shape_cast %347 : vector<1x8x128xbf16> to vector<8x128xbf16>
    %349 = vector.shape_cast %345 : vector<8x128xbf16> to vector<1x8x128xbf16>
    tpu.vector_store %arg11[%346, %c0_115, %c0_116], %349 {strides = array<i32>} : memref<8x8x128xbf16, #tpu.memory_space<vmem>>, vector<1x8x128xbf16>,
    %c3_i32_117 = arith.constant 3 : i32
    %350 = arith.index_cast %c3_i32_117 : i32 to index
    %c0_118 = arith.constant 0 : index
    %c0_119 = arith.constant 0 : index
    %351 = vector.load %arg10[%350, %c0_118, %c0_119] : memref<8x8x512xf32, #tpu.memory_space<vmem>>, vector<1x8x512xf32>
    %352 = vector.shape_cast %351 : vector<1x8x512xf32> to vector<8x512xf32>
    %353 = arith.addf %352, %261 : vector<8x512xf32>
    %354 = arith.truncf %344 : vector<8x128xf32> to vector<8x128xbf16>
    %cst_120 = arith.constant dense<0.000000e+00> : vector<8x512xf32>
    %355 = tpu.matmul %354, %257, %cst_120 {dimension_numbers = #tpu.dot_dimension_numbers<[1], [0], [0], [1], [0, 0, 1, 1], [], []>} : vector<8x128xbf16>, vector<128x512xbf16>, vector<8x512xf32> -> vector<8x512xf32>
    %356 = arith.addf %353, %355 : vector<8x512xf32>
    %357 = vector.extract_strided_slice %356 {offsets = [0, 0], sizes = [8, 384], strides = [1, 1]} : vector<8x512xf32> to vector<8x384xf32>
    %358 = arith.negf %357 : vector<8x384xf32>
    %359 = math.exp %358 : vector<8x384xf32>
    %cst_121 = arith.constant 1.000000e+00 : f32
    %360 = vector.broadcast %cst_121 : f32 to vector<8x384xf32>
    %361 = arith.addf %360, %359 : vector<8x384xf32>
    %362 = arith.divf %360, %361 : vector<8x384xf32>
    %363 = vector.extract_strided_slice %362 {offsets = [0, 0], sizes = [8, 128], strides = [1, 1]} : vector<8x384xf32> to vector<8x128xf32>
    %364 = vector.extract_strided_slice %362 {offsets = [0, 128], sizes = [8, 128], strides = [1, 1]} : vector<8x384xf32> to vector<8x128xf32>
    %365 = vector.extract_strided_slice %362 {offsets = [0, 256], sizes = [8, 128], strides = [1, 1]} : vector<8x384xf32> to vector<8x128xf32>
    %366 = vector.extract_strided_slice %356 {offsets = [0, 384], sizes = [8, 128], strides = [1, 1]} : vector<8x512xf32> to vector<8x128xf32>
    %367 = math.tanh %366 : vector<8x128xf32>
    %368 = arith.mulf %364, %342 : vector<8x128xf32>
    %369 = arith.mulf %363, %367 : vector<8x128xf32>
    %370 = arith.addf %368, %369 : vector<8x128xf32>
    %371 = math.tanh %370 : vector<8x128xf32>
    %372 = arith.mulf %365, %371 : vector<8x128xf32>
    %373 = arith.truncf %372 : vector<8x128xf32> to vector<8x128xbf16>
    %374 = arith.index_cast %c3_i32_117 : i32 to index
    %c0_122 = arith.constant 0 : index
    %c0_123 = arith.constant 0 : index
    %375 = vector.load %arg11[%374, %c0_122, %c0_123] : memref<8x8x128xbf16, #tpu.memory_space<vmem>>, vector<1x8x128xbf16>
    %376 = vector.shape_cast %375 : vector<1x8x128xbf16> to vector<8x128xbf16>
    %377 = vector.shape_cast %373 : vector<8x128xbf16> to vector<1x8x128xbf16>
    tpu.vector_store %arg11[%374, %c0_122, %c0_123], %377 {strides = array<i32>} : memref<8x8x128xbf16, #tpu.memory_space<vmem>>, vector<1x8x128xbf16>,
    %c4_i32_124 = arith.constant 4 : i32
    %378 = arith.index_cast %c4_i32_124 : i32 to index
    %c0_125 = arith.constant 0 : index
    %c0_126 = arith.constant 0 : index
    %379 = vector.load %arg10[%378, %c0_125, %c0_126] : memref<8x8x512xf32, #tpu.memory_space<vmem>>, vector<1x8x512xf32>
    %380 = vector.shape_cast %379 : vector<1x8x512xf32> to vector<8x512xf32>
    %381 = arith.addf %380, %261 : vector<8x512xf32>
    %382 = arith.truncf %372 : vector<8x128xf32> to vector<8x128xbf16>
    %cst_127 = arith.constant dense<0.000000e+00> : vector<8x512xf32>
    %383 = tpu.matmul %382, %257, %cst_127 {dimension_numbers = #tpu.dot_dimension_numbers<[1], [0], [0], [1], [0, 0, 1, 1], [], []>} : vector<8x128xbf16>, vector<128x512xbf16>, vector<8x512xf32> -> vector<8x512xf32>
    %384 = arith.addf %381, %383 : vector<8x512xf32>
    %385 = vector.extract_strided_slice %384 {offsets = [0, 0], sizes = [8, 384], strides = [1, 1]} : vector<8x512xf32> to vector<8x384xf32>
    %386 = arith.negf %385 : vector<8x384xf32>
    %387 = math.exp %386 : vector<8x384xf32>
    %cst_128 = arith.constant 1.000000e+00 : f32
    %388 = vector.broadcast %cst_128 : f32 to vector<8x384xf32>
    %389 = arith.addf %388, %387 : vector<8x384xf32>
    %390 = arith.divf %388, %389 : vector<8x384xf32>
    %391 = vector.extract_strided_slice %390 {offsets = [0, 0], sizes = [8, 128], strides = [1, 1]} : vector<8x384xf32> to vector<8x128xf32>
    %392 = vector.extract_strided_slice %390 {offsets = [0, 128], sizes = [8, 128], strides = [1, 1]} : vector<8x384xf32> to vector<8x128xf32>
    %393 = vector.extract_strided_slice %390 {offsets = [0, 256], sizes = [8, 128], strides = [1, 1]} : vector<8x384xf32> to vector<8x128xf32>
    %394 = vector.extract_strided_slice %384 {offsets = [0, 384], sizes = [8, 128], strides = [1, 1]} : vector<8x512xf32> to vector<8x128xf32>
    %395 = math.tanh %394 : vector<8x128xf32>
    %396 = arith.mulf %392, %370 : vector<8x128xf32>
    %397 = arith.mulf %391, %395 : vector<8x128xf32>
    %398 = arith.addf %396, %397 : vector<8x128xf32>
    %399 = math.tanh %398 : vector<8x128xf32>
    %400 = arith.mulf %393, %399 : vector<8x128xf32>
    %401 = arith.truncf %400 : vector<8x128xf32> to vector<8x128xbf16>
    %402 = arith.index_cast %c4_i32_124 : i32 to index
    %c0_129 = arith.constant 0 : index
    %c0_130 = arith.constant 0 : index
    %403 = vector.load %arg11[%402, %c0_129, %c0_130] : memref<8x8x128xbf16, #tpu.memory_space<vmem>>, vector<1x8x128xbf16>
    %404 = vector.shape_cast %403 : vector<1x8x128xbf16> to vector<8x128xbf16>
    %405 = vector.shape_cast %401 : vector<8x128xbf16> to vector<1x8x128xbf16>
    tpu.vector_store %arg11[%402, %c0_129, %c0_130], %405 {strides = array<i32>} : memref<8x8x128xbf16, #tpu.memory_space<vmem>>, vector<1x8x128xbf16>,
    %c5_i32_131 = arith.constant 5 : i32
    %406 = arith.index_cast %c5_i32_131 : i32 to index
    %c0_132 = arith.constant 0 : index
    %c0_133 = arith.constant 0 : index
    %407 = vector.load %arg10[%406, %c0_132, %c0_133] : memref<8x8x512xf32, #tpu.memory_space<vmem>>, vector<1x8x512xf32>
    %408 = vector.shape_cast %407 : vector<1x8x512xf32> to vector<8x512xf32>
    %409 = arith.addf %408, %261 : vector<8x512xf32>
    %410 = arith.truncf %400 : vector<8x128xf32> to vector<8x128xbf16>
    %cst_134 = arith.constant dense<0.000000e+00> : vector<8x512xf32>
    %411 = tpu.matmul %410, %257, %cst_134 {dimension_numbers = #tpu.dot_dimension_numbers<[1], [0], [0], [1], [0, 0, 1, 1], [], []>} : vector<8x128xbf16>, vector<128x512xbf16>, vector<8x512xf32> -> vector<8x512xf32>
    %412 = arith.addf %409, %411 : vector<8x512xf32>
    %413 = vector.extract_strided_slice %412 {offsets = [0, 0], sizes = [8, 384], strides = [1, 1]} : vector<8x512xf32> to vector<8x384xf32>
    %414 = arith.negf %413 : vector<8x384xf32>
    %415 = math.exp %414 : vector<8x384xf32>
    %cst_135 = arith.constant 1.000000e+00 : f32
    %416 = vector.broadcast %cst_135 : f32 to vector<8x384xf32>
    %417 = arith.addf %416, %415 : vector<8x384xf32>
    %418 = arith.divf %416, %417 : vector<8x384xf32>
    %419 = vector.extract_strided_slice %418 {offsets = [0, 0], sizes = [8, 128], strides = [1, 1]} : vector<8x384xf32> to vector<8x128xf32>
    %420 = vector.extract_strided_slice %418 {offsets = [0, 128], sizes = [8, 128], strides = [1, 1]} : vector<8x384xf32> to vector<8x128xf32>
    %421 = vector.extract_strided_slice %418 {offsets = [0, 256], sizes = [8, 128], strides = [1, 1]} : vector<8x384xf32> to vector<8x128xf32>
    %422 = vector.extract_strided_slice %412 {offsets = [0, 384], sizes = [8, 128], strides = [1, 1]} : vector<8x512xf32> to vector<8x128xf32>
    %423 = math.tanh %422 : vector<8x128xf32>
    %424 = arith.mulf %420, %398 : vector<8x128xf32>
    %425 = arith.mulf %419, %423 : vector<8x128xf32>
    %426 = arith.addf %424, %425 : vector<8x128xf32>
    %427 = math.tanh %426 : vector<8x128xf32>
    %428 = arith.mulf %421, %427 : vector<8x128xf32>
    %429 = arith.truncf %428 : vector<8x128xf32> to vector<8x128xbf16>
    %430 = arith.index_cast %c5_i32_131 : i32 to index
    %c0_136 = arith.constant 0 : index
    %c0_137 = arith.constant 0 : index
    %431 = vector.load %arg11[%430, %c0_136, %c0_137] : memref<8x8x128xbf16, #tpu.memory_space<vmem>>, vector<1x8x128xbf16>
    %432 = vector.shape_cast %431 : vector<1x8x128xbf16> to vector<8x128xbf16>
    %433 = vector.shape_cast %429 : vector<8x128xbf16> to vector<1x8x128xbf16>
    tpu.vector_store %arg11[%430, %c0_136, %c0_137], %433 {strides = array<i32>} : memref<8x8x128xbf16, #tpu.memory_space<vmem>>, vector<1x8x128xbf16>,
    %c6_i32_138 = arith.constant 6 : i32
    %434 = arith.index_cast %c6_i32_138 : i32 to index
    %c0_139 = arith.constant 0 : index
    %c0_140 = arith.constant 0 : index
    %435 = vector.load %arg10[%434, %c0_139, %c0_140] : memref<8x8x512xf32, #tpu.memory_space<vmem>>, vector<1x8x512xf32>
    %436 = vector.shape_cast %435 : vector<1x8x512xf32> to vector<8x512xf32>
    %437 = arith.addf %436, %261 : vector<8x512xf32>
    %438 = arith.truncf %428 : vector<8x128xf32> to vector<8x128xbf16>
    %cst_141 = arith.constant dense<0.000000e+00> : vector<8x512xf32>
    %439 = tpu.matmul %438, %257, %cst_141 {dimension_numbers = #tpu.dot_dimension_numbers<[1], [0], [0], [1], [0, 0, 1, 1], [], []>} : vector<8x128xbf16>, vector<128x512xbf16>, vector<8x512xf32> -> vector<8x512xf32>
    %440 = arith.addf %437, %439 : vector<8x512xf32>
    %441 = vector.extract_strided_slice %440 {offsets = [0, 0], sizes = [8, 384], strides = [1, 1]} : vector<8x512xf32> to vector<8x384xf32>
    %442 = arith.negf %441 : vector<8x384xf32>
    %443 = math.exp %442 : vector<8x384xf32>
    %cst_142 = arith.constant 1.000000e+00 : f32
    %444 = vector.broadcast %cst_142 : f32 to vector<8x384xf32>
    %445 = arith.addf %444, %443 : vector<8x384xf32>
    %446 = arith.divf %444, %445 : vector<8x384xf32>
    %447 = vector.extract_strided_slice %446 {offsets = [0, 0], sizes = [8, 128], strides = [1, 1]} : vector<8x384xf32> to vector<8x128xf32>
    %448 = vector.extract_strided_slice %446 {offsets = [0, 128], sizes = [8, 128], strides = [1, 1]} : vector<8x384xf32> to vector<8x128xf32>
    %449 = vector.extract_strided_slice %446 {offsets = [0, 256], sizes = [8, 128], strides = [1, 1]} : vector<8x384xf32> to vector<8x128xf32>
    %450 = vector.extract_strided_slice %440 {offsets = [0, 384], sizes = [8, 128], strides = [1, 1]} : vector<8x512xf32> to vector<8x128xf32>
    %451 = math.tanh %450 : vector<8x128xf32>
    %452 = arith.mulf %448, %426 : vector<8x128xf32>
    %453 = arith.mulf %447, %451 : vector<8x128xf32>
    %454 = arith.addf %452, %453 : vector<8x128xf32>
    %455 = math.tanh %454 : vector<8x128xf32>
    %456 = arith.mulf %449, %455 : vector<8x128xf32>
    %457 = arith.truncf %456 : vector<8x128xf32> to vector<8x128xbf16>
    %458 = arith.index_cast %c6_i32_138 : i32 to index
    %c0_143 = arith.constant 0 : index
    %c0_144 = arith.constant 0 : index
    %459 = vector.load %arg11[%458, %c0_143, %c0_144] : memref<8x8x128xbf16, #tpu.memory_space<vmem>>, vector<1x8x128xbf16>
    %460 = vector.shape_cast %459 : vector<1x8x128xbf16> to vector<8x128xbf16>
    %461 = vector.shape_cast %457 : vector<8x128xbf16> to vector<1x8x128xbf16>
    tpu.vector_store %arg11[%458, %c0_143, %c0_144], %461 {strides = array<i32>} : memref<8x8x128xbf16, #tpu.memory_space<vmem>>, vector<1x8x128xbf16>,
    %c7_i32_145 = arith.constant 7 : i32
    %462 = arith.index_cast %c7_i32_145 : i32 to index
    %c0_146 = arith.constant 0 : index
    %c0_147 = arith.constant 0 : index
    %463 = vector.load %arg10[%462, %c0_146, %c0_147] : memref<8x8x512xf32, #tpu.memory_space<vmem>>, vector<1x8x512xf32>
    %464 = vector.shape_cast %463 : vector<1x8x512xf32> to vector<8x512xf32>
    %465 = arith.addf %464, %261 : vector<8x512xf32>
    %466 = arith.truncf %456 : vector<8x128xf32> to vector<8x128xbf16>
    %cst_148 = arith.constant dense<0.000000e+00> : vector<8x512xf32>
    %467 = tpu.matmul %466, %257, %cst_148 {dimension_numbers = #tpu.dot_dimension_numbers<[1], [0], [0], [1], [0, 0, 1, 1], [], []>} : vector<8x128xbf16>, vector<128x512xbf16>, vector<8x512xf32> -> vector<8x512xf32>
    %468 = arith.addf %465, %467 : vector<8x512xf32>
    %469 = vector.extract_strided_slice %468 {offsets = [0, 0], sizes = [8, 384], strides = [1, 1]} : vector<8x512xf32> to vector<8x384xf32>
    %470 = arith.negf %469 : vector<8x384xf32>
    %471 = math.exp %470 : vector<8x384xf32>
    %cst_149 = arith.constant 1.000000e+00 : f32
    %472 = vector.broadcast %cst_149 : f32 to vector<8x384xf32>
    %473 = arith.addf %472, %471 : vector<8x384xf32>
    %474 = arith.divf %472, %473 : vector<8x384xf32>
    %475 = vector.extract_strided_slice %474 {offsets = [0, 0], sizes = [8, 128], strides = [1, 1]} : vector<8x384xf32> to vector<8x128xf32>
    %476 = vector.extract_strided_slice %474 {offsets = [0, 128], sizes = [8, 128], strides = [1, 1]} : vector<8x384xf32> to vector<8x128xf32>
    %477 = vector.extract_strided_slice %474 {offsets = [0, 256], sizes = [8, 128], strides = [1, 1]} : vector<8x384xf32> to vector<8x128xf32>
    %478 = vector.extract_strided_slice %468 {offsets = [0, 384], sizes = [8, 128], strides = [1, 1]} : vector<8x512xf32> to vector<8x128xf32>
    %479 = math.tanh %478 : vector<8x128xf32>
    %480 = arith.mulf %476, %454 : vector<8x128xf32>
    %481 = arith.mulf %475, %479 : vector<8x128xf32>
    %482 = arith.addf %480, %481 : vector<8x128xf32>
    %483 = math.tanh %482 : vector<8x128xf32>
    %484 = arith.mulf %477, %483 : vector<8x128xf32>
    %485 = arith.truncf %484 : vector<8x128xf32> to vector<8x128xbf16>
    %486 = arith.index_cast %c7_i32_145 : i32 to index
    %c0_150 = arith.constant 0 : index
    %c0_151 = arith.constant 0 : index
    %487 = vector.load %arg11[%486, %c0_150, %c0_151] : memref<8x8x128xbf16, #tpu.memory_space<vmem>>, vector<1x8x128xbf16>
    %488 = vector.shape_cast %487 : vector<1x8x128xbf16> to vector<8x128xbf16>
    %489 = vector.shape_cast %485 : vector<8x128xbf16> to vector<1x8x128xbf16>
    tpu.vector_store %arg11[%486, %c0_150, %c0_151], %489 {strides = array<i32>} : memref<8x8x128xbf16, #tpu.memory_space<vmem>>, vector<1x8x128xbf16>,
    %c8_i32_152 = arith.constant 8 : i32
    %c1_153 = arith.constant 1 : index
    %c0_154 = arith.constant 0 : index
    %c0_155 = arith.constant 0 : index
    %490 = vector.load %arg12[%c1_153, %c0_154, %c0_155] : memref<2x8x128xf32, #tpu.memory_space<vmem>>, vector<1x8x128xf32>
    %491 = vector.shape_cast %490 : vector<1x8x128xf32> to vector<8x128xf32>
    %492 = vector.shape_cast %484 : vector<8x128xf32> to vector<1x8x128xf32>
    tpu.vector_store %arg12[%c1_153, %c0_154, %c0_155], %492 {strides = array<i32>} : memref<2x8x128xf32, #tpu.memory_space<vmem>>, vector<1x8x128xf32>,
    %c1_156 = arith.constant 1 : index
    %c0_157 = arith.constant 0 : index
    %c0_158 = arith.constant 0 : index
    %493 = vector.load %arg13[%c1_156, %c0_157, %c0_158] : memref<2x8x128xf32, #tpu.memory_space<vmem>>, vector<1x8x128xf32>
    %494 = vector.shape_cast %493 : vector<1x8x128xf32> to vector<8x128xf32>
    %495 = vector.shape_cast %482 : vector<8x128xf32> to vector<1x8x128xf32>
    tpu.vector_store %arg13[%c1_156, %c0_157, %c0_158], %495 {strides = array<i32>} : memref<2x8x128xf32, #tpu.memory_space<vmem>>, vector<1x8x128xf32>,
    %c0_159 = arith.constant 0 : index
    %c0_160 = arith.constant 0 : index
    %c0_161 = arith.constant 0 : index
    %496 = vector.load %arg11[%c0_159, %c0_160, %c0_161] : memref<8x8x128xbf16, #tpu.memory_space<vmem>>, vector<8x8x128xbf16>
    %497 = vector.shape_cast %496 : vector<8x8x128xbf16> to vector<64x128xbf16>
    %c0_162 = arith.constant 0 : index
    %c0_163 = arith.constant 0 : index
    %498 = vector.load %arg7[%c0_162, %c0_163] : memref<128x128xbf16, #tpu.memory_space<vmem>>, vector<128x128xbf16>
    %cst_164 = arith.constant dense<0.000000e+00> : vector<64x128xf32>
    %499 = tpu.matmul %497, %498, %cst_164 {dimension_numbers = #tpu.dot_dimension_numbers<[1], [0], [0], [1], [0, 0, 1, 1], [], []>} : vector<64x128xbf16>, vector<128x128xbf16>, vector<64x128xf32> -> vector<64x128xf32>
    %500 = vector.shape_cast %499 : vector<64x128xf32> to vector<8x8x128xf32>
    %c0_165 = arith.constant 0 : index
    %c0_166 = arith.constant 0 : index
    %501 = vector.load %arg8[%c0_165, %c0_166] : memref<1x128xf32, #tpu.memory_space<vmem>>, vector<1x128xf32>
    %502 = vector.shape_cast %501 : vector<1x128xf32> to vector<1x1x128xf32>
    %503 = vector.broadcast %502 : vector<1x1x128xf32> to vector<8x8x128xf32>
    %504 = arith.addf %500, %503 : vector<8x8x128xf32>
    %c0_167 = arith.constant 0 : index
    %c0_168 = arith.constant 0 : index
    %c0_169 = arith.constant 0 : index
    %505 = vector.load %arg9[%c0_167, %c0_168, %c0_169] : memref<8x8x128xf32, #tpu.memory_space<vmem>>, vector<8x8x128xf32>
    tpu.vector_store %arg9[%c0_167, %c0_168, %c0_169], %504 {strides = array<i32>} : memref<8x8x128xf32, #tpu.memory_space<vmem>>, vector<8x8x128xf32>,
    return
  }
  func.func @transform_0(%arg0: i32, %arg1: i32) -> (i32, i32, i32) {
    %c0_i32 = arith.constant 0 : i32
    %c0_i32_0 = arith.constant 0 : i32
    return %arg1, %arg0, %c0_i32 : i32, i32, i32
  }
  func.func @transform_1(%arg0: i32, %arg1: i32) -> (i32, i32) {
    %c0_i32 = arith.constant 0 : i32
    %c0_i32_0 = arith.constant 0 : i32
    %c0_i32_1 = arith.constant 0 : i32
    return %c0_i32, %c0_i32_0 : i32, i32
  }
  func.func @transform_2(%arg0: i32, %arg1: i32) -> (i32, i32, i32) {
    %c0_i32 = arith.constant 0 : i32
    %c0_i32_0 = arith.constant 0 : i32
    %c0_i32_1 = arith.constant 0 : i32
    %c0_i32_2 = arith.constant 0 : i32
    return %c0_i32, %c0_i32_0, %c0_i32_1 : i32, i32, i32
  }
  func.func @transform_3(%arg0: i32, %arg1: i32) -> (i32, i32, i32) {
    %c0_i32 = arith.constant 0 : i32
    %c0_i32_0 = arith.constant 0 : i32
    %c0_i32_1 = arith.constant 0 : i32
    %c0_i32_2 = arith.constant 0 : i32
    return %c0_i32, %c0_i32_0, %c0_i32_1 : i32, i32, i32
  }
  func.func @transform_4(%arg0: i32, %arg1: i32) -> (i32, i32, i32) {
    %c0_i32 = arith.constant 0 : i32
    %c0_i32_0 = arith.constant 0 : i32
    %c0_i32_1 = arith.constant 0 : i32
    %c0_i32_2 = arith.constant 0 : i32
    return %c0_i32, %c0_i32_0, %c0_i32_1 : i32, i32, i32
  }
  func.func @transform_5(%arg0: i32, %arg1: i32) -> (i32, i32) {
    %c0_i32 = arith.constant 0 : i32
    %c0_i32_0 = arith.constant 0 : i32
    %c0_i32_1 = arith.constant 0 : i32
    return %c0_i32, %c0_i32_0 : i32, i32
  }
  func.func @transform_6(%arg0: i32, %arg1: i32) -> (i32, i32) {
    %c0_i32 = arith.constant 0 : i32
    %c0_i32_0 = arith.constant 0 : i32
    %c0_i32_1 = arith.constant 0 : i32
    return %c0_i32, %c0_i32_0 : i32, i32
  }
  func.func @transform_7(%arg0: i32, %arg1: i32) -> (i32, i32, i32) {
    %c0_i32 = arith.constant 0 : i32
    %c0_i32_0 = arith.constant 0 : i32
    return %arg1, %arg0, %c0_i32 : i32, i32, i32
  }
}

</mosaic_0001>

<bundles_post_ra>
// kernel: tpu_custom_call.1
= control target key start
LH: loop header
LB: loop body
LE: loop exit
PB: predicated region body
PF: predicated region fallthrough
CT: control target
= control target key end

     0   :  { %12 = vsyncpa [#allocation7], 0  ;;  %s5634_s0 = inlined_call_operand.hbm [shape: bf16[8,8,128], index: 0, kind: input, shape index: {}]   ;;  %s5635_s1 = inlined_call_operand.hbm [shape: bf16[128,512], index: 1, kind: input, shape index: {}]   ;;  %s5636_s2 = inlined_call_operand.hbm [shape: bf16[1,128,512], index: 2, kind: input, shape index: {}]   ;;  %s5637_s3 = inlined_call_operand.hbm [shape: bf16[2,128,512], index: 3, kind: input, shape index: {}]   ;;  %s5638_s4 = inlined_call_operand.vmem [shape: f32[2,1,512], index: 4, kind: input, shape index: {}]   ;;  %s5639_s5 = inlined_call_operand.hbm [shape: bf16[128,128], index: 5, kind: input, shape index: {}]   ;;  %s5640_s6 = inlined_call_operand.vmem [shape: f32[1,128], index: 6, kind: input, shape index: {}]   ;;  %s5641_s7 = inlined_call_operand.hbm [shape: f32[8,8,128], index: 7, kind: output, shape index: {}]  }
   0x1   :  { %13 = vsyncpa [#allocation10], 0 }
   0x2   :  { %14 = vsyncpa [#allocation13], 0 }
   0x3   :  { %15 = vsyncpa [#allocation8], 0  ;;  %s4407_s24 = smov [#allocation9]   ;;  %s4267_s28 = scalar_lea.hbm %s5635_s1, 4096 }
   0x4   :  { %s33_s25 = sshll.u32 %s4407_s24, 4  ;;  %p4268_p0 = scmp.ne.s32.totalorder %s5635_s1, %s4267_s28  ;;  %s34_s25 = int_to_ptr.vmem [resolvable:$true] %s33_s25 }
   0x5   :  { %p4271_p1 = scmp.lt.u32.totalorder %s4267_s28, %s5635_s1 }
   0x7   :  { %p4273_p2 = pnand %p4271_p1, %p4268_p0 }
   0x9   :  { %4276 = shalt.err (!%p4273_p2)
}
   0xa   :  { %s4277_s10 = scalar_lea.vmem %s34_s25, 4096  ;;  %p4282_p4 = scmp.lt.s32.totalorder %s34_s25, %s34_s25 }
   0xb   :  { %p4278_p3 = scmp.ne.s32.totalorder %s34_s25, %s4277_s10  ;;  %p4283_p5 = scmp.lt.s32.totalorder %s4277_s10, %s4277_s10 }
   0xd   :  { %p4284_p6 = por %p4283_p5, %p4282_p4 }
   0xf   :  { %p4285_p7 = pnand %p4284_p6, %p4278_p3 }
  0x11   :  { %4288 = shalt.err (!%p4285_p7)
}
  0x12   :  { %s4408_s11 = smov 256   ;;  %s4409_s12 = smov 16  }
  0x13   :  { %39 = dma.hbm_to_vmem [thread:$0]  %s5635_s1, 4096, %s34_s25, [#allocation10], %s4408_s11, %s4408_s11, %s4409_s12  }
  0x14   :  { %s4410_s15 = smov [#allocation12]   ;;  %s4411_s17 = smov [#allocation6]  }
  0x15   :  { %s57_s16 = sshll.u32 %s4410_s15, 4  ;;  %s21_s18 = sshll.u32 %s4411_s17, 4  ;;  %s58_s16 = int_to_ptr.vmem [resolvable:$true] %s57_s16  ;;  %s22_s18 = int_to_ptr.vmem [resolvable:$true] %s21_s18 }
  0x16   :  { %s4289_s21 = scalar_lea.hbm %s5637_s3, 8192 }
  0x17   :  { %p4290_p8 = scmp.ne.s32.totalorder %s5637_s3, %s4289_s21  ;;  %p4293_p9 = scmp.lt.u32.totalorder %s4289_s21, %s5637_s3 }
  0x19   :  { %p4295_p10 = pnand %p4293_p9, %p4290_p8 }
  0x1b   :  { %4298 = shalt.err (!%p4295_p10)
}
  0x1c   :  { %s4299_s1 = scalar_lea.vmem %s58_s16, 8192  ;;  %p4304_p12 = scmp.lt.s32.totalorder %s58_s16, %s58_s16 }
  0x1d   :  { %p4300_p11 = scmp.ne.s32.totalorder %s58_s16, %s4299_s1  ;;  %p4305_p13 = scmp.lt.s32.totalorder %s4299_s1, %s4299_s1 }
  0x1f   :  { %p4306_p0 = por %p4305_p13, %p4304_p12 }
  0x21   :  { %p4307_p1 = pnand %p4306_p0, %p4300_p11 }
  0x23   :  { %4310 = shalt.err (!%p4307_p1)
}
  0x24   :  { %63 = dma.hbm_to_vmem [thread:$0]  %s5637_s3, 8192, %s58_s16, [#allocation13], %s4408_s11, %s4408_s11, %s4409_s12  }
  0x25   :  { %s4311_s30 = scalar_lea.hbm %s5634_s0, 512 }
  0x26   :  { %p4312_p2 = scmp.ne.s32.totalorder %s5634_s0, %s4311_s30  ;;  %p4315_p3 = scmp.lt.u32.totalorder %s4311_s30, %s5634_s0 }
  0x28   :  { %p4317_p4 = pnand %p4315_p3, %p4312_p2 }
  0x2a   :  { %4320 = shalt.err (!%p4317_p4)
}
  0x2b   :  { %s4321_s14 = scalar_lea.vmem %s22_s18, 512  ;;  %p4326_p6 = scmp.lt.s32.totalorder %s22_s18, %s22_s18 }
  0x2c   :  { %p4322_p5 = scmp.ne.s32.totalorder %s22_s18, %s4321_s14  ;;  %p4327_p7 = scmp.lt.s32.totalorder %s4321_s14, %s4321_s14 }
  0x2e   :  { %p4328_p8 = por %p4327_p7, %p4326_p6 }
  0x30   :  { %p4329_p9 = pnand %p4328_p8, %p4322_p5 }
  0x32   :  { %4332 = shalt.err (!%p4329_p9)
}
  0x33   :  { %s4412_s3 = smov 64   ;;  %s4413_s15 = smov 4  }
  0x34   :  { %27 = dma.hbm_to_vmem [thread:$0]  %s5634_s0, 512, %s22_s18, [#allocation7], %s4412_s3, %s4412_s3, %s4413_s15  }
  0x35   :  { %s4414_s19 = smov [#allocation11]   ;;  %s4415_s21 = smov [#allocation14]  }
  0x36   :  { %s45_s20 = sshll.u32 %s4414_s19, 4  ;;  %s71_s22 = sshll.u32 %s4415_s21, 4  ;;  %s46_s20 = int_to_ptr.vmem [resolvable:$true] %s45_s20  ;;  %s72_s22 = int_to_ptr.vmem [resolvable:$true] %s71_s22 }
  0x37   :  { %s4333_s26 = scalar_lea.hbm %s5636_s2, 4096 }
  0x38   :  { %p4334_p10 = scmp.ne.s32.totalorder %s5636_s2, %s4333_s26  ;;  %p4337_p11 = scmp.lt.u32.totalorder %s4333_s26, %s5636_s2 }
  0x3a   :  { %p4339_p12 = pnand %p4337_p11, %p4334_p10 }
  0x3c   :  { %4342 = shalt.err (!%p4339_p12)
}
  0x3d   :  { %s4343_s0 = scalar_lea.vmem %s46_s20, 4096  ;;  %p4348_p0 = scmp.lt.s32.totalorder %s46_s20, %s46_s20 }
  0x3e   :  { %p4344_p13 = scmp.ne.s32.totalorder %s46_s20, %s4343_s0  ;;  %p4349_p1 = scmp.lt.s32.totalorder %s4343_s0, %s4343_s0 }
  0x40   :  { %p4350_p2 = por %p4349_p1, %p4348_p0 }
  0x42   :  { %p4351_p3 = pnand %p4350_p2, %p4344_p13 }
  0x44   :  { %4354 = shalt.err (!%p4351_p3)
}
  0x45   :  { %51 = dma.hbm_to_vmem [thread:$0]  %s5636_s2, 4096, %s46_s20, [#allocation10], %s4408_s11, %s4408_s11, %s4409_s12  }
  0x46   :  { %s4355_s9 = scalar_lea.hbm %s5639_s5, 1024 }
  0x47   :  { %p4356_p4 = scmp.ne.s32.totalorder %s5639_s5, %s4355_s9  ;;  %p4359_p5 = scmp.lt.u32.totalorder %s4355_s9, %s5639_s5 }
  0x49   :  { %p4361_p6 = pnand %p4359_p5, %p4356_p4 }
  0x4b   :  { %4364 = shalt.err (!%p4361_p6)
}
  0x4c   :  { %s4365_s17 = scalar_lea.vmem %s72_s22, 1024  ;;  %p4370_p8 = scmp.lt.s32.totalorder %s72_s22, %s72_s22 }
  0x4d   :  { %p4366_p7 = scmp.ne.s32.totalorder %s72_s22, %s4365_s17  ;;  %p4371_p9 = scmp.lt.s32.totalorder %s4365_s17, %s4365_s17 }
  0x4f   :  { %p4372_p10 = por %p4371_p9, %p4370_p8 }
  0x51   :  { %p4373_p11 = pnand %p4372_p10, %p4366_p7 }
  0x53   :  { %4376 = shalt.err (!%p4373_p11)
}
  0x54   :  { %77 = dma.hbm_to_vmem [thread:$0]  %s5639_s5, 1024, %s72_s22, [#allocation13], %s4412_s3, %s4412_s3, %s4413_s15  }
  0x55   :  { %4399 = dma.done.wait [#allocation7], 512  }
  0x56   :  { %4400 = vsyncadd [#allocation7], 4294966784 }
  0x57   :  { %4401 = dma.done.wait [#allocation10], 8192  }
  0x58   :  { %4402 = vsyncadd [#allocation10], 4294959104 }
  0x59   :  { %4403 = dma.done.wait [#allocation13], 9216  }
  0x5a   :  { %4404 = vsyncadd [#allocation13], 4294958080  ;;  %v5646_v0 = vmov 0   ;;  %v3735_v1 = vld [vmem:[#allocation9 + $0x4] ss:$16 sps:$4 sm:$0xff]   ;;  %v5644_v38 = vmov 0.0|0.0  }
  0x5b   :  { %360 = vmatprep.mubr.bf16.mxu1 %v5646_v0  ;;  %763 = vmatprep.mubr.bf16.mxu0 %v5646_v0  ;;  %v3737_v2 = vld [vmem:[#allocation9] ss:$16 sps:$4 sm:$0xff]   ;;  %v4538_v3 = vld [vmem:[#allocation12 + $0x4] ss:$16 sps:$4 sm:$0xff]   ;;  %v3786_v32 = vld [vmem:[#allocation9 + $0xc] ss:$16 sps:$4 sm:$0xff]  }
  0x5c   :  { %328 = vmatprep.subr.bf16.mxu1 %v3735_v1  ;;  %v4540_v4 = vld [vmem:[#allocation12] ss:$16 sps:$4 sm:$0xff]   ;;  %v3741_v5 = vld [vmem:[#allocation9 + $0x24] ss:$16 sps:$4 sm:$0xff]   ;;  %731 = vmatprep.subr.bf16.mxu0 %v4538_v3  ;;  %v3784_v35 = vld [vmem:[#allocation9 + $0x8] ss:$16 sps:$4 sm:$0xff]  }
  0x5d   :  { %329 = vmatpush1.bf16.msra.mxu1 %v3737_v2  ;;  %v3743_v6 = vld [vmem:[#allocation9 + $0x20] ss:$16 sps:$4 sm:$0xff]   ;;  %v4543_v7 = vld [vmem:[#allocation12 + $0x24] ss:$16 sps:$4 sm:$0xff]   ;;  %732 = vmatpush1.bf16.msra.mxu0 %v4540_v4  ;;  %v3789_v36 = vld [vmem:[#allocation9 + $0x2c] ss:$16 sps:$4 sm:$0xff]  }
  0x5e   :  { %330 = vmatprep.subr.bf16.mxu1 %v3741_v5  ;;  %v4546_v8 = vld [vmem:[#allocation12 + $0x20] ss:$16 sps:$4 sm:$0xff]   ;;  %733 = vmatprep.subr.bf16.mxu0 %v4543_v7  ;;  %v3747_v9 = vld [vmem:[#allocation9 + $0x44] ss:$16 sps:$4 sm:$0xff]   ;;  %v3787_v37 = vld [vmem:[#allocation9 + $0x28] ss:$16 sps:$4 sm:$0xff]  }
  0x5f   :  { %v3749_v10 = vld [vmem:[#allocation9 + $0x40] ss:$16 sps:$4 sm:$0xff]   ;;  %v4549_v11 = vld [vmem:[#allocation12 + $0x44] ss:$16 sps:$4 sm:$0xff]   ;;  %v3793_v39 = vld [vmem:[#allocation9 + $0x4c] ss:$16 sps:$4 sm:$0xff]  }
  0x60   :  { %v3753_v12 = vld [vmem:[#allocation9 + $0x64] ss:$16 sps:$4 sm:$0xff]   ;;  %v4552_v13 = vld [vmem:[#allocation12 + $0x40] ss:$16 sps:$4 sm:$0xff]   ;;  %v3790_v40 = vld [vmem:[#allocation6 + $0x8] sm:$0xff]  }
  0x61   :  { %331 = vmatpush1.bf16.msra.mxu1 %v3743_v6  ;;  %734 = vmatpush1.bf16.msra.mxu0 %v4546_v8  ;;  %v4555_v14 = vld [vmem:[#allocation12 + $0x64] ss:$16 sps:$4 sm:$0xff]   ;;  %v3755_v15 = vld [vmem:[#allocation9 + $0x60] ss:$16 sps:$4 sm:$0xff]   ;;  %v3791_v41 = vld [vmem:[#allocation9 + $0x48] ss:$16 sps:$4 sm:$0xff]  }
  0x62   :  { %332 = vmatprep.subr.bf16.mxu1 %v3747_v9  ;;  %735 = vmatprep.subr.bf16.mxu0 %v4549_v11  ;;  %v3759_v16 = vld [vmem:[#allocation9 + $0x84] ss:$16 sps:$4 sm:$0xff]   ;;  %v4558_v17 = vld [vmem:[#allocation12 + $0x60] ss:$16 sps:$4 sm:$0xff]   ;;  %v3796_v42 = vld [vmem:[#allocation9 + $0x6c] ss:$16 sps:$4 sm:$0xff]  }
  0x63   :  { %v4561_v18 = vld [vmem:[#allocation12 + $0x84] ss:$16 sps:$4 sm:$0xff]   ;;  %v3761_v19 = vld [vmem:[#allocation9 + $0x80] ss:$16 sps:$4 sm:$0xff]   ;;  %v3794_v43 = vld [vmem:[#allocation9 + $0x68] ss:$16 sps:$4 sm:$0xff]  }
  0x64   :  { %v3765_v20 = vld [vmem:[#allocation9 + $0xa4] ss:$16 sps:$4 sm:$0xff]   ;;  %v4564_v21 = vld [vmem:[#allocation12 + $0x80] ss:$16 sps:$4 sm:$0xff]   ;;  %v3800_v44 = vld [vmem:[#allocation9 + $0x8c] ss:$16 sps:$4 sm:$0xff]  }
  0x65   :  { %333 = vmatpush1.bf16.msra.mxu1 %v3749_v10  ;;  %736 = vmatpush1.bf16.msra.mxu0 %v4552_v13  ;;  %v4567_v22 = vld [vmem:[#allocation12 + $0xa4] ss:$16 sps:$4 sm:$0xff]   ;;  %v3767_v23 = vld [vmem:[#allocation9 + $0xa0] ss:$16 sps:$4 sm:$0xff]   ;;  %v3798_v46 = vld [vmem:[#allocation9 + $0x88] ss:$16 sps:$4 sm:$0xff]  }
  0x66   :  { %334 = vmatprep.subr.bf16.mxu1 %v3753_v12  ;;  %737 = vmatprep.subr.bf16.mxu0 %v4555_v14  ;;  %v3771_v24 = vld [vmem:[#allocation9 + $0xc4] ss:$16 sps:$4 sm:$0xff]   ;;  %v4570_v25 = vld [vmem:[#allocation12 + $0xa0] ss:$16 sps:$4 sm:$0xff]   ;;  %v3803_v47 = vld [vmem:[#allocation9 + $0xac] ss:$16 sps:$4 sm:$0xff]   ;;  %v540_v12 = vlaneseq }
  0x67   :  { %v4573_v26 = vld [vmem:[#allocation12 + $0xc4] ss:$16 sps:$4 sm:$0xff]   ;;  %v3773_v27 = vld [vmem:[#allocation9 + $0xc0] ss:$16 sps:$4 sm:$0xff]   ;;  %v3801_v48 = vld [vmem:[#allocation9 + $0xa8] ss:$16 sps:$4 sm:$0xff]  }
  0x68   :  { %v3777_v28 = vld [vmem:[#allocation9 + $0xe4] ss:$16 sps:$4 sm:$0xff]   ;;  %v4576_v29 = vld [vmem:[#allocation12 + $0xc0] ss:$16 sps:$4 sm:$0xff]   ;;  %v3807_v49 = vld [vmem:[#allocation9 + $0xcc] ss:$16 sps:$4 sm:$0xff]  }
  0x69   :  { %335 = vmatpush1.bf16.msra.mxu1 %v3755_v15  ;;  %738 = vmatpush1.bf16.msra.mxu0 %v4558_v17  ;;  %v4579_v30 = vld [vmem:[#allocation12 + $0xe4] ss:$16 sps:$4 sm:$0xff]   ;;  %v3779_v31 = vld [vmem:[#allocation9 + $0xe0] ss:$16 sps:$4 sm:$0xff]   ;;  %v3804_v50 = vld [vmem:[#allocation6 + $0x18] sm:$0xff]   ;;  %v4684_v15 = vshrl.u32 %v540_v12, 7 }
  0x6a   :  { %336 = vmatprep.subr.bf16.mxu1 %v3759_v16  ;;  %739 = vmatprep.subr.bf16.mxu0 %v4561_v18  ;;  %v4582_v33 = vld [vmem:[#allocation12 + $0xe0] ss:$16 sps:$4 sm:$0xff]   ;;  %v3805_v51 = vld [vmem:[#allocation9 + $0xc8] ss:$16 sps:$4 sm:$0xff]   ;;  %v3810_v52 = vld [vmem:[#allocation9 + $0xec] ss:$16 sps:$4 sm:$0xff]  }
  0x6b   :  { %v4585_v34 = vld [vmem:[#allocation6] sm:$0xff]   ;;  %v3797_v45 = vld [vmem:[#allocation6 + $0x10] sm:$0xff]   ;;  %v3808_v53 = vld [vmem:[#allocation9 + $0xe8] ss:$16 sps:$4 sm:$0xff]   ;;  %5652 = vst [vmem:[#allocation20_spill] sm:$0xff] %v4684_v15  ;;  %v5643_v16 = vsub.s32 0, %v4684_v15 }
  0x6c   :  { %v4606_v54 = vld [vmem:[#allocation12 + $0xc] ss:$16 sps:$4 sm:$0xff]   ;;  %v4610_v55 = vld [vmem:[#allocation12 + $0x8] ss:$16 sps:$4 sm:$0xff]  }
  0x6d   :  { %337 = vmatpush1.bf16.msra.mxu1 %v3761_v19  ;;  %740 = vmatpush1.bf16.msra.mxu0 %v4564_v21  ;;  %v4613_v56 = vld [vmem:[#allocation12 + $0x2c] ss:$16 sps:$4 sm:$0xff]   ;;  %v4617_v57 = vld [vmem:[#allocation12 + $0x28] ss:$16 sps:$4 sm:$0xff]   ;;  %v538_v19 = vld [vmem:[%s5638_s4] sm:$0xf] }
  0x6e   :  { %338 = vmatprep.subr.bf16.mxu1 %v3765_v20  ;;  %741 = vmatprep.subr.bf16.mxu0 %v4567_v22  ;;  %v4621_v58 = vld [vmem:[#allocation12 + $0x4c] ss:$16 sps:$4 sm:$0xff]   ;;  %v4627_v59 = vld [vmem:[#allocation12 + $0x48] ss:$16 sps:$4 sm:$0xff]   ;;  %v5642_v20 = vsub.s32 1, %v4684_v15 }
  0x6f   :  { %v4629_v60 = vld [vmem:[#allocation12 + $0x6c] ss:$16 sps:$4 sm:$0xff]   ;;  %v4634_v61 = vld [vmem:[#allocation12 + $0x68] ss:$16 sps:$4 sm:$0xff]  }
  0x70   :  { %v4638_v62 = vld [vmem:[#allocation12 + $0x8c] ss:$16 sps:$4 sm:$0xff]   ;;  %v4641_v63 = vld [vmem:[#allocation12 + $0x88] ss:$16 sps:$4 sm:$0xff]  }
  0x71   :  { %339 = vmatpush1.bf16.msra.mxu1 %v3767_v23  ;;  %742 = vmatpush1.bf16.msra.mxu0 %v4570_v25  ;;  %v4644_v1 = vld [vmem:[#allocation12 + $0xac] ss:$16 sps:$4 sm:$0xff]   ;;  %v4647_v2 = vld [vmem:[#allocation12 + $0xa8] ss:$16 sps:$4 sm:$0xff]   ;;  %v543_v23 = vrot.slane %v538_v19, %v5643_v16 }
  0x72   :  { %340 = vmatprep.subr.bf16.mxu1 %v3771_v24  ;;  %743 = vmatprep.subr.bf16.mxu0 %v4573_v26  ;;  %v4651_v5 = vld [vmem:[#allocation12 + $0xcc] ss:$16 sps:$4 sm:$0xff]   ;;  %v4654_v6 = vld [vmem:[#allocation12 + $0xc8] ss:$16 sps:$4 sm:$0xff]   ;;  %v547_v24 = vrot.slane %v538_v19, %v5642_v20 }
  0x73   :  { %v4657_v9 = vld [vmem:[#allocation12 + $0xec] ss:$16 sps:$4 sm:$0xff]   ;;  %v4660_v10 = vld [vmem:[#allocation12 + $0xe8] ss:$16 sps:$4 sm:$0xff]  }
  0x75   :  { %341 = vmatpush1.bf16.msra.mxu1 %v3773_v27  ;;  %744 = vmatpush1.bf16.msra.mxu0 %v4576_v29 }
  0x76   :  { %342 = vmatprep.subr.bf16.mxu1 %v3777_v28  ;;  %745 = vmatprep.subr.bf16.mxu0 %v4579_v30 }
  0x79   :  { %343 = vmatpush1.bf16.msra.mxu1 %v3779_v31  ;;  %746 = vmatpush1.bf16.msra.mxu0 %v4582_v33 }
  0x7a   :  { %401 = vmatprep.subr.bf16.mxu1 %v3786_v32  ;;  %852 = vmatprep.subr.bf16.mxu0 %v4538_v3 }
  0x7c   :  { %361 = vmatmul.mubr.bf16.vlgmr.msra.gmra.mrb[0].mxu1 %v4585_v34  ;;  %764 = vmatmul.mubr.bf16.vlgmr.msra.gmra.mrb[0].mxu0 %v5644_v38 }
  0x7d   :  { %402 = vmatpush1.bf16.msra.mxu1 %v3784_v35  ;;  %370 = vmatprep.mubr.bf16.mxu1 %v5646_v0 }
  0x7e   :  { %403 = vmatprep.subr.bf16.mxu1 %v3789_v36  ;;  %853 = vmatpush1.bf16.msra.mxu0 %v4540_v4 }
  0x7f   :  { %884 = vmatprep.mubr.bf16.mxu0 %v5646_v0  ;;  %854 = vmatprep.subr.bf16.mxu0 %v4543_v7 }
  0x81   :  { %404 = vmatpush1.bf16.msra.mxu1 %v3787_v37 }
  0x82   :  { %405 = vmatprep.subr.bf16.mxu1 %v3793_v39  ;;  %855 = vmatpush1.bf16.msra.mxu0 %v4546_v8 }
  0x83   :  { %856 = vmatprep.subr.bf16.mxu0 %v4549_v11 }
  0x84   :  { %371 = vmatmul.mubr.bf16.gmra.mrb[4].mxu1 %v3790_v40 }
  0x85   :  { %406 = vmatpush1.bf16.msra.mxu1 %v3791_v41  ;;  %380 = vmatprep.mubr.bf16.mxu1 %v5646_v0 }
  0x86   :  { %407 = vmatprep.subr.bf16.mxu1 %v3796_v42  ;;  %857 = vmatpush1.bf16.msra.mxu0 %v4552_v13 }
  0x87   :  { %858 = vmatprep.subr.bf16.mxu0 %v4555_v14 }
  0x89   :  { %408 = vmatpush1.bf16.msra.mxu1 %v3794_v43 }
  0x8a   :  { %409 = vmatprep.subr.bf16.mxu1 %v3800_v44  ;;  %859 = vmatpush1.bf16.msra.mxu0 %v4558_v17 }
  0x8b   :  { %860 = vmatprep.subr.bf16.mxu0 %v4561_v18 }
  0x8c   :  { %381 = vmatmul.mubr.bf16.gmra.mrb[8].mxu1 %v3797_v45 }
  0x8d   :  { %410 = vmatpush1.bf16.msra.mxu1 %v3798_v46  ;;  %390 = vmatprep.mubr.bf16.mxu1 %v5646_v0 }
  0x8e   :  { %411 = vmatprep.subr.bf16.mxu1 %v3803_v47  ;;  %861 = vmatpush1.bf16.msra.mxu0 %v4564_v21 }
  0x8f   :  { %862 = vmatprep.subr.bf16.mxu0 %v4567_v22 }
  0x91   :  { %412 = vmatpush1.bf16.msra.mxu1 %v3801_v48 }
  0x92   :  { %413 = vmatprep.subr.bf16.mxu1 %v3807_v49  ;;  %863 = vmatpush1.bf16.msra.mxu0 %v4570_v25 }
  0x93   :  { %864 = vmatprep.subr.bf16.mxu0 %v4573_v26 }
  0x94   :  { %391 = vmatmul.mubr.bf16.gmra.mrb[12].mxu1 %v3804_v50 }
  0x95   :  { %414 = vmatpush1.bf16.msra.mxu1 %v3805_v51  ;;  %433 = vmatprep.mubr.bf16.mxu1 %v5646_v0 }
  0x96   :  { %415 = vmatprep.subr.bf16.mxu1 %v3810_v52  ;;  %865 = vmatpush1.bf16.msra.mxu0 %v4576_v29 }
  0x97   :  { %866 = vmatprep.subr.bf16.mxu0 %v4579_v30 }
  0x99   :  { %416 = vmatpush1.bf16.msra.mxu1 %v3808_v53 }
  0x9a   :  { %772 = vmatprep.subr.bf16.mxu1 %v4606_v54  ;;  %867 = vmatpush1.bf16.msra.mxu0 %v4582_v33 }
  0x9b   :  { %974 = vmatprep.subr.bf16.mxu0 %v4538_v3 }
  0x9c   :  { %434 = vmatmul.mubr.bf16.vlgmr.msra.gmra.mrb[16].mxu1 %v4585_v34 }
  0x9d   :  { %773 = vmatpush1.bf16.msra.mxu1 %v4610_v55  ;;  %443 = vmatprep.mubr.bf16.mxu1 %v5646_v0 }
  0x9e   :  { %774 = vmatprep.subr.bf16.mxu1 %v4613_v56 }
  0xa1   :  { %775 = vmatpush1.bf16.msra.mxu1 %v4617_v57 }
  0xa2   :  { %776 = vmatprep.subr.bf16.mxu1 %v4621_v58 }
  0xa4   :  { %444 = vmatmul.mubr.bf16.gmra.mrb[20].mxu1 %v3790_v40 }
  0xa5   :  { %777 = vmatpush1.bf16.msra.mxu1 %v4627_v59  ;;  %453 = vmatprep.mubr.bf16.mxu1 %v5646_v0 }
  0xa6   :  { %778 = vmatprep.subr.bf16.mxu1 %v4629_v60 }
  0xa9   :  { %779 = vmatpush1.bf16.msra.mxu1 %v4634_v61 }
  0xaa   :  { %780 = vmatprep.subr.bf16.mxu1 %v4638_v62 }
  0xac   :  { %454 = vmatmul.mubr.bf16.gmra.mrb[24].mxu1 %v3797_v45 }
  0xad   :  { %781 = vmatpush1.bf16.msra.mxu1 %v4641_v63  ;;  %463 = vmatprep.mubr.bf16.mxu1 %v5646_v0 }
  0xae   :  { %782 = vmatprep.subr.bf16.mxu1 %v4644_v1 }
  0xb1   :  { %783 = vmatpush1.bf16.msra.mxu1 %v4647_v2 }
  0xb2   :  { %784 = vmatprep.subr.bf16.mxu1 %v4651_v5 }
  0xb4   :  { %464 = vmatmul.mubr.bf16.gmra.mrb[28].mxu1 %v3804_v50 }
  0xb5   :  { %785 = vmatpush1.bf16.msra.mxu1 %v4654_v6  ;;  %804 = vmatprep.mubr.bf16.mxu1 %v5646_v0 }
  0xb6   :  { %786 = vmatprep.subr.bf16.mxu1 %v4657_v9 }
  0xb9   :  { %787 = vmatpush1.bf16.msra.mxu1 %v4660_v10 }
  0xba   :  { %893 = vmatprep.subr.bf16.mxu1 %v4606_v54 }
  0xbc   :  { %805 = vmatmul.mubr.bf16.vlgmr.msra.gmra.mrb[32].mxu1 %v5644_v38 }
  0xbd   :  { %894 = vmatpush1.bf16.msra.mxu1 %v4610_v55  ;;  %925 = vmatprep.mubr.bf16.mxu1 %v5646_v0 }
  0xbe   :  { %895 = vmatprep.subr.bf16.mxu1 %v4613_v56 }
  0xc1   :  { %896 = vmatpush1.bf16.msra.mxu1 %v4617_v57 }
  0xc2   :  { %897 = vmatprep.subr.bf16.mxu1 %v4621_v58 }
  0xc5   :  { %898 = vmatpush1.bf16.msra.mxu1 %v4627_v59 }
  0xc6   :  { %899 = vmatprep.subr.bf16.mxu1 %v4629_v60 }
  0xc9   :  { %900 = vmatpush1.bf16.msra.mxu1 %v4634_v61 }
  0xca   :  { %901 = vmatprep.subr.bf16.mxu1 %v4638_v62 }
  0xcd   :  { %902 = vmatpush1.bf16.msra.mxu1 %v4641_v63 }
  0xce   :  { %903 = vmatprep.subr.bf16.mxu1 %v4644_v1 }
  0xd1   :  { %904 = vmatpush1.bf16.msra.mxu1 %v4647_v2 }
  0xd2   :  { %905 = vmatprep.subr.bf16.mxu1 %v4651_v5 }
  0xd5   :  { %906 = vmatpush1.bf16.msra.mxu1 %v4654_v6 }
  0xd6   :  { %907 = vmatprep.subr.bf16.mxu1 %v4657_v9 }
  0xd9   :  { %908 = vmatpush1.bf16.msra.mxu1 %v4660_v10 }
  0xda   :  { %1015 = vmatprep.subr.bf16.mxu1 %v4606_v54 }
 0x14f   :  { %v362_v27 = vpop.f32.mrb[0].mxu1  ;;  %v765_v35 = vpop.f32.mrb[0].mxu0 }
 0x150   :  { %v566_v28 = vadd.f32 %v543_v23, %v362_v27  ;;  %v364_v31 = vpop.f32.mrb[1].mxu1  ;;  %v767_v40 = vpop.f32.mrb[1].mxu0 }
 0x151   :  { %v567_v32 = vadd.f32 %v547_v24, %v364_v31  ;;  %v366_v34 = vpop.f32.mrb[2].mxu1  ;;  %v769_v43 = vpop.f32.mrb[2].mxu0 }
 0x152   :  { %v4695_v36 = vadd.f32 %v543_v23, %v366_v34  ;;  %v813_v37 = vadd.f32 %v765_v35, %v566_v28  ;;  %v368_v39 = vpop.f32.mrb[3].mxu1  ;;  %v770_v44 = vpop.f32.mrb[3].mxu0 }
 0x153   :  { %v4697_v41 = vadd.f32 %v547_v24, %v368_v39  ;;  %v814_v42 = vadd.f32 %v767_v40, %v567_v32 }
 0x157   :  { %v372_v45 = vpop.f32.mrb[4].mxu1 }
 0x158   :  { %v4699_v46 = vadd.f32 %v543_v23, %v372_v45  ;;  %v374_v47 = vpop.f32.mrb[5].mxu1 }
 0x159   :  { %v4701_v48 = vadd.f32 %v547_v24, %v374_v47  ;;  %v376_v49 = vpop.f32.mrb[6].mxu1 }
 0x15a   :  { %v4703_v50 = vadd.f32 %v543_v23, %v376_v49  ;;  %v378_v51 = vpop.f32.mrb[7].mxu1 }
 0x15b   :  { %v4705_v52 = vadd.f32 %v547_v24, %v378_v51 }
 0x15d   :  { %5653 = vst [vmem:[#allocation21_spill] sm:$0xff] %v4705_v52 }
 0x15f   :  { %v382_v53 = vpop.f32.mrb[8].mxu1 }
 0x160   :  { %v4707_v12 = vadd.f32 %v543_v23, %v382_v53  ;;  %v384_v27 = vpop.f32.mrb[9].mxu1  ;;  %v5648_v53 = vsub.s32 2, %v4684_v15 }
 0x161   :  { %v4709_v28 = vadd.f32 %v547_v24, %v384_v27  ;;  %v386_v31 = vpop.f32.mrb[10].mxu1  ;;  %v5651_v27 = vsub.s32 3, %v4684_v15  ;;  %v3556_v15 = vmul.f32 -1.442695, %v814_v42 }
 0x162   :  { %5654 = vst [vmem:[#allocation22_spill] sm:$0xff] %v4707_v12  ;;  %v4711_v32 = vadd.f32 %v543_v23, %v386_v31  ;;  %v388_v34 = vpop.f32.mrb[11].mxu1 }
 0x163   :  { %5655 = vst [vmem:[#allocation23_spill] sm:$0xff] %v4709_v28  ;;  %v4713_v35 = vadd.f32 %v547_v24, %v388_v34  ;;  %v551_v34 = vrot.slane %v538_v19, %v5648_v53  ;;  %3947 = vpow2.f32 %v3556_v15 }
 0x164   :  { %5656 = vst [vmem:[#allocation24_spill] sm:$0xff] %v4711_v32 }
 0x165   :  { %5657 = vst [vmem:[#allocation25_spill] sm:$0xff] %v4713_v35 }
 0x167   :  { %v392_v39 = vpop.f32.mrb[12].mxu1 }
 0x168   :  { %v4715_v40 = vadd.f32 %v543_v23, %v392_v39  ;;  %v394_v43 = vpop.f32.mrb[13].mxu1  ;;  %v555_v39 = vrot.slane %v538_v19, %v5651_v27  ;;  %v3555_v19 = vmul.f32 -1.442695, %v813_v37 }
 0x169   :  { %v4717_v44 = vadd.f32 %v547_v24, %v394_v43  ;;  %v396_v45 = vpop.f32.mrb[14].mxu1 }
 0x16a   :  { %5658 = vst [vmem:[#allocation26_spill] sm:$0xff] %v4715_v40  ;;  %v4719_v47 = vadd.f32 %v543_v23, %v396_v45  ;;  %v398_v49 = vpop.f32.mrb[15].mxu1  ;;  %3949 = vpow2.f32 %v3555_v19 }
 0x16b   :  { %5659 = vst [vmem:[#allocation27_spill] sm:$0xff] %v4717_v44  ;;  %v4721_v51 = vadd.f32 %v547_v24, %v398_v49 }
 0x16c   :  { %5660 = vst [vmem:[#allocation28_spill] sm:$0xff] %v4719_v47 }
 0x16d   :  { %5661 = vst [vmem:[#allocation29_spill] sm:$0xff] %v4721_v51  ;;  %v3948_v15 = vpop.eup %3947 }
 0x16f   :  { %v435_v31 = vpop.f32.mrb[16].mxu1 }
 0x170   :  { %v437_v20 = vpop.f32.mrb[17].mxu1 }
 0x171   :  { %v439_v43 = vpop.f32.mrb[18].mxu1  ;;  %v569_v12 = vadd.f32 %v555_v39, %v437_v20 }
 0x172   :  { %v4729_v16 = vadd.f32 %v551_v34, %v439_v43  ;;  %v441_v23 = vpop.f32.mrb[19].mxu1 }
 0x173   :  { %v4731_v45 = vadd.f32 %v555_v39, %v441_v23 }
 0x174   :  { %v3950_v19 = vpop.eup %3949 }
 0x177   :  { %v445_v24 = vpop.f32.mrb[20].mxu1 }
 0x178   :  { %v4733_v49 = vadd.f32 %v551_v34, %v445_v24  ;;  %v447_v38 = vpop.f32.mrb[21].mxu1 }
 0x179   :  { %v4735_v0 = vadd.f32 %v555_v39, %v447_v38  ;;  %v449_v51 = vpop.f32.mrb[22].mxu1 }
 0x17a   :  { %v4737_v47 = vadd.f32 %v551_v34, %v449_v51  ;;  %v451_v53 = vpop.f32.mrb[23].mxu1 }
 0x17b   :  { %v4739_v44 = vadd.f32 %v555_v39, %v451_v53 }
 0x17d   :  { %5662 = vst [vmem:[#allocation30_spill] sm:$0xff] %v4739_v44 }
 0x17f   :  { %v455_v27 = vpop.f32.mrb[24].mxu1 }
 0x180   :  { %v4741_v43 = vadd.f32 %v551_v34, %v455_v27  ;;  %v457_v23 = vpop.f32.mrb[25].mxu1 }
 0x181   :  { %v4743_v40 = vadd.f32 %v555_v39, %v457_v23  ;;  %v459_v24 = vpop.f32.mrb[26].mxu1 }
 0x182   :  { %5663 = vst [vmem:[#allocation31_spill] sm:$0xff] %v4741_v43  ;;  %v4745_v35 = vadd.f32 %v551_v34, %v459_v24  ;;  %v461_v38 = vpop.f32.mrb[27].mxu1  ;;  %v826_v24 = vadd.f32 1.0, %v3950_v19 }
 0x183   :  { %5664 = vst [vmem:[#allocation32_spill] sm:$0xff] %v4743_v40  ;;  %v4747_v32 = vadd.f32 %v555_v39, %v461_v38  ;;  %v827_v40 = vadd.f32 1.0, %v3948_v15 }
 0x184   :  { %5665 = vst [vmem:[#allocation33_spill] sm:$0xff] %v4745_v35  ;;  %v568_v35 = vadd.f32 %v551_v34, %v435_v31 }
 0x185   :  { %5666 = vst [vmem:[#allocation34_spill] sm:$0xff] %v4747_v32  ;;  %3951 = vrcp.f32 %v827_v40 }
 0x186   :  { %3953 = vrcp.f32 %v826_v24 }
 0x187   :  { %v465_v51 = vpop.f32.mrb[28].mxu1 }
 0x188   :  { %v4749_v28 = vadd.f32 %v551_v34, %v465_v51  ;;  %v467_v53 = vpop.f32.mrb[29].mxu1 }
 0x189   :  { %v4751_v42 = vadd.f32 %v555_v39, %v467_v53  ;;  %v469_v37 = vpop.f32.mrb[30].mxu1 }
 0x18a   :  { %5667 = vst [vmem:[#allocation35_spill] sm:$0xff] %v4749_v28  ;;  %v4753_v27 = vadd.f32 %v551_v34, %v469_v37  ;;  %v471_v43 = vpop.f32.mrb[31].mxu1 }
 0x18b   :  { %5668 = vst [vmem:[#allocation36_spill] sm:$0xff] %v4751_v42  ;;  %v4755_v23 = vadd.f32 %v555_v39, %v471_v43 }
 0x18c   :  { %5669 = vst [vmem:[#allocation37_spill] sm:$0xff] %v4753_v27 }
 0x18d   :  { %5670 = vst [vmem:[#allocation38_spill] sm:$0xff] %v4755_v23 }
 0x18f   :  { %v806_v38 = vpop.f32.mrb[32].mxu1  ;;  %v3952_v37 = vpop.eup %3951 }
 0x190   :  { %v815_v32 = vadd.f32 %v806_v38, %v568_v35  ;;  %v808_v44 = vpop.f32.mrb[33].mxu1  ;;  %v3954_v27 = vpop.eup %3953  ;;  %v836_v23 = vmul.f32 0.0, %v3952_v37 }
 0x191   :  { %v816_v51 = vadd.f32 %v808_v44, %v569_v12  ;;  %v810_v28 = vpop.f32.mrb[34].mxu1 }
 0x192   :  { %v3557_v53 = vmul.f32 -1.442695, %v815_v32  ;;  %v811_v42 = vpop.f32.mrb[35].mxu1 }
 0x193   :  { %3955 = vtanh.f32 %v816_v51 }
 0x194   :  { %3957 = vpow2.f32 %v3557_v53 }
 0x19d   :  { %v3956_v52 = vpop.eup %3955 }
 0x19e   :  { %v3958_v43 = vpop.eup %3957  ;;  %v837_v15 = vmul.f32 %v3956_v52, %v3954_v27  ;;  %v5671_v52 = vmov 0  }
 0x19f   :  { %v828_v19 = vadd.f32 1.0, %v3958_v43 }
 0x1a0   :  { %v4757_v31 = vadd.f32 %v837_v15, %v836_v23 }
 0x1a1   :  { %3959 = vrcp.f32 %v828_v19 }
 0x1a2   :  { %3961 = vtanh.f32 %v4757_v31 }
 0x1ab   :  { %v3960_v20 = vpop.eup %3959 }
 0x1ac   :  { %v3962_v12 = vpop.eup %3961 }
 0x1ad   :  { %v840_v28 = vmul.f32 %v3962_v12, %v3960_v20 }
 0x1af   :  { %v841_v35 = vpack.c.bf16 %v840_v28, %v840_v28 }
 0x1b1   :  { %842 = vst [vmem:[#allocation3] sm:$0xf] %v841_v35  ;;  %885 = vmatmul.mubr.bf16.vlgmr.msra.gmra.mrb[4].mxu0 %v841_v35  ;;  %926 = vmatmul.mubr.bf16.vlgmr.msra.gmra.mrb[36].mxu1 %v841_v35 }
 0x1b2   :  { %975 = vmatpush1.bf16.msra.mxu0 %v4540_v4  ;;  %1016 = vmatpush1.bf16.msra.mxu1 %v4610_v55 }
 0x1b3   :  { %976 = vmatprep.subr.bf16.mxu0 %v4543_v7  ;;  %1017 = vmatprep.subr.bf16.mxu1 %v4613_v56 }
 0x1b4   :  { %1006 = vmatprep.mubr.bf16.mxu0 %v5671_v52  ;;  %1047 = vmatprep.mubr.bf16.mxu1 %v5671_v52 }
 0x1b6   :  { %977 = vmatpush1.bf16.msra.mxu0 %v4546_v8  ;;  %1018 = vmatpush1.bf16.msra.mxu1 %v4617_v57 }
 0x1b7   :  { %978 = vmatprep.subr.bf16.mxu0 %v4549_v11  ;;  %1019 = vmatprep.subr.bf16.mxu1 %v4621_v58 }
 0x1ba   :  { %979 = vmatpush1.bf16.msra.mxu0 %v4552_v13  ;;  %1020 = vmatpush1.bf16.msra.mxu1 %v4627_v59 }
 0x1bb   :  { %980 = vmatprep.subr.bf16.mxu0 %v4555_v14  ;;  %1021 = vmatprep.subr.bf16.mxu1 %v4629_v60 }
 0x1be   :  { %981 = vmatpush1.bf16.msra.mxu0 %v4558_v17  ;;  %1022 = vmatpush1.bf16.msra.mxu1 %v4634_v61 }
 0x1bf   :  { %982 = vmatprep.subr.bf16.mxu0 %v4561_v18  ;;  %1023 = vmatprep.subr.bf16.mxu1 %v4638_v62 }
 0x1c2   :  { %983 = vmatpush1.bf16.msra.mxu0 %v4564_v21  ;;  %1024 = vmatpush1.bf16.msra.mxu1 %v4641_v63 }
 0x1c3   :  { %984 = vmatprep.subr.bf16.mxu0 %v4567_v22  ;;  %1025 = vmatprep.subr.bf16.mxu1 %v4644_v1 }
 0x1c6   :  { %985 = vmatpush1.bf16.msra.mxu0 %v4570_v25  ;;  %1026 = vmatpush1.bf16.msra.mxu1 %v4647_v2 }
 0x1c7   :  { %986 = vmatprep.subr.bf16.mxu0 %v4573_v26  ;;  %1027 = vmatprep.subr.bf16.mxu1 %v4651_v5 }
 0x1ca   :  { %987 = vmatpush1.bf16.msra.mxu0 %v4576_v29  ;;  %1028 = vmatpush1.bf16.msra.mxu1 %v4654_v6 }
 0x1cb   :  { %988 = vmatprep.subr.bf16.mxu0 %v4579_v30  ;;  %1029 = vmatprep.subr.bf16.mxu1 %v4657_v9 }
 0x1ce   :  { %989 = vmatpush1.bf16.msra.mxu0 %v4582_v33  ;;  %1030 = vmatpush1.bf16.msra.mxu1 %v4660_v10 }
 0x1cf   :  { %1096 = vmatprep.subr.bf16.mxu0 %v4538_v3  ;;  %1137 = vmatprep.subr.bf16.mxu1 %v4606_v54 }
 0x284   :  { %v886_v4 = vpop.f32.mrb[4].mxu0  ;;  %v927_v7 = vpop.f32.mrb[36].mxu1 }
 0x285   :  { %v934_v8 = vadd.f32 %v886_v4, %v4695_v36  ;;  %v936_v11 = vadd.f32 %v927_v7, %v4729_v16  ;;  %v888_v32 = vpop.f32.mrb[5].mxu0  ;;  %v929_v40 = vpop.f32.mrb[37].mxu1 }
 0x286   :  { %v935_v44 = vadd.f32 %v888_v32, %v4697_v41  ;;  %v937_v34 = vadd.f32 %v929_v40, %v4731_v45  ;;  %v890_v39 = vpop.f32.mrb[6].mxu0  ;;  %v931_v42 = vpop.f32.mrb[38].mxu1  ;;  %v4816_v32 = vld [vmem:[#allocation12 + $0x44] ss:$16 sps:$4 sm:$0xff]  }
 0x287   :  { %v3558_v27 = vmul.f32 -1.442695, %v934_v8  ;;  %v891_v23 = vpop.f32.mrb[7].mxu0  ;;  %v932_v24 = vpop.f32.mrb[39].mxu1  ;;  %v3560_v38 = vmul.f32 -1.442695, %v936_v11 }
 0x288   :  { %v3559_v3 = vmul.f32 -1.442695, %v935_v44  ;;  %v4802_v8 = vld [vmem:[#allocation12] ss:$16 sps:$4 sm:$0xff]   ;;  %v4806_v11 = vld [vmem:[#allocation12 + $0x24] ss:$16 sps:$4 sm:$0xff]  }
 0x289   :  { %3963 = vpow2.f32 %v3558_v27 }
 0x28a   :  { %3965 = vpow2.f32 %v3559_v3 }
 0x28b   :  { %3967 = vtanh.f32 %v937_v34 }
 0x28c   :  { %3969 = vpow2.f32 %v3560_v38 }
 0x293   :  { %v3964_v51 = vpop.eup %3963 }
 0x294   :  { %v947_v53 = vadd.f32 1.0, %v3964_v51  ;;  %v3966_v36 = vpop.eup %3965 }
 0x295   :  { %v948_v16 = vadd.f32 1.0, %v3966_v36  ;;  %v3968_v41 = vpop.eup %3967 }
 0x296   :  { %3971 = vrcp.f32 %v947_v53  ;;  %v3970_v37 = vpop.eup %3969 }
 0x297   :  { %3973 = vrcp.f32 %v948_v16  ;;  %v949_v19 = vadd.f32 1.0, %v3970_v37 }
 0x299   :  { %3975 = vrcp.f32 %v949_v19  ;;  %v4872_v19 = vld [vmem:[#allocation12 + $0x60] ss:$16 sps:$4 sm:$0xff]  }
 0x2a0   :  { %v3972_v45 = vpop.eup %3971 }
 0x2a1   :  { %v958_v43 = vmul.f32 %v3972_v45, %v3968_v41  ;;  %v3974_v15 = vpop.eup %3973 }
 0x2a2   :  { %v957_v20 = vmul.f32 %v3974_v15, %v4757_v31  ;;  %v4812_v31 = vld [vmem:[#allocation12 + $0x20] ss:$16 sps:$4 sm:$0xff]   ;;  %v4868_v15 = vld [vmem:[#allocation12 + $0x64] ss:$16 sps:$4 sm:$0xff]  }
 0x2a3   :  { %v3976_v28 = vpop.eup %3975 }
 0x2a4   :  { %v4799_v12 = vadd.f32 %v958_v43, %v957_v20  ;;  %v4864_v43 = vld [vmem:[#allocation12 + $0x40] ss:$16 sps:$4 sm:$0xff]   ;;  %v4876_v20 = vld [vmem:[#allocation12 + $0x84] ss:$16 sps:$4 sm:$0xff]  }
 0x2a6   :  { %3977 = vtanh.f32 %v4799_v12 }
 0x2b0   :  { %v3978_v35 = vpop.eup %3977 }
 0x2b1   :  { %v961_v4 = vmul.f32 %v3978_v35, %v3976_v28  ;;  %v4884_v28 = vld [vmem:[#allocation12 + $0xa4] ss:$16 sps:$4 sm:$0xff]   ;;  %v4888_v35 = vld [vmem:[#allocation12 + $0xa0] ss:$16 sps:$4 sm:$0xff]  }
 0x2b3   :  { %v962_v7 = vpack.c.bf16 %v961_v4, %v961_v4  ;;  %v4892_v4 = vld [vmem:[#allocation12 + $0xc4] ss:$16 sps:$4 sm:$0xff]  }
 0x2b5   :  { %964 = vst [vmem:[#allocation3 + $0x4] sm:$0xf] %v962_v7  ;;  %1007 = vmatmul.mubr.bf16.vlgmr.msra.gmra.mrb[8].mxu0 %v962_v7  ;;  %1048 = vmatmul.mubr.bf16.vlgmr.msra.gmra.mrb[40].mxu1 %v962_v7  ;;  %v4896_v7 = vld [vmem:[#allocation12 + $0xc0] ss:$16 sps:$4 sm:$0xff]  }
 0x2b6   :  { %1097 = vmatpush1.bf16.msra.mxu0 %v4802_v8  ;;  %1138 = vmatpush1.bf16.msra.mxu1 %v4610_v55 }
 0x2b7   :  { %1098 = vmatprep.subr.bf16.mxu0 %v4806_v11  ;;  %1139 = vmatprep.subr.bf16.mxu1 %v4613_v56 }
 0x2b8   :  { %1128 = vmatprep.mubr.bf16.mxu0 %v5671_v52  ;;  %1169 = vmatprep.mubr.bf16.mxu1 %v5671_v52 }
 0x2ba   :  { %1099 = vmatpush1.bf16.msra.mxu0 %v4812_v31  ;;  %1140 = vmatpush1.bf16.msra.mxu1 %v4617_v57 }
 0x2bb   :  { %1100 = vmatprep.subr.bf16.mxu0 %v4816_v32  ;;  %1141 = vmatprep.subr.bf16.mxu1 %v4621_v58 }
 0x2be   :  { %1101 = vmatpush1.bf16.msra.mxu0 %v4552_v13  ;;  %1142 = vmatpush1.bf16.msra.mxu1 %v4627_v59  ;;  %v4842_v13 = vld [vmem:[#allocation12 + $0x4] ss:$16 sps:$4 sm:$0xff]  }
 0x2bf   :  { %1102 = vmatprep.subr.bf16.mxu0 %v4555_v14  ;;  %1143 = vmatprep.subr.bf16.mxu1 %v4629_v60 }
 0x2c2   :  { %1103 = vmatpush1.bf16.msra.mxu0 %v4558_v17  ;;  %1144 = vmatpush1.bf16.msra.mxu1 %v4634_v61 }
 0x2c3   :  { %1104 = vmatprep.subr.bf16.mxu0 %v4561_v18  ;;  %1145 = vmatprep.subr.bf16.mxu1 %v4638_v62 }
 0x2c6   :  { %1105 = vmatpush1.bf16.msra.mxu0 %v4564_v21  ;;  %1146 = vmatpush1.bf16.msra.mxu1 %v4641_v63 }
 0x2c7   :  { %1106 = vmatprep.subr.bf16.mxu0 %v4567_v22  ;;  %1147 = vmatprep.subr.bf16.mxu1 %v4644_v1 }
 0x2ca   :  { %1107 = vmatpush1.bf16.msra.mxu0 %v4570_v25  ;;  %1148 = vmatpush1.bf16.msra.mxu1 %v4647_v2 }
 0x2cb   :  { %1108 = vmatprep.subr.bf16.mxu0 %v4573_v26  ;;  %1149 = vmatprep.subr.bf16.mxu1 %v4651_v5 }
 0x2ce   :  { %1109 = vmatpush1.bf16.msra.mxu0 %v4576_v29  ;;  %1150 = vmatpush1.bf16.msra.mxu1 %v4654_v6 }
 0x2cf   :  { %1110 = vmatprep.subr.bf16.mxu0 %v4579_v30  ;;  %1151 = vmatprep.subr.bf16.mxu1 %v4657_v9 }
 0x2d2   :  { %1111 = vmatpush1.bf16.msra.mxu0 %v4582_v33  ;;  %1152 = vmatpush1.bf16.msra.mxu1 %v4660_v10 }
 0x2d3   :  { %1218 = vmatprep.subr.bf16.mxu0 %v4842_v13  ;;  %1259 = vmatprep.subr.bf16.mxu1 %v4606_v54 }
 0x388   :  { %v1008_v14 = vpop.f32.mrb[8].mxu0  ;;  %v1049_v17 = vpop.f32.mrb[40].mxu1 }
 0x389   :  { %v1056_v18 = vadd.f32 %v1008_v14, %v4699_v46  ;;  %v1058_v21 = vadd.f32 %v1049_v17, %v4733_v49  ;;  %v1010_v22 = vpop.f32.mrb[9].mxu0  ;;  %v1051_v25 = vpop.f32.mrb[41].mxu1  ;;  %v4900_v14 = vld [vmem:[#allocation12 + $0xe4] ss:$16 sps:$4 sm:$0xff]   ;;  %v4904_v17 = vld [vmem:[#allocation12 + $0xe0] ss:$16 sps:$4 sm:$0xff]  }
 0x38a   :  { %v1057_v26 = vadd.f32 %v1010_v22, %v4701_v48  ;;  %v1059_v29 = vadd.f32 %v1051_v25, %v4735_v0  ;;  %v1012_v30 = vpop.f32.mrb[10].mxu0  ;;  %v1053_v33 = vpop.f32.mrb[42].mxu1 }
 0x38b   :  { %v3561_v40 = vmul.f32 -1.442695, %v1056_v18  ;;  %v1013_v44 = vpop.f32.mrb[11].mxu0  ;;  %v1054_v34 = vpop.f32.mrb[43].mxu1  ;;  %v3563_v42 = vmul.f32 -1.442695, %v1058_v21 }
 0x38c   :  { %v3562_v39 = vmul.f32 -1.442695, %v1057_v26  ;;  %v5672_v30 = vld [vmem:[#allocation21_spill] sm:$0xff] }
 0x38d   :  { %3979 = vpow2.f32 %v3561_v40  ;;  %v5673_v40 = vld [vmem:[#allocation30_spill] sm:$0xff] }
 0x38e   :  { %3981 = vpow2.f32 %v3562_v39 }
 0x38f   :  { %3983 = vtanh.f32 %v1059_v29 }
 0x390   :  { %3985 = vpow2.f32 %v3563_v42 }
 0x397   :  { %v3980_v27 = vpop.eup %3979 }
 0x398   :  { %v1069_v23 = vadd.f32 1.0, %v3980_v27  ;;  %v3982_v46 = vpop.eup %3981 }
 0x399   :  { %v1070_v49 = vadd.f32 1.0, %v3982_v46  ;;  %v3984_v48 = vpop.eup %3983 }
 0x39a   :  { %3987 = vrcp.f32 %v1069_v23  ;;  %v3986_v24 = vpop.eup %3985 }
 0x39b   :  { %3989 = vrcp.f32 %v1070_v49  ;;  %v1071_v51 = vadd.f32 1.0, %v3986_v24 }
 0x39d   :  { %3991 = vrcp.f32 %v1071_v51 }
 0x3a4   :  { %v3988_v0 = vpop.eup %3987 }
 0x3a5   :  { %v1080_v3 = vmul.f32 %v3988_v0, %v3984_v48  ;;  %v3990_v38 = vpop.eup %3989 }
 0x3a6   :  { %v1079_v53 = vmul.f32 %v3990_v38, %v4799_v12  ;;  %v4880_v12 = vld [vmem:[#allocation12 + $0x80] ss:$16 sps:$4 sm:$0xff]  }
 0x3a7   :  { %v3992_v16 = vpop.eup %3991 }
 0x3a8   :  { %v4851_v36 = vadd.f32 %v1080_v3, %v1079_v53 }
 0x3aa   :  { %3993 = vtanh.f32 %v4851_v36 }
 0x3b4   :  { %v3994_v41 = vpop.eup %3993 }
 0x3b5   :  { %v1083_v37 = vmul.f32 %v3994_v41, %v3992_v16 }
 0x3b7   :  { %v1084_v45 = vpack.c.bf16 %v1083_v37, %v1083_v37 }
 0x3b9   :  { %1086 = vst [vmem:[#allocation3 + $0x8] sm:$0xf] %v1084_v45  ;;  %1129 = vmatmul.mubr.bf16.vlgmr.msra.gmra.mrb[12].mxu0 %v1084_v45  ;;  %1170 = vmatmul.mubr.bf16.vlgmr.msra.gmra.mrb[44].mxu1 %v1084_v45 }
 0x3ba   :  { %1219 = vmatpush1.bf16.msra.mxu0 %v4802_v8  ;;  %1260 = vmatpush1.bf16.msra.mxu1 %v4610_v55 }
 0x3bb   :  { %1220 = vmatprep.subr.bf16.mxu0 %v4806_v11  ;;  %1261 = vmatprep.subr.bf16.mxu1 %v4613_v56 }
 0x3bc   :  { %1250 = vmatprep.mubr.bf16.mxu0 %v5671_v52  ;;  %1291 = vmatprep.mubr.bf16.mxu1 %v5671_v52 }
 0x3be   :  { %1221 = vmatpush1.bf16.msra.mxu0 %v4812_v31  ;;  %1262 = vmatpush1.bf16.msra.mxu1 %v4617_v57 }
 0x3bf   :  { %1222 = vmatprep.subr.bf16.mxu0 %v4816_v32  ;;  %1263 = vmatprep.subr.bf16.mxu1 %v4621_v58 }
 0x3c2   :  { %1223 = vmatpush1.bf16.msra.mxu0 %v4864_v43  ;;  %1264 = vmatpush1.bf16.msra.mxu1 %v4627_v59 }
 0x3c3   :  { %1224 = vmatprep.subr.bf16.mxu0 %v4868_v15  ;;  %1265 = vmatprep.subr.bf16.mxu1 %v4629_v60 }
 0x3c6   :  { %1225 = vmatpush1.bf16.msra.mxu0 %v4872_v19  ;;  %1266 = vmatpush1.bf16.msra.mxu1 %v4634_v61 }
 0x3c7   :  { %1226 = vmatprep.subr.bf16.mxu0 %v4876_v20  ;;  %1267 = vmatprep.subr.bf16.mxu1 %v4638_v62 }
 0x3ca   :  { %1227 = vmatpush1.bf16.msra.mxu0 %v4880_v12  ;;  %1268 = vmatpush1.bf16.msra.mxu1 %v4641_v63 }
 0x3cb   :  { %1228 = vmatprep.subr.bf16.mxu0 %v4884_v28  ;;  %1269 = vmatprep.subr.bf16.mxu1 %v4644_v1 }
 0x3ce   :  { %1229 = vmatpush1.bf16.msra.mxu0 %v4888_v35  ;;  %1270 = vmatpush1.bf16.msra.mxu1 %v4647_v2 }
 0x3cf   :  { %1230 = vmatprep.subr.bf16.mxu0 %v4892_v4  ;;  %1271 = vmatprep.subr.bf16.mxu1 %v4651_v5 }
 0x3d2   :  { %1231 = vmatpush1.bf16.msra.mxu0 %v4896_v7  ;;  %1272 = vmatpush1.bf16.msra.mxu1 %v4654_v6 }
 0x3d3   :  { %1232 = vmatprep.subr.bf16.mxu0 %v4900_v14  ;;  %1273 = vmatprep.subr.bf16.mxu1 %v4657_v9 }
 0x3d6   :  { %1233 = vmatpush1.bf16.msra.mxu0 %v4904_v17  ;;  %1274 = vmatpush1.bf16.msra.mxu1 %v4660_v10 }
 0x3d7   :  { %1340 = vmatprep.subr.bf16.mxu0 %v4842_v13  ;;  %1381 = vmatprep.subr.bf16.mxu1 %v4606_v54 }
 0x48c   :  { %v1130_v18 = vpop.f32.mrb[12].mxu0  ;;  %v1171_v21 = vpop.f32.mrb[44].mxu1 }
 0x48d   :  { %v1178_v22 = vadd.f32 %v1130_v18, %v4703_v50  ;;  %v1180_v25 = vadd.f32 %v1171_v21, %v4737_v47  ;;  %v1132_v26 = vpop.f32.mrb[13].mxu0  ;;  %v1173_v29 = vpop.f32.mrb[45].mxu1 }
 0x48e   :  { %v1179_v33 = vadd.f32 %v1132_v26, %v5672_v30  ;;  %v1181_v44 = vadd.f32 %v1173_v29, %v5673_v40  ;;  %v1134_v34 = vpop.f32.mrb[14].mxu0  ;;  %v1175_v39 = vpop.f32.mrb[46].mxu1 }
 0x48f   :  { %v3564_v42 = vmul.f32 -1.442695, %v1178_v22  ;;  %v1135_v27 = vpop.f32.mrb[15].mxu0  ;;  %v1176_v23 = vpop.f32.mrb[47].mxu1  ;;  %v3566_v49 = vmul.f32 -1.442695, %v1180_v25 }
 0x490   :  { %v3565_v46 = vmul.f32 -1.442695, %v1179_v33  ;;  %v5675_v25 = vld [vmem:[#allocation31_spill] sm:$0xff] }
 0x491   :  { %3995 = vpow2.f32 %v3564_v42  ;;  %v5676_v33 = vld [vmem:[#allocation23_spill] sm:$0xff] }
 0x492   :  { %3997 = vpow2.f32 %v3565_v46 }
 0x493   :  { %3999 = vtanh.f32 %v1181_v44  ;;  %v5677_v44 = vld [vmem:[#allocation32_spill] sm:$0xff] }
 0x494   :  { %4001 = vpow2.f32 %v3566_v49 }
 0x49b   :  { %v3996_v48 = vpop.eup %3995 }
 0x49c   :  { %v1191_v24 = vadd.f32 1.0, %v3996_v48  ;;  %v3998_v50 = vpop.eup %3997 }
 0x49d   :  { %v1192_v47 = vadd.f32 1.0, %v3998_v50  ;;  %v4000_v0 = vpop.eup %3999 }
 0x49e   :  { %4003 = vrcp.f32 %v1191_v24  ;;  %v4002_v3 = vpop.eup %4001 }
 0x49f   :  { %4005 = vrcp.f32 %v1192_v47  ;;  %v1193_v16 = vadd.f32 1.0, %v4002_v3 }
 0x4a1   :  { %4007 = vrcp.f32 %v1193_v16 }
 0x4a8   :  { %v4004_v38 = vpop.eup %4003 }
 0x4a9   :  { %v1202_v51 = vmul.f32 %v4004_v38, %v4000_v0  ;;  %v4006_v53 = vpop.eup %4005 }
 0x4aa   :  { %v1201_v41 = vmul.f32 %v4006_v53, %v4851_v36 }
 0x4ab   :  { %v4008_v45 = vpop.eup %4007 }
 0x4ac   :  { %v4915_v37 = vadd.f32 %v1202_v51, %v1201_v41 }
 0x4ae   :  { %4009 = vtanh.f32 %v4915_v37 }
 0x4b8   :  { %v4010_v18 = vpop.eup %4009 }
 0x4b9   :  { %v1205_v21 = vmul.f32 %v4010_v18, %v4008_v45 }
 0x4bb   :  { %v1206_v22 = vpack.c.bf16 %v1205_v21, %v1205_v21 }
 0x4bd   :  { %1208 = vst [vmem:[#allocation3 + $0xc] sm:$0xf] %v1206_v22  ;;  %1251 = vmatmul.mubr.bf16.vlgmr.msra.gmra.mrb[16].mxu0 %v1206_v22  ;;  %1292 = vmatmul.mubr.bf16.vlgmr.msra.gmra.mrb[48].mxu1 %v1206_v22 }
 0x4be   :  { %1341 = vmatpush1.bf16.msra.mxu0 %v4802_v8  ;;  %1382 = vmatpush1.bf16.msra.mxu1 %v4610_v55 }
 0x4bf   :  { %1342 = vmatprep.subr.bf16.mxu0 %v4806_v11  ;;  %1383 = vmatprep.subr.bf16.mxu1 %v4613_v56 }
 0x4c0   :  { %1372 = vmatprep.mubr.bf16.mxu0 %v5671_v52  ;;  %1413 = vmatprep.mubr.bf16.mxu1 %v5671_v52 }
 0x4c2   :  { %1343 = vmatpush1.bf16.msra.mxu0 %v4812_v31  ;;  %1384 = vmatpush1.bf16.msra.mxu1 %v4617_v57  ;;  %v5674_v57 = vld [vmem:[#allocation22_spill] sm:$0xff] }
 0x4c3   :  { %1344 = vmatprep.subr.bf16.mxu0 %v4816_v32  ;;  %1385 = vmatprep.subr.bf16.mxu1 %v4621_v58 }
 0x4c6   :  { %1345 = vmatpush1.bf16.msra.mxu0 %v4864_v43  ;;  %1386 = vmatpush1.bf16.msra.mxu1 %v4627_v59 }
 0x4c7   :  { %1346 = vmatprep.subr.bf16.mxu0 %v4868_v15  ;;  %1387 = vmatprep.subr.bf16.mxu1 %v4629_v60 }
 0x4ca   :  { %1347 = vmatpush1.bf16.msra.mxu0 %v4872_v19  ;;  %1388 = vmatpush1.bf16.msra.mxu1 %v4634_v61 }
 0x4cb   :  { %1348 = vmatprep.subr.bf16.mxu0 %v4876_v20  ;;  %1389 = vmatprep.subr.bf16.mxu1 %v4638_v62 }
 0x4ce   :  { %1349 = vmatpush1.bf16.msra.mxu0 %v4880_v12  ;;  %1390 = vmatpush1.bf16.msra.mxu1 %v4641_v63 }
 0x4cf   :  { %1350 = vmatprep.subr.bf16.mxu0 %v4884_v28  ;;  %1391 = vmatprep.subr.bf16.mxu1 %v4644_v1 }
 0x4d2   :  { %1351 = vmatpush1.bf16.msra.mxu0 %v4888_v35  ;;  %1392 = vmatpush1.bf16.msra.mxu1 %v4647_v2 }
 0x4d3   :  { %1352 = vmatprep.subr.bf16.mxu0 %v4892_v4  ;;  %1393 = vmatprep.subr.bf16.mxu1 %v4651_v5 }
 0x4d6   :  { %1353 = vmatpush1.bf16.msra.mxu0 %v4896_v7  ;;  %1394 = vmatpush1.bf16.msra.mxu1 %v4654_v6 }
 0x4d7   :  { %1354 = vmatprep.subr.bf16.mxu0 %v4900_v14  ;;  %1395 = vmatprep.subr.bf16.mxu1 %v4657_v9 }
 0x4da   :  { %1355 = vmatpush1.bf16.msra.mxu0 %v4904_v17  ;;  %1396 = vmatpush1.bf16.msra.mxu1 %v4660_v10 }
 0x4db   :  { %1462 = vmatprep.subr.bf16.mxu0 %v4842_v13  ;;  %1503 = vmatprep.subr.bf16.mxu1 %v4606_v54 }
 0x590   :  { %v1252_v55 = vpop.f32.mrb[16].mxu0  ;;  %v1293_v56 = vpop.f32.mrb[48].mxu1 }
 0x591   :  { %v1300_v36 = vadd.f32 %v1252_v55, %v5674_v57  ;;  %v1302_v26 = vadd.f32 %v1293_v56, %v5675_v25  ;;  %v1254_v29 = vpop.f32.mrb[17].mxu0  ;;  %v1295_v30 = vpop.f32.mrb[49].mxu1  ;;  %v4961_v56 = vld [vmem:[#allocation12 + $0x8] ss:$16 sps:$4 sm:$0xff]   ;;  %v5681_v25 = vld [vmem:[#allocation34_spill] sm:$0xff] }
 0x592   :  { %v1301_v40 = vadd.f32 %v1254_v29, %v5676_v33  ;;  %v1303_v34 = vadd.f32 %v1295_v30, %v5677_v44  ;;  %v1256_v39 = vpop.f32.mrb[18].mxu0  ;;  %v1297_v42 = vpop.f32.mrb[50].mxu1  ;;  %v4971_v57 = vld [vmem:[#allocation12 + $0x28] ss:$16 sps:$4 sm:$0xff]  }
 0x593   :  { %v3567_v27 = vmul.f32 -1.442695, %v1300_v36  ;;  %v1257_v23 = vpop.f32.mrb[19].mxu0  ;;  %v1298_v46 = vpop.f32.mrb[51].mxu1  ;;  %v3569_v54 = vmul.f32 -1.442695, %v1302_v26 }
 0x594   :  { %v3568_v49 = vmul.f32 -1.442695, %v1301_v40 }
 0x595   :  { %4011 = vpow2.f32 %v3567_v27 }
 0x596   :  { %4013 = vpow2.f32 %v3568_v49 }
 0x597   :  { %4015 = vtanh.f32 %v1303_v34 }
 0x598   :  { %4017 = vpow2.f32 %v3569_v54 }
 0x59f   :  { %v4012_v48 = vpop.eup %4011 }
 0x5a0   :  { %v1313_v24 = vadd.f32 1.0, %v4012_v48  ;;  %v4014_v50 = vpop.eup %4013 }
 0x5a1   :  { %v1314_v47 = vadd.f32 1.0, %v4014_v50  ;;  %v4016_v0 = vpop.eup %4015 }
 0x5a2   :  { %4019 = vrcp.f32 %v1313_v24  ;;  %v4018_v3 = vpop.eup %4017 }
 0x5a3   :  { %4021 = vrcp.f32 %v1314_v47  ;;  %v1315_v16 = vadd.f32 1.0, %v4018_v3 }
 0x5a5   :  { %4023 = vrcp.f32 %v1315_v16  ;;  %v3837_v16 = vld [vmem:[#allocation11 + $0x4] ss:$16 sps:$4 sm:$0xff]  }
 0x5ac   :  { %v4020_v38 = vpop.eup %4019 }
 0x5ad   :  { %v1324_v51 = vmul.f32 %v4020_v38, %v4016_v0  ;;  %v4022_v53 = vpop.eup %4021 }
 0x5ae   :  { %v1323_v41 = vmul.f32 %v4022_v53, %v4915_v37  ;;  %v4965_v37 = vld [vmem:[#allocation12 + $0x2c] ss:$16 sps:$4 sm:$0xff]   ;;  %v4226_v53 = vld [vmem:[#allocation12 + $0x68] ss:$16 sps:$4 sm:$0xff]  }
 0x5af   :  { %v4024_v18 = vpop.eup %4023 }
 0x5b0   :  { %v4957_v45 = vadd.f32 %v1324_v51, %v1323_v41  ;;  %v4223_v51 = vld [vmem:[#allocation12 + $0x4c] ss:$16 sps:$4 sm:$0xff]  }
 0x5b2   :  { %4025 = vtanh.f32 %v4957_v45 }
 0x5bc   :  { %v4026_v21 = vpop.eup %4025 }
 0x5bd   :  { %v1327_v22 = vmul.f32 %v4026_v21, %v4024_v18  ;;  %v5683_v21 = vld [vmem:[#allocation35_spill] sm:$0xff] }
 0x5bf   :  { %v1328_v55 = vpack.c.bf16 %v1327_v22, %v1327_v22 }
 0x5c1   :  { %1330 = vst [vmem:[#allocation3 + $0x10] sm:$0xf] %v1328_v55  ;;  %1373 = vmatmul.mubr.bf16.vlgmr.msra.gmra.mrb[20].mxu0 %v1328_v55  ;;  %1414 = vmatmul.mubr.bf16.vlgmr.msra.gmra.mrb[52].mxu1 %v1328_v55 }
 0x5c2   :  { %1463 = vmatpush1.bf16.msra.mxu0 %v4802_v8  ;;  %1504 = vmatpush1.bf16.msra.mxu1 %v4961_v56 }
 0x5c3   :  { %1464 = vmatprep.subr.bf16.mxu0 %v4806_v11  ;;  %1505 = vmatprep.subr.bf16.mxu1 %v4965_v37 }
 0x5c4   :  { %1494 = vmatprep.mubr.bf16.mxu0 %v5671_v52  ;;  %1535 = vmatprep.mubr.bf16.mxu1 %v5671_v52 }
 0x5c6   :  { %1465 = vmatpush1.bf16.msra.mxu0 %v4812_v31  ;;  %1506 = vmatpush1.bf16.msra.mxu1 %v4971_v57 }
 0x5c7   :  { %1466 = vmatprep.subr.bf16.mxu0 %v4816_v32  ;;  %1507 = vmatprep.subr.bf16.mxu1 %v4621_v58  ;;  %v4222_v58 = vld [vmem:[#allocation12 + $0xc] ss:$16 sps:$4 sm:$0xff]  }
 0x5ca   :  { %1467 = vmatpush1.bf16.msra.mxu0 %v4864_v43  ;;  %1508 = vmatpush1.bf16.msra.mxu1 %v4627_v59 }
 0x5cb   :  { %1468 = vmatprep.subr.bf16.mxu0 %v4868_v15  ;;  %1509 = vmatprep.subr.bf16.mxu1 %v4629_v60 }
 0x5ce   :  { %1469 = vmatpush1.bf16.msra.mxu0 %v4872_v19  ;;  %1510 = vmatpush1.bf16.msra.mxu1 %v4634_v61  ;;  %v5678_v61 = vld [vmem:[#allocation24_spill] sm:$0xff] }
 0x5cf   :  { %1470 = vmatprep.subr.bf16.mxu0 %v4876_v20  ;;  %1511 = vmatprep.subr.bf16.mxu1 %v4638_v62 }
 0x5d2   :  { %1471 = vmatpush1.bf16.msra.mxu0 %v4880_v12  ;;  %1512 = vmatpush1.bf16.msra.mxu1 %v4641_v63  ;;  %v5679_v63 = vld [vmem:[#allocation33_spill] sm:$0xff] }
 0x5d3   :  { %1472 = vmatprep.subr.bf16.mxu0 %v4884_v28  ;;  %1513 = vmatprep.subr.bf16.mxu1 %v4644_v1 }
 0x5d6   :  { %1473 = vmatpush1.bf16.msra.mxu0 %v4888_v35  ;;  %1514 = vmatpush1.bf16.msra.mxu1 %v4647_v2 }
 0x5d7   :  { %1474 = vmatprep.subr.bf16.mxu0 %v4892_v4  ;;  %1515 = vmatprep.subr.bf16.mxu1 %v4651_v5 }
 0x5da   :  { %1475 = vmatpush1.bf16.msra.mxu0 %v4896_v7  ;;  %1516 = vmatpush1.bf16.msra.mxu1 %v4654_v6  ;;  %v5680_v6 = vld [vmem:[#allocation25_spill] sm:$0xff] }
 0x5db   :  { %1476 = vmatprep.subr.bf16.mxu0 %v4900_v14  ;;  %1517 = vmatprep.subr.bf16.mxu1 %v4657_v9 }
 0x5de   :  { %1477 = vmatpush1.bf16.msra.mxu0 %v4904_v17  ;;  %1518 = vmatpush1.bf16.msra.mxu1 %v4660_v10 }
 0x5df   :  { %1584 = vmatprep.subr.bf16.mxu0 %v4842_v13  ;;  %1625 = vmatprep.subr.bf16.mxu1 %v4222_v58 }
 0x694   :  { %v1374_v59 = vpop.f32.mrb[20].mxu0  ;;  %v1415_v60 = vpop.f32.mrb[52].mxu1 }
 0x695   :  { %v1422_v62 = vadd.f32 %v1374_v59, %v5678_v61  ;;  %v1424_v1 = vadd.f32 %v1415_v60, %v5679_v63  ;;  %v1376_v2 = vpop.f32.mrb[21].mxu0  ;;  %v1417_v5 = vpop.f32.mrb[53].mxu1 }
 0x696   :  { %v1423_v36 = vadd.f32 %v1376_v2, %v5680_v6  ;;  %v1425_v9 = vadd.f32 %v1417_v5, %v5681_v25  ;;  %v1378_v26 = vpop.f32.mrb[22].mxu0  ;;  %v1419_v29 = vpop.f32.mrb[54].mxu1 }
 0x697   :  { %v3570_v30 = vmul.f32 -1.442695, %v1422_v62  ;;  %v1379_v10 = vpop.f32.mrb[23].mxu0  ;;  %v1420_v33 = vpop.f32.mrb[55].mxu1  ;;  %v3572_v40 = vmul.f32 -1.442695, %v1424_v1 }
 0x698   :  { %v3571_v13 = vmul.f32 -1.442695, %v1423_v36 }
 0x699   :  { %4027 = vpow2.f32 %v3570_v30 }
 0x69a   :  { %4029 = vpow2.f32 %v3571_v13 }
 0x69b   :  { %4031 = vtanh.f32 %v1425_v9 }
 0x69c   :  { %4033 = vpow2.f32 %v3572_v40 }
 0x6a3   :  { %v4028_v44 = vpop.eup %4027 }
 0x6a4   :  { %v1435_v34 = vadd.f32 1.0, %v4028_v44  ;;  %v4030_v39 = vpop.eup %4029 }
 0x6a5   :  { %v1436_v42 = vadd.f32 1.0, %v4030_v39  ;;  %v4032_v27 = vpop.eup %4031  ;;  %v3838_v39 = vld [vmem:[#allocation11 + $0x8] ss:$16 sps:$4 sm:$0xff]  }
 0x6a6   :  { %4035 = vrcp.f32 %v1435_v34  ;;  %v4034_v23 = vpop.eup %4033  ;;  %v3835_v34 = vld [vmem:[#allocation11] ss:$16 sps:$4 sm:$0xff]  }
 0x6a7   :  { %4037 = vrcp.f32 %v1436_v42  ;;  %v1437_v48 = vadd.f32 1.0, %v4034_v23  ;;  %v3846_v23 = vld [vmem:[#allocation11 + $0x2c] ss:$16 sps:$4 sm:$0xff]  }
 0x6a9   :  { %4039 = vrcp.f32 %v1437_v48  ;;  %v3852_v48 = vld [vmem:[#allocation11 + $0x4c] ss:$16 sps:$4 sm:$0xff]  }
 0x6b0   :  { %v4036_v46 = vpop.eup %4035 }
 0x6b1   :  { %v1446_v49 = vmul.f32 %v4036_v46, %v4032_v27  ;;  %v4038_v54 = vpop.eup %4037  ;;  %v3843_v27 = vld [vmem:[#allocation11 + $0x24] ss:$16 sps:$4 sm:$0xff]   ;;  %v3841_v46 = vld [vmem:[#allocation11 + $0x20] ss:$16 sps:$4 sm:$0xff]  }
 0x6b2   :  { %v1445_v24 = vmul.f32 %v4038_v54, %v4957_v45  ;;  %v5682_v45 = vld [vmem:[#allocation26_spill] sm:$0xff] }
 0x6b3   :  { %v4040_v47 = vpop.eup %4039  ;;  %v3849_v54 = vld [vmem:[#allocation11 + $0x44] ss:$16 sps:$4 sm:$0xff]  }
 0x6b4   :  { %v5004_v50 = vadd.f32 %v1446_v49, %v1445_v24  ;;  %v3844_v49 = vld [vmem:[#allocation11 + $0x28] ss:$16 sps:$4 sm:$0xff]   ;;  %v3847_v24 = vld [vmem:[#allocation11 + $0x40] ss:$16 sps:$4 sm:$0xff]  }
 0x6b6   :  { %4041 = vtanh.f32 %v5004_v50 }
 0x6c0   :  { %v4042_v0 = vpop.eup %4041 }
 0x6c1   :  { %v1449_v3 = vmul.f32 %v4042_v0, %v4040_v47  ;;  %v3855_v47 = vld [vmem:[#allocation11 + $0x64] ss:$16 sps:$4 sm:$0xff]   ;;  %v3858_v0 = vld [vmem:[#allocation11 + $0x6c] ss:$16 sps:$4 sm:$0xff]  }
 0x6c3   :  { %v1450_v38 = vpack.c.bf16 %v1449_v3, %v1449_v3  ;;  %v3853_v3 = vld [vmem:[#allocation11 + $0x60] ss:$16 sps:$4 sm:$0xff]  }
 0x6c5   :  { %1452 = vst [vmem:[#allocation3 + $0x14] sm:$0xf] %v1450_v38  ;;  %1495 = vmatmul.mubr.bf16.vlgmr.msra.gmra.mrb[24].mxu0 %v1450_v38  ;;  %1536 = vmatmul.mubr.bf16.vlgmr.msra.gmra.mrb[56].mxu1 %v1450_v38  ;;  %v3856_v38 = vld [vmem:[#allocation11 + $0x68] ss:$16 sps:$4 sm:$0xff]  }
 0x6c6   :  { %1585 = vmatpush1.bf16.msra.mxu0 %v4802_v8  ;;  %1626 = vmatpush1.bf16.msra.mxu1 %v4961_v56  ;;  %v4224_v8 = vld [vmem:[#allocation12 + $0x48] ss:$16 sps:$4 sm:$0xff]  }
 0x6c7   :  { %1586 = vmatprep.subr.bf16.mxu0 %v4806_v11  ;;  %1627 = vmatprep.subr.bf16.mxu1 %v4965_v37  ;;  %v4225_v11 = vld [vmem:[#allocation12 + $0x6c] ss:$16 sps:$4 sm:$0xff]   ;;  %v5685_v37 = vld [vmem:[#allocation36_spill] sm:$0xff] }
 0x6c8   :  { %1616 = vmatprep.mubr.bf16.mxu0 %v5671_v52  ;;  %1657 = vmatprep.mubr.bf16.mxu1 %v5671_v52  ;;  %v5684_v56 = vld [vmem:[#allocation27_spill] sm:$0xff] }
 0x6ca   :  { %1587 = vmatpush1.bf16.msra.mxu0 %v4812_v31  ;;  %1628 = vmatpush1.bf16.msra.mxu1 %v4971_v57  ;;  %v4227_v31 = vld [vmem:[#allocation12 + $0x8c] ss:$16 sps:$4 sm:$0xff]  }
 0x6cb   :  { %1588 = vmatprep.subr.bf16.mxu0 %v4816_v32  ;;  %1629 = vmatprep.subr.bf16.mxu1 %v4223_v51  ;;  %v4228_v32 = vld [vmem:[#allocation12 + $0x88] ss:$16 sps:$4 sm:$0xff]   ;;  %v3861_v51 = vld [vmem:[#allocation11 + $0x84] ss:$16 sps:$4 sm:$0xff]  }
 0x6ce   :  { %1589 = vmatpush1.bf16.msra.mxu0 %v4864_v43  ;;  %1630 = vmatpush1.bf16.msra.mxu1 %v4224_v8  ;;  %v4229_v43 = vld [vmem:[#allocation12 + $0xac] ss:$16 sps:$4 sm:$0xff]  }
 0x6cf   :  { %1590 = vmatprep.subr.bf16.mxu0 %v4868_v15  ;;  %1631 = vmatprep.subr.bf16.mxu1 %v4225_v11  ;;  %v4230_v15 = vld [vmem:[#allocation12 + $0xa8] ss:$16 sps:$4 sm:$0xff]   ;;  %v3864_v8 = vld [vmem:[#allocation11 + $0x8c] ss:$16 sps:$4 sm:$0xff]   ;;  %v3859_v11 = vld [vmem:[#allocation11 + $0x80] ss:$16 sps:$4 sm:$0xff]  }
 0x6d2   :  { %1591 = vmatpush1.bf16.msra.mxu0 %v4872_v19  ;;  %1632 = vmatpush1.bf16.msra.mxu1 %v4226_v53  ;;  %v4231_v19 = vld [vmem:[#allocation12 + $0xcc] ss:$16 sps:$4 sm:$0xff]   ;;  %v3862_v53 = vld [vmem:[#allocation11 + $0x88] ss:$16 sps:$4 sm:$0xff]  }
 0x6d3   :  { %1592 = vmatprep.subr.bf16.mxu0 %v4876_v20  ;;  %1633 = vmatprep.subr.bf16.mxu1 %v4227_v31  ;;  %v4232_v20 = vld [vmem:[#allocation12 + $0xc8] ss:$16 sps:$4 sm:$0xff]   ;;  %v3867_v31 = vld [vmem:[#allocation11 + $0xa4] ss:$16 sps:$4 sm:$0xff]  }
 0x6d6   :  { %1593 = vmatpush1.bf16.msra.mxu0 %v4880_v12  ;;  %1634 = vmatpush1.bf16.msra.mxu1 %v4228_v32  ;;  %v4233_v12 = vld [vmem:[#allocation12 + $0xec] ss:$16 sps:$4 sm:$0xff]  }
 0x6d7   :  { %1594 = vmatprep.subr.bf16.mxu0 %v4884_v28  ;;  %1635 = vmatprep.subr.bf16.mxu1 %v4229_v43  ;;  %v4234_v28 = vld [vmem:[#allocation12 + $0xe8] ss:$16 sps:$4 sm:$0xff]   ;;  %v3870_v32 = vld [vmem:[#allocation11 + $0xac] ss:$16 sps:$4 sm:$0xff]   ;;  %v3865_v43 = vld [vmem:[#allocation11 + $0xa0] ss:$16 sps:$4 sm:$0xff]  }
 0x6da   :  { %1595 = vmatpush1.bf16.msra.mxu0 %v4888_v35  ;;  %1636 = vmatpush1.bf16.msra.mxu1 %v4230_v15  ;;  %v3840_v35 = vld [vmem:[#allocation11 + $0xc] ss:$16 sps:$4 sm:$0xff]   ;;  %v3868_v15 = vld [vmem:[#allocation11 + $0xa8] ss:$16 sps:$4 sm:$0xff]  }
 0x6db   :  { %1596 = vmatprep.subr.bf16.mxu0 %v4892_v4  ;;  %1637 = vmatprep.subr.bf16.mxu1 %v4231_v19  ;;  %v3873_v19 = vld [vmem:[#allocation11 + $0xc4] ss:$16 sps:$4 sm:$0xff]  }
 0x6de   :  { %1597 = vmatpush1.bf16.msra.mxu0 %v4896_v7  ;;  %1638 = vmatpush1.bf16.msra.mxu1 %v4232_v20  ;;  %v3876_v20 = vld [vmem:[#allocation11 + $0xcc] ss:$16 sps:$4 sm:$0xff]  }
 0x6df   :  { %1598 = vmatprep.subr.bf16.mxu0 %v4900_v14  ;;  %1639 = vmatprep.subr.bf16.mxu1 %v4233_v12  ;;  %v3871_v12 = vld [vmem:[#allocation11 + $0xc0] ss:$16 sps:$4 sm:$0xff]  }
 0x6e2   :  { %1599 = vmatpush1.bf16.msra.mxu0 %v4904_v17  ;;  %1640 = vmatpush1.bf16.msra.mxu1 %v4234_v28  ;;  %v3874_v28 = vld [vmem:[#allocation11 + $0xc8] ss:$16 sps:$4 sm:$0xff]  }
 0x6e3   :  { %1923 = vmatprep.subr.bf16.mxu0 %v3837_v16  ;;  %1996 = vmatprep.subr.bf16.mxu1 %v3840_v35  ;;  %v3879_v16 = vld [vmem:[#allocation11 + $0xe4] ss:$16 sps:$4 sm:$0xff]   ;;  %v3882_v35 = vld [vmem:[#allocation11 + $0xec] ss:$16 sps:$4 sm:$0xff]  }
 0x798   :  { %v1496_v41 = vpop.f32.mrb[24].mxu0  ;;  %v1537_v4 = vpop.f32.mrb[56].mxu1 }
 0x799   :  { %v1544_v18 = vadd.f32 %v1496_v41, %v5682_v45  ;;  %v1546_v7 = vadd.f32 %v1537_v4, %v5683_v21  ;;  %v1498_v22 = vpop.f32.mrb[25].mxu0  ;;  %v1539_v55 = vpop.f32.mrb[57].mxu1  ;;  %v3877_v41 = vld [vmem:[#allocation11 + $0xe0] ss:$16 sps:$4 sm:$0xff]   ;;  %v3880_v4 = vld [vmem:[#allocation11 + $0xe8] ss:$16 sps:$4 sm:$0xff]  }
 0x79a   :  { %v1545_v14 = vadd.f32 %v1498_v22, %v5684_v56  ;;  %v1547_v57 = vadd.f32 %v1539_v55, %v5685_v37  ;;  %v1500_v58 = vpop.f32.mrb[26].mxu0  ;;  %v1541_v17 = vpop.f32.mrb[58].mxu1  ;;  %v3883_v45 = vld [vmem:[#allocation3] sm:$0xff]   ;;  %v3885_v21 = vld [vmem:[#allocation3 + $0x10] sm:$0xff]   ;;  %v5045_v22 = vld [vmem:[#allocation12 + $0x10c] ss:$16 sps:$4 sm:$0xff]  }
 0x79b   :  { %v3573_v59 = vmul.f32 -1.442695, %v1544_v18  ;;  %v1501_v60 = vpop.f32.mrb[27].mxu0  ;;  %v1542_v61 = vpop.f32.mrb[59].mxu1  ;;  %v3575_v63 = vmul.f32 -1.442695, %v1546_v7 }
 0x79c   :  { %v3574_v62 = vmul.f32 -1.442695, %v1545_v14  ;;  %v3884_v18 = vld [vmem:[#allocation3 + $0x8] sm:$0xff]   ;;  %v5043_v7 = vld [vmem:[#allocation12 + $0x104] ss:$16 sps:$4 sm:$0xff]  }
 0x79d   :  { %4043 = vpow2.f32 %v3573_v59  ;;  %v5047_v55 = vld [vmem:[#allocation12 + $0x100] ss:$16 sps:$4 sm:$0xff]   ;;  %v5049_v56 = vld [vmem:[#allocation12 + $0x108] ss:$16 sps:$4 sm:$0xff]   ;;  %v5055_v14 = vld [vmem:[#allocation12 + $0x124] ss:$16 sps:$4 sm:$0xff]  }
 0x79e   :  { %4045 = vpow2.f32 %v3574_v62  ;;  %v5057_v37 = vld [vmem:[#allocation12 + $0x12c] ss:$16 sps:$4 sm:$0xff]   ;;  %v5061_v58 = vld [vmem:[#allocation12 + $0x128] ss:$16 sps:$4 sm:$0xff]   ;;  %v5067_v17 = vld [vmem:[#allocation12 + $0x144] ss:$16 sps:$4 sm:$0xff]  }
 0x79f   :  { %4047 = vtanh.f32 %v1547_v57  ;;  %v5059_v57 = vld [vmem:[#allocation12 + $0x120] ss:$16 sps:$4 sm:$0xff]   ;;  %v5069_v59 = vld [vmem:[#allocation12 + $0x14c] ss:$16 sps:$4 sm:$0xff]   ;;  %v5073_v61 = vld [vmem:[#allocation12 + $0x148] ss:$16 sps:$4 sm:$0xff]  }
 0x7a0   :  { %4049 = vpow2.f32 %v3575_v63  ;;  %v5071_v60 = vld [vmem:[#allocation12 + $0x140] ss:$16 sps:$4 sm:$0xff]   ;;  %v5079_v62 = vld [vmem:[#allocation12 + $0x164] ss:$16 sps:$4 sm:$0xff]   ;;  %v5081_v63 = vld [vmem:[#allocation12 + $0x16c] ss:$16 sps:$4 sm:$0xff]  }
 0x7a7   :  { %v4044_v1 = vpop.eup %4043 }
 0x7a8   :  { %v1557_v2 = vadd.f32 1.0, %v4044_v1  ;;  %v4046_v5 = vpop.eup %4045  ;;  %v5083_v1 = vld [vmem:[#allocation12 + $0x160] ss:$16 sps:$4 sm:$0xff]  }
 0x7a9   :  { %v1558_v6 = vadd.f32 1.0, %v4046_v5  ;;  %v4048_v36 = vpop.eup %4047  ;;  %v5091_v5 = vld [vmem:[#allocation12 + $0x184] ss:$16 sps:$4 sm:$0xff]  }
 0x7aa   :  { %4051 = vrcp.f32 %v1557_v2  ;;  %v4050_v25 = vpop.eup %4049  ;;  %v5085_v2 = vld [vmem:[#allocation12 + $0x168] ss:$16 sps:$4 sm:$0xff]  }
 0x7ab   :  { %4053 = vrcp.f32 %v1558_v6  ;;  %v1559_v30 = vadd.f32 1.0, %v4050_v25  ;;  %v5093_v6 = vld [vmem:[#allocation12 + $0x18c] ss:$16 sps:$4 sm:$0xff]   ;;  %v5097_v25 = vld [vmem:[#allocation12 + $0x188] ss:$16 sps:$4 sm:$0xff]  }
 0x7ad   :  { %4055 = vrcp.f32 %v1559_v30  ;;  %v5109_v30 = vld [vmem:[#allocation12 + $0x1a8] ss:$16 sps:$4 sm:$0xff]  }
 0x7b4   :  { %v4052_v9 = vpop.eup %4051 }
 0x7b5   :  { %v1568_v26 = vmul.f32 %v4052_v9, %v4048_v36  ;;  %v4054_v29 = vpop.eup %4053  ;;  %v5095_v36 = vld [vmem:[#allocation12 + $0x180] ss:$16 sps:$4 sm:$0xff]   ;;  %v5103_v9 = vld [vmem:[#allocation12 + $0x1a4] ss:$16 sps:$4 sm:$0xff]  }
 0x7b6   :  { %v1567_v10 = vmul.f32 %v4054_v29, %v5004_v50  ;;  %v3850_v50 = vld [vmem:[#allocation11 + $0x48] ss:$16 sps:$4 sm:$0xff]   ;;  %v5107_v29 = vld [vmem:[#allocation12 + $0x1a0] ss:$16 sps:$4 sm:$0xff]  }
 0x7b7   :  { %v4056_v13 = vpop.eup %4055 }
 0x7b8   :  { %v5032_v33 = vadd.f32 %v1568_v26, %v1567_v10  ;;  %v5105_v26 = vld [vmem:[#allocation12 + $0x1ac] ss:$16 sps:$4 sm:$0xff]   ;;  %v5115_v10 = vld [vmem:[#allocation12 + $0x1c4] ss:$16 sps:$4 sm:$0xff]  }
 0x7ba   :  { %4057 = vtanh.f32 %v5032_v33 }
 0x7c4   :  { %v4058_v40 = vpop.eup %4057 }
 0x7c5   :  { %v1571_v44 = vmul.f32 %v4058_v40, %v4056_v13  ;;  %v5117_v13 = vld [vmem:[#allocation12 + $0x1cc] ss:$16 sps:$4 sm:$0xff]   ;;  %v5119_v40 = vld [vmem:[#allocation12 + $0x1c0] ss:$16 sps:$4 sm:$0xff]  }
 0x7c7   :  { %v1572_v42 = vpack.c.bf16 %v1571_v44, %v1571_v44  ;;  %v5121_v44 = vld [vmem:[#allocation12 + $0x1c8] ss:$16 sps:$4 sm:$0xff]  }
 0x7c9   :  { %1574 = vst [vmem:[#allocation3 + $0x18] sm:$0xf] %v1572_v42  ;;  %1617 = vmatmul.mubr.bf16.vlgmr.msra.gmra.mrb[28].mxu0 %v1572_v42  ;;  %1658 = vmatmul.mubr.bf16.vlgmr.msra.gmra.mrb[60].mxu1 %v1572_v42  ;;  %v5131_v42 = vld [vmem:[#allocation12 + $0x1e0] ss:$16 sps:$4 sm:$0xff]  }
 0x7ca   :  { %1924 = vmatpush1.bf16.msra.mxu0 %v3835_v34  ;;  %1997 = vmatpush1.bf16.msra.mxu1 %v3838_v39  ;;  %v5125_v34 = vld [vmem:[#allocation12 + $0x1e4] ss:$16 sps:$4 sm:$0xff]   ;;  %v5127_v39 = vld [vmem:[#allocation12 + $0x1ec] ss:$16 sps:$4 sm:$0xff]  }
 0x7cb   :  { %1925 = vmatprep.subr.bf16.mxu0 %v3843_v27  ;;  %1998 = vmatprep.subr.bf16.mxu1 %v3846_v23  ;;  %v5133_v27 = vld [vmem:[#allocation12 + $0x1e8] ss:$16 sps:$4 sm:$0xff]  }
 0x7cc   :  { %1955 = vmatprep.mubr.bf16.mxu0 %v5671_v52  ;;  %2028 = vmatprep.mubr.bf16.mxu1 %v5671_v52 }
 0x7ce   :  { %1926 = vmatpush1.bf16.msra.mxu0 %v3841_v46  ;;  %1999 = vmatpush1.bf16.msra.mxu1 %v3844_v49  ;;  %v5686_v49 = vld [vmem:[#allocation28_spill] sm:$0xff] }
 0x7cf   :  { %1927 = vmatprep.subr.bf16.mxu0 %v3849_v54  ;;  %2000 = vmatprep.subr.bf16.mxu1 %v3852_v48  ;;  %v5687_v48 = vld [vmem:[#allocation37_spill] sm:$0xff] }
 0x7d2   :  { %1928 = vmatpush1.bf16.msra.mxu0 %v3847_v24  ;;  %2001 = vmatpush1.bf16.msra.mxu1 %v3850_v50 }
 0x7d3   :  { %1929 = vmatprep.subr.bf16.mxu0 %v3855_v47  ;;  %2002 = vmatprep.subr.bf16.mxu1 %v3858_v0  ;;  %v5688_v0 = vld [vmem:[#allocation29_spill] sm:$0xff] }
 0x7d6   :  { %1930 = vmatpush1.bf16.msra.mxu0 %v3853_v3  ;;  %2003 = vmatpush1.bf16.msra.mxu1 %v3856_v38  ;;  %v5689_v38 = vld [vmem:[#allocation38_spill] sm:$0xff] }
 0x7d7   :  { %1931 = vmatprep.subr.bf16.mxu0 %v3861_v51  ;;  %2004 = vmatprep.subr.bf16.mxu1 %v3864_v8 }
 0x7da   :  { %1932 = vmatpush1.bf16.msra.mxu0 %v3859_v11  ;;  %2005 = vmatpush1.bf16.msra.mxu1 %v3862_v53 }
 0x7db   :  { %1933 = vmatprep.subr.bf16.mxu0 %v3867_v31  ;;  %2006 = vmatprep.subr.bf16.mxu1 %v3870_v32 }
 0x7de   :  { %1934 = vmatpush1.bf16.msra.mxu0 %v3865_v43  ;;  %2007 = vmatpush1.bf16.msra.mxu1 %v3868_v15 }
 0x7df   :  { %1935 = vmatprep.subr.bf16.mxu0 %v3873_v19  ;;  %2008 = vmatprep.subr.bf16.mxu1 %v3876_v20 }
 0x7e2   :  { %1936 = vmatpush1.bf16.msra.mxu0 %v3871_v12  ;;  %2009 = vmatpush1.bf16.msra.mxu1 %v3874_v28 }
 0x7e3   :  { %1937 = vmatprep.subr.bf16.mxu0 %v3879_v16  ;;  %2010 = vmatprep.subr.bf16.mxu1 %v3882_v35 }
 0x7e6   :  { %1938 = vmatpush1.bf16.msra.mxu0 %v3877_v41  ;;  %2011 = vmatpush1.bf16.msra.mxu1 %v3880_v4 }
 0x7e7   :  { %2330 = vmatprep.subr.bf16.mxu0 %v5043_v7  ;;  %2371 = vmatprep.subr.bf16.mxu1 %v5045_v22 }
 0x7e9   :  { %1956 = vmatmul.mubr.bf16.vlgmr.msra.gmra.mrb[32].mxu0 %v3883_v45  ;;  %2029 = vmatmul.mubr.bf16.vlgmr.msra.gmra.mrb[64].mxu1 %v3883_v45 }
 0x7ea   :  { %1965 = vmatprep.mubr.bf16.mxu0 %v5671_v52  ;;  %2038 = vmatprep.mubr.bf16.mxu1 %v5671_v52 }
 0x7eb   :  { %2331 = vmatpush1.bf16.msra.mxu0 %v5047_v55  ;;  %2372 = vmatpush1.bf16.msra.mxu1 %v5049_v56 }
 0x7ec   :  { %2332 = vmatprep.subr.bf16.mxu0 %v5055_v14  ;;  %2373 = vmatprep.subr.bf16.mxu1 %v5057_v37 }
 0x7ef   :  { %2333 = vmatpush1.bf16.msra.mxu0 %v5059_v57  ;;  %2374 = vmatpush1.bf16.msra.mxu1 %v5061_v58 }
 0x7f0   :  { %2334 = vmatprep.subr.bf16.mxu0 %v5067_v17  ;;  %2375 = vmatprep.subr.bf16.mxu1 %v5069_v59 }
 0x7f1   :  { %1966 = vmatmul.mubr.bf16.gmra.mrb[36].mxu0 %v3884_v18  ;;  %2039 = vmatmul.mubr.bf16.gmra.mrb[68].mxu1 %v3884_v18 }
 0x7f2   :  { %1975 = vmatprep.mubr.bf16.mxu0 %v5671_v52  ;;  %2048 = vmatprep.mubr.bf16.mxu1 %v5671_v52 }
 0x7f3   :  { %2335 = vmatpush1.bf16.msra.mxu0 %v5071_v60  ;;  %2376 = vmatpush1.bf16.msra.mxu1 %v5073_v61 }
 0x7f4   :  { %2336 = vmatprep.subr.bf16.mxu0 %v5079_v62  ;;  %2377 = vmatprep.subr.bf16.mxu1 %v5081_v63 }
 0x7f7   :  { %2337 = vmatpush1.bf16.msra.mxu0 %v5083_v1  ;;  %2378 = vmatpush1.bf16.msra.mxu1 %v5085_v2 }
 0x7f8   :  { %2338 = vmatprep.subr.bf16.mxu0 %v5091_v5  ;;  %2379 = vmatprep.subr.bf16.mxu1 %v5093_v6 }
 0x7f9   :  { %1976 = vmatmul.mubr.bf16.gmra.mrb[40].mxu0 %v3885_v21  ;;  %2049 = vmatmul.mubr.bf16.gmra.mrb[72].mxu1 %v3885_v21 }
 0x7fa   :  { %1985 = vmatprep.mubr.bf16.mxu0 %v5671_v52  ;;  %2058 = vmatprep.mubr.bf16.mxu1 %v5671_v52 }
 0x7fb   :  { %2339 = vmatpush1.bf16.msra.mxu0 %v5095_v36  ;;  %2380 = vmatpush1.bf16.msra.mxu1 %v5097_v25 }
 0x7fc   :  { %2340 = vmatprep.subr.bf16.mxu0 %v5103_v9  ;;  %2381 = vmatprep.subr.bf16.mxu1 %v5105_v26 }
 0x7ff   :  { %2341 = vmatpush1.bf16.msra.mxu0 %v5107_v29  ;;  %2382 = vmatpush1.bf16.msra.mxu1 %v5109_v30 }
 0x800   :  { %2342 = vmatprep.subr.bf16.mxu0 %v5115_v10  ;;  %2383 = vmatprep.subr.bf16.mxu1 %v5117_v13 }
 0x803   :  { %2343 = vmatpush1.bf16.msra.mxu0 %v5119_v40  ;;  %2384 = vmatpush1.bf16.msra.mxu1 %v5121_v44 }
 0x804   :  { %2344 = vmatprep.subr.bf16.mxu0 %v5125_v34  ;;  %2385 = vmatprep.subr.bf16.mxu1 %v5127_v39 }
 0x807   :  { %2345 = vmatpush1.bf16.msra.mxu0 %v5131_v42  ;;  %2386 = vmatpush1.bf16.msra.mxu1 %v5133_v27 }
 0x808   :  { %2450 = vmatprep.subr.bf16.mxu0 %v5043_v7  ;;  %2491 = vmatprep.subr.bf16.mxu1 %v5045_v22 }
 0x89c   :  { %v1618_v23 = vpop.f32.mrb[28].mxu0  ;;  %v1659_v46 = vpop.f32.mrb[60].mxu1 }
 0x89d   :  { %v1666_v54 = vadd.f32 %v1618_v23, %v5686_v49  ;;  %v1668_v24 = vadd.f32 %v1659_v46, %v5687_v48  ;;  %v1620_v50 = vpop.f32.mrb[29].mxu0  ;;  %v1661_v47 = vpop.f32.mrb[61].mxu1 }
 0x89e   :  { %v1667_v3 = vadd.f32 %v1620_v50, %v5688_v0  ;;  %v1669_v51 = vadd.f32 %v1661_v47, %v5689_v38  ;;  %v1622_v8 = vpop.f32.mrb[30].mxu0  ;;  %v1663_v11 = vpop.f32.mrb[62].mxu1 }
 0x89f   :  { %v3576_v53 = vmul.f32 -1.442695, %v1666_v54  ;;  %v1623_v31 = vpop.f32.mrb[31].mxu0  ;;  %v1664_v32 = vpop.f32.mrb[63].mxu1  ;;  %v3578_v15 = vmul.f32 -1.442695, %v1668_v24 }
 0x8a0   :  { %v3577_v43 = vmul.f32 -1.442695, %v1667_v3 }
 0x8a1   :  { %4059 = vpow2.f32 %v3576_v53 }
 0x8a2   :  { %4061 = vpow2.f32 %v3577_v43 }
 0x8a3   :  { %4063 = vtanh.f32 %v1669_v51 }
 0x8a4   :  { %4065 = vpow2.f32 %v3578_v15 }
 0x8ab   :  { %v4060_v19 = vpop.eup %4059 }
 0x8ac   :  { %v1679_v20 = vadd.f32 1.0, %v4060_v19  ;;  %v4062_v12 = vpop.eup %4061 }
 0x8ad   :  { %v1680_v28 = vadd.f32 1.0, %v4062_v12  ;;  %v4064_v16 = vpop.eup %4063 }
 0x8ae   :  { %4067 = vrcp.f32 %v1679_v20  ;;  %v4066_v35 = vpop.eup %4065 }
 0x8af   :  { %4069 = vrcp.f32 %v1680_v28  ;;  %v1681_v18 = vadd.f32 1.0, %v4066_v35 }
 0x8b1   :  { %4071 = vrcp.f32 %v1681_v18 }
 0x8b8   :  { %v4068_v41 = vpop.eup %4067 }
 0x8b9   :  { %v1690_v4 = vmul.f32 %v4068_v41, %v4064_v16  ;;  %v4070_v45 = vpop.eup %4069 }
 0x8ba   :  { %v1689_v21 = vmul.f32 %v4070_v45, %v5032_v33 }
 0x8bb   :  { %v4072_v32 = vpop.eup %4071 }
 0x8bc   :  { %v5146_v23 = vpop.f32.mrb[32].mxu0  ;;  %v5148_v46 = vpop.f32.mrb[64].mxu1  ;;  %v1691_v49 = vadd.f32 %v1690_v4, %v1689_v21  ;;  %v5705_v21 = vmov 0.0|0.0  }
 0x8bd   :  { %v5150_v54 = vpop.f32.mrb[33].mxu0  ;;  %v5152_v48 = vpop.f32.mrb[65].mxu1 }
 0x8be   :  { %v5154_v24 = vpop.f32.mrb[34].mxu0  ;;  %v5156_v50 = vpop.f32.mrb[66].mxu1  ;;  %4073 = vtanh.f32 %v1691_v49  ;;  %v3615_v49 = vld [vmem:[%s5638_s4 + $0x4] sm:$0xf] }
 0x8bf   :  { %v5158_v47 = vpop.f32.mrb[35].mxu0  ;;  %v5160_v0 = vpop.f32.mrb[67].mxu1 }
 0x8c4   :  { %v5162_v33 = vpop.f32.mrb[36].mxu0  ;;  %v5164_v3 = vpop.f32.mrb[68].mxu1 }
 0x8c5   :  { %5690 = vst [vmem:[#allocation21_spill] sm:$0xff] %v5164_v3  ;;  %v5166_v38 = vpop.f32.mrb[37].mxu0  ;;  %v5168_v51 = vpop.f32.mrb[69].mxu1 }
 0x8c6   :  { %5691 = vst [vmem:[#allocation30_spill] sm:$0xff] %v5166_v38  ;;  %5692 = vst [vmem:[#allocation22_spill] sm:$0xff] %v5168_v51  ;;  %v5170_v8 = vpop.f32.mrb[38].mxu0  ;;  %v5172_v11 = vpop.f32.mrb[70].mxu1 }
 0x8c7   :  { %5693 = vst [vmem:[#allocation31_spill] sm:$0xff] %v5170_v8  ;;  %5694 = vst [vmem:[#allocation23_spill] sm:$0xff] %v5172_v11  ;;  %v5174_v53 = vpop.f32.mrb[39].mxu0  ;;  %v5176_v31 = vpop.f32.mrb[71].mxu1 }
 0x8c8   :  { %5695 = vst [vmem:[#allocation32_spill] sm:$0xff] %v5174_v53  ;;  %5696 = vst [vmem:[#allocation24_spill] sm:$0xff] %v5176_v31  ;;  %v4074_v43 = vpop.eup %4073 }
 0x8c9   :  { %v1693_v15 = vmul.f32 %v4074_v43, %v4072_v32 }
 0x8cb   :  { %v1694_v19 = vpack.c.bf16 %v1693_v15, %v1693_v15 }
 0x8cc   :  { %v5178_v20 = vpop.f32.mrb[40].mxu0  ;;  %v5180_v12 = vpop.f32.mrb[72].mxu1 }
 0x8cd   :  { %5697 = vst [vmem:[#allocation33_spill] sm:$0xff] %v5178_v20  ;;  %5698 = vst [vmem:[#allocation25_spill] sm:$0xff] %v5180_v12  ;;  %v5182_v28 = vpop.f32.mrb[41].mxu0  ;;  %v5184_v16 = vpop.f32.mrb[73].mxu1 }
 0x8ce   :  { %5699 = vst [vmem:[#allocation34_spill] sm:$0xff] %v5182_v28  ;;  %5700 = vst [vmem:[#allocation26_spill] sm:$0xff] %v5184_v16  ;;  %v5186_v35 = vpop.f32.mrb[42].mxu0  ;;  %v5188_v41 = vpop.f32.mrb[74].mxu1 }
 0x8cf   :  { %1696 = vst [vmem:[#allocation3 + $0x1c] sm:$0xf] %v1694_v19  ;;  %5701 = vst [vmem:[#allocation35_spill] sm:$0xff] %v5186_v35  ;;  %v5190_v4 = vpop.f32.mrb[43].mxu0  ;;  %v5192_v45 = vpop.f32.mrb[75].mxu1 }
 0x8d0   :  { %5702 = vst [vmem:[#allocation27_spill] sm:$0xff] %v5188_v41  ;;  %5703 = vst [vmem:[#allocation36_spill] sm:$0xff] %v5190_v4 }
 0x8d1   :  { %5704 = vst [vmem:[#allocation28_spill] sm:$0xff] %v5192_v45  ;;  %v5712_v45 = vld [vmem:[#allocation20_spill] sm:$0xff] }
 0x8d2   :  { %v5713_v4 = vsub.s32 0, %v5712_v45  ;;  %v5714_v35 = vsub.s32 2, %v5712_v45 }
 0x8d4   :  { %v5249_v41 = vrot.slane %v3615_v49, %v5713_v4  ;;  %v5253_v16 = vrot.slane %v3615_v49, %v5714_v35 }
 0x8d6   :  { %v3922_v18 = vld [vmem:[#allocation3 + $0x18] sm:$0xff]   ;;  %v2165_v4 = vadd.f32 %v5249_v41, %v5146_v23 }
 0x8d7   :  { %1986 = vmatmul.mubr.bf16.gmra.mrb[44].mxu0 %v3922_v18  ;;  %2059 = vmatmul.mubr.bf16.gmra.mrb[76].mxu1 %v3922_v18 }
 0x8d8   :  { %2362 = vmatprep.mubr.bf16.mxu0 %v5671_v52  ;;  %2403 = vmatprep.mubr.bf16.mxu1 %v5671_v52 }
 0x8df   :  { %2363 = vmatmul.mubr.bf16.vlgmr.msra.gmra.mrb[48].mxu0 %v5705_v21  ;;  %2404 = vmatmul.mubr.bf16.vlgmr.msra.gmra.mrb[80].mxu1 %v5705_v21 }
 0x8e0   :  { %2451 = vmatpush1.bf16.msra.mxu0 %v5047_v55  ;;  %2492 = vmatpush1.bf16.msra.mxu1 %v5049_v56 }
 0x8e1   :  { %2452 = vmatprep.subr.bf16.mxu0 %v5055_v14  ;;  %2493 = vmatprep.subr.bf16.mxu1 %v5057_v37 }
 0x8e2   :  { %2482 = vmatprep.mubr.bf16.mxu0 %v5671_v52  ;;  %2523 = vmatprep.mubr.bf16.mxu1 %v5671_v52 }
 0x8e4   :  { %2453 = vmatpush1.bf16.msra.mxu0 %v5059_v57  ;;  %2494 = vmatpush1.bf16.msra.mxu1 %v5061_v58 }
 0x8e5   :  { %2454 = vmatprep.subr.bf16.mxu0 %v5067_v17  ;;  %2495 = vmatprep.subr.bf16.mxu1 %v5069_v59 }
 0x8e8   :  { %2455 = vmatpush1.bf16.msra.mxu0 %v5071_v60  ;;  %2496 = vmatpush1.bf16.msra.mxu1 %v5073_v61 }
 0x8e9   :  { %2456 = vmatprep.subr.bf16.mxu0 %v5079_v62  ;;  %2497 = vmatprep.subr.bf16.mxu1 %v5081_v63 }
 0x8ec   :  { %2457 = vmatpush1.bf16.msra.mxu0 %v5083_v1  ;;  %2498 = vmatpush1.bf16.msra.mxu1 %v5085_v2 }
 0x8ed   :  { %2458 = vmatprep.subr.bf16.mxu0 %v5091_v5  ;;  %2499 = vmatprep.subr.bf16.mxu1 %v5093_v6 }
 0x8f0   :  { %2459 = vmatpush1.bf16.msra.mxu0 %v5095_v36  ;;  %2500 = vmatpush1.bf16.msra.mxu1 %v5097_v25 }
 0x8f1   :  { %2460 = vmatprep.subr.bf16.mxu0 %v5103_v9  ;;  %2501 = vmatprep.subr.bf16.mxu1 %v5105_v26 }
 0x8f4   :  { %2461 = vmatpush1.bf16.msra.mxu0 %v5107_v29  ;;  %2502 = vmatpush1.bf16.msra.mxu1 %v5109_v30 }
 0x8f5   :  { %2462 = vmatprep.subr.bf16.mxu0 %v5115_v10  ;;  %2503 = vmatprep.subr.bf16.mxu1 %v5117_v13 }
 0x8f8   :  { %2463 = vmatpush1.bf16.msra.mxu0 %v5119_v40  ;;  %2504 = vmatpush1.bf16.msra.mxu1 %v5121_v44 }
 0x8f9   :  { %2464 = vmatprep.subr.bf16.mxu0 %v5125_v34  ;;  %2505 = vmatprep.subr.bf16.mxu1 %v5127_v39 }
 0x8fc   :  { %2465 = vmatpush1.bf16.msra.mxu0 %v5131_v42  ;;  %2506 = vmatpush1.bf16.msra.mxu1 %v5133_v27 }
 0x8fd   :  { %2570 = vmatprep.subr.bf16.mxu0 %v5043_v7  ;;  %2611 = vmatprep.subr.bf16.mxu1 %v5045_v22 }
 0x9aa   :  { %v5235_v32 = vpop.f32.mrb[44].mxu0  ;;  %v5237_v43 = vpop.f32.mrb[76].mxu1 }
 0x9ab   :  { %5706 = vst [vmem:[#allocation37_spill] sm:$0xff] %v5235_v32  ;;  %5707 = vst [vmem:[#allocation29_spill] sm:$0xff] %v5237_v43  ;;  %v5239_v15 = vpop.f32.mrb[45].mxu0  ;;  %v5241_v19 = vpop.f32.mrb[77].mxu1 }
 0x9ac   :  { %5708 = vst [vmem:[#allocation38_spill] sm:$0xff] %v5239_v15  ;;  %5709 = vst [vmem:[#allocation39_spill] sm:$0xff] %v5241_v19  ;;  %v5243_v18 = vpop.f32.mrb[46].mxu0  ;;  %v5245_v21 = vpop.f32.mrb[78].mxu1  ;;  %v5717_v15 = vsub.s32 1, %v5712_v45 }
 0x9ad   :  { %5710 = vst [vmem:[#allocation40_spill] sm:$0xff] %v5243_v18  ;;  %5711 = vst [vmem:[#allocation41_spill] sm:$0xff] %v5245_v21  ;;  %v5255_v28 = vpop.f32.mrb[47].mxu0  ;;  %v5257_v32 = vpop.f32.mrb[79].mxu1  ;;  %v5718_v18 = vsub.s32 3, %v5712_v45  ;;  %v2167_v21 = vadd.f32 %v5253_v16, %v5148_v46 }
 0x9ae   :  { %5715 = vst [vmem:[#allocation20_spill] sm:$0xff] %v5255_v28  ;;  %5716 = vst [vmem:[#allocation42_spill] sm:$0xff] %v5257_v32  ;;  %v5261_v43 = vrot.slane %v3615_v49, %v5717_v15 }
 0x9af   :  { %v5265_v19 = vrot.slane %v3615_v49, %v5718_v18 }
 0x9b0   :  { %v2166_v35 = vadd.f32 %v5261_v43, %v5150_v54 }
 0x9b1   :  { %v2168_v32 = vadd.f32 %v5265_v19, %v5152_v48 }
 0x9b2   :  { %v2364_v28 = vpop.f32.mrb[48].mxu0  ;;  %v2405_v12 = vpop.f32.mrb[80].mxu1 }
 0x9b3   :  { %v2412_v15 = vadd.f32 %v2364_v28, %v2165_v4  ;;  %v2414_v20 = vadd.f32 %v2405_v12, %v2167_v21  ;;  %v2366_v31 = vpop.f32.mrb[49].mxu0  ;;  %v2407_v45 = vpop.f32.mrb[81].mxu1 }
 0x9b4   :  { %v2413_v49 = vadd.f32 %v2366_v31, %v2166_v35  ;;  %v2415_v18 = vadd.f32 %v2407_v45, %v2168_v32  ;;  %v2368_v53 = vpop.f32.mrb[50].mxu0  ;;  %v2409_v11 = vpop.f32.mrb[82].mxu1  ;;  %v2447_v45 = vadd.f32 %v5261_v43, %v5158_v47 }
 0x9b5   :  { %v3648_v23 = vmul.f32 -1.442695, %v2412_v15  ;;  %v2369_v8 = vpop.f32.mrb[51].mxu0  ;;  %v2410_v51 = vpop.f32.mrb[83].mxu1  ;;  %v3650_v54 = vmul.f32 -1.442695, %v2414_v20  ;;  %v2448_v15 = vadd.f32 %v5253_v16, %v5156_v50 }
 0x9b6   :  { %v3649_v46 = vmul.f32 -1.442695, %v2413_v49  ;;  %v2449_v49 = vadd.f32 %v5265_v19, %v5160_v0 }
 0x9b7   :  { %4075 = vpow2.f32 %v3648_v23 }
 0x9b8   :  { %4077 = vpow2.f32 %v3649_v46 }
 0x9b9   :  { %4079 = vtanh.f32 %v2415_v18 }
 0x9ba   :  { %4081 = vpow2.f32 %v3650_v54 }
 0x9c1   :  { %v4076_v38 = vpop.eup %4075 }
 0x9c2   :  { %v2425_v3 = vadd.f32 1.0, %v4076_v38  ;;  %v4078_v48 = vpop.eup %4077 }
 0x9c3   :  { %v2426_v12 = vadd.f32 1.0, %v4078_v48  ;;  %v4080_v28 = vpop.eup %4079 }
 0x9c4   :  { %4083 = vrcp.f32 %v2425_v3  ;;  %v4082_v31 = vpop.eup %4081  ;;  %v2446_v3 = vadd.f32 %v5249_v41, %v5154_v24 }
 0x9c5   :  { %4085 = vrcp.f32 %v2426_v12  ;;  %v2427_v21 = vadd.f32 1.0, %v4082_v31 }
 0x9c7   :  { %4087 = vrcp.f32 %v2427_v21 }
 0x9ce   :  { %v4084_v32 = vpop.eup %4083 }
 0x9cf   :  { %v2436_v53 = vmul.f32 %v4084_v32, %v4080_v28  ;;  %v4086_v11 = vpop.eup %4085 }
 0x9d0   :  { %v2435_v8 = vmul.f32 0.0, %v4086_v11 }
 0x9d1   :  { %v4088_v20 = vpop.eup %4087 }
 0x9d2   :  { %v5275_v51 = vadd.f32 %v2436_v53, %v2435_v8 }
 0x9d4   :  { %4089 = vtanh.f32 %v5275_v51 }
 0x9de   :  { %v4090_v38 = vpop.eup %4089 }
 0x9df   :  { %v2439_v4 = vmul.f32 %v4090_v38, %v4088_v20 }
 0x9e1   :  { %v2440_v35 = vpack.c.bf16 %v2439_v4, %v2439_v4 }
 0x9e3   :  { %2441 = vst [vmem:[#allocation3] sm:$0xf] %v2440_v35  ;;  %2483 = vmatmul.mubr.bf16.vlgmr.msra.gmra.mrb[52].mxu0 %v2440_v35  ;;  %2524 = vmatmul.mubr.bf16.vlgmr.msra.gmra.mrb[84].mxu1 %v2440_v35 }
 0x9e4   :  { %2571 = vmatpush1.bf16.msra.mxu0 %v5047_v55  ;;  %2612 = vmatpush1.bf16.msra.mxu1 %v5049_v56 }
 0x9e5   :  { %2572 = vmatprep.subr.bf16.mxu0 %v5055_v14  ;;  %2613 = vmatprep.subr.bf16.mxu1 %v5057_v37 }
 0x9e6   :  { %2602 = vmatprep.mubr.bf16.mxu0 %v5671_v52  ;;  %2643 = vmatprep.mubr.bf16.mxu1 %v5671_v52 }
 0x9e8   :  { %2573 = vmatpush1.bf16.msra.mxu0 %v5059_v57  ;;  %2614 = vmatpush1.bf16.msra.mxu1 %v5061_v58 }
 0x9e9   :  { %2574 = vmatprep.subr.bf16.mxu0 %v5067_v17  ;;  %2615 = vmatprep.subr.bf16.mxu1 %v5069_v59 }
 0x9ec   :  { %2575 = vmatpush1.bf16.msra.mxu0 %v5071_v60  ;;  %2616 = vmatpush1.bf16.msra.mxu1 %v5073_v61 }
 0x9ed   :  { %2576 = vmatprep.subr.bf16.mxu0 %v5079_v62  ;;  %2617 = vmatprep.subr.bf16.mxu1 %v5081_v63 }
 0x9f0   :  { %2577 = vmatpush1.bf16.msra.mxu0 %v5083_v1  ;;  %2618 = vmatpush1.bf16.msra.mxu1 %v5085_v2 }
 0x9f1   :  { %2578 = vmatprep.subr.bf16.mxu0 %v5091_v5  ;;  %2619 = vmatprep.subr.bf16.mxu1 %v5093_v6 }
 0x9f4   :  { %2579 = vmatpush1.bf16.msra.mxu0 %v5095_v36  ;;  %2620 = vmatpush1.bf16.msra.mxu1 %v5097_v25 }
 0x9f5   :  { %2580 = vmatprep.subr.bf16.mxu0 %v5103_v9  ;;  %2621 = vmatprep.subr.bf16.mxu1 %v5105_v26 }
 0x9f8   :  { %2581 = vmatpush1.bf16.msra.mxu0 %v5107_v29  ;;  %2622 = vmatpush1.bf16.msra.mxu1 %v5109_v30 }
 0x9f9   :  { %2582 = vmatprep.subr.bf16.mxu0 %v5115_v10  ;;  %2623 = vmatprep.subr.bf16.mxu1 %v5117_v13 }
 0x9fc   :  { %2583 = vmatpush1.bf16.msra.mxu0 %v5119_v40  ;;  %2624 = vmatpush1.bf16.msra.mxu1 %v5121_v44 }
 0x9fd   :  { %2584 = vmatprep.subr.bf16.mxu0 %v5125_v34  ;;  %2625 = vmatprep.subr.bf16.mxu1 %v5127_v39 }
 0xa00   :  { %2585 = vmatpush1.bf16.msra.mxu0 %v5131_v42  ;;  %2626 = vmatpush1.bf16.msra.mxu1 %v5133_v27 }
 0xa01   :  { %2690 = vmatprep.subr.bf16.mxu0 %v5043_v7  ;;  %2731 = vmatprep.subr.bf16.mxu1 %v5045_v22 }
 0xab6   :  { %v2484_v18 = vpop.f32.mrb[52].mxu0  ;;  %v2525_v23 = vpop.f32.mrb[84].mxu1 }
 0xab7   :  { %v2532_v46 = vadd.f32 %v2484_v18, %v2446_v3  ;;  %v2534_v54 = vadd.f32 %v2525_v23, %v2448_v15  ;;  %v2486_v48 = vpop.f32.mrb[53].mxu0  ;;  %v2527_v12 = vpop.f32.mrb[85].mxu1 }
 0xab8   :  { %v2533_v28 = vadd.f32 %v2486_v48, %v2447_v45  ;;  %v2535_v31 = vadd.f32 %v2527_v12, %v2449_v49  ;;  %v2488_v32 = vpop.f32.mrb[54].mxu0  ;;  %v2529_v53 = vpop.f32.mrb[86].mxu1 }
 0xab9   :  { %v3651_v24 = vmul.f32 -1.442695, %v2532_v46  ;;  %v2489_v11 = vpop.f32.mrb[55].mxu0  ;;  %v2530_v21 = vpop.f32.mrb[87].mxu1  ;;  %v3653_v47 = vmul.f32 -1.442695, %v2534_v54 }
 0xaba   :  { %v3652_v50 = vmul.f32 -1.442695, %v2533_v28  ;;  %v5719_v28 = vld [vmem:[#allocation21_spill] sm:$0xff]  ;;  %v5720_v32 = vld [vmem:[#allocation30_spill] sm:$0xff] }
 0xabb   :  { %4091 = vpow2.f32 %v3651_v24  ;;  %v2567_v53 = vadd.f32 %v5261_v43, %v5720_v32  ;;  %v5721_v24 = vld [vmem:[#allocation22_spill] sm:$0xff] }
 0xabc   :  { %4093 = vpow2.f32 %v3652_v50  ;;  %v2569_v11 = vadd.f32 %v5265_v19, %v5721_v24 }
 0xabd   :  { %4095 = vtanh.f32 %v2535_v31  ;;  %v2568_v31 = vadd.f32 %v5253_v16, %v5719_v28 }
 0xabe   :  { %4097 = vpow2.f32 %v3653_v47 }
 0xac5   :  { %v4092_v8 = vpop.eup %4091 }
 0xac6   :  { %v2545_v20 = vadd.f32 1.0, %v4092_v8  ;;  %v4094_v0 = vpop.eup %4093 }
 0xac7   :  { %v2546_v38 = vadd.f32 1.0, %v4094_v0  ;;  %v4096_v4 = vpop.eup %4095 }
 0xac8   :  { %4099 = vrcp.f32 %v2545_v20  ;;  %v4098_v35 = vpop.eup %4097 }
 0xac9   :  { %4101 = vrcp.f32 %v2546_v38  ;;  %v2547_v49 = vadd.f32 1.0, %v4098_v35 }
 0xacb   :  { %4103 = vrcp.f32 %v2547_v49 }
 0xad2   :  { %v4100_v3 = vpop.eup %4099 }
 0xad3   :  { %v2556_v15 = vmul.f32 %v4100_v3, %v4096_v4  ;;  %v4102_v45 = vpop.eup %4101 }
 0xad4   :  { %v2555_v18 = vmul.f32 %v4102_v45, %v5275_v51  ;;  %v2566_v51 = vadd.f32 %v5249_v41, %v5162_v33 }
 0xad5   :  { %v4104_v46 = vpop.eup %4103 }
 0xad6   :  { %v5321_v23 = vadd.f32 %v2556_v15, %v2555_v18 }
 0xad8   :  { %4105 = vtanh.f32 %v5321_v23 }
 0xae2   :  { %v4106_v54 = vpop.eup %4105 }
 0xae3   :  { %v2559_v48 = vmul.f32 %v4106_v54, %v4104_v46 }
 0xae5   :  { %v2560_v12 = vpack.c.bf16 %v2559_v48, %v2559_v48 }
 0xae7   :  { %2561 = vst [vmem:[#allocation3 + $0x4] sm:$0xf] %v2560_v12  ;;  %2603 = vmatmul.mubr.bf16.vlgmr.msra.gmra.mrb[56].mxu0 %v2560_v12  ;;  %2644 = vmatmul.mubr.bf16.vlgmr.msra.gmra.mrb[88].mxu1 %v2560_v12 }
 0xae8   :  { %2691 = vmatpush1.bf16.msra.mxu0 %v5047_v55  ;;  %2732 = vmatpush1.bf16.msra.mxu1 %v5049_v56 }
 0xae9   :  { %2692 = vmatprep.subr.bf16.mxu0 %v5055_v14  ;;  %2733 = vmatprep.subr.bf16.mxu1 %v5057_v37 }
 0xaea   :  { %2722 = vmatprep.mubr.bf16.mxu0 %v5671_v52  ;;  %2763 = vmatprep.mubr.bf16.mxu1 %v5671_v52 }
 0xaec   :  { %2693 = vmatpush1.bf16.msra.mxu0 %v5059_v57  ;;  %2734 = vmatpush1.bf16.msra.mxu1 %v5061_v58 }
 0xaed   :  { %2694 = vmatprep.subr.bf16.mxu0 %v5067_v17  ;;  %2735 = vmatprep.subr.bf16.mxu1 %v5069_v59 }
 0xaf0   :  { %2695 = vmatpush1.bf16.msra.mxu0 %v5071_v60  ;;  %2736 = vmatpush1.bf16.msra.mxu1 %v5073_v61 }
 0xaf1   :  { %2696 = vmatprep.subr.bf16.mxu0 %v5079_v62  ;;  %2737 = vmatprep.subr.bf16.mxu1 %v5081_v63 }
 0xaf4   :  { %2697 = vmatpush1.bf16.msra.mxu0 %v5083_v1  ;;  %2738 = vmatpush1.bf16.msra.mxu1 %v5085_v2 }
 0xaf5   :  { %2698 = vmatprep.subr.bf16.mxu0 %v5091_v5  ;;  %2739 = vmatprep.subr.bf16.mxu1 %v5093_v6 }
 0xaf8   :  { %2699 = vmatpush1.bf16.msra.mxu0 %v5095_v36  ;;  %2740 = vmatpush1.bf16.msra.mxu1 %v5097_v25 }
 0xaf9   :  { %2700 = vmatprep.subr.bf16.mxu0 %v5103_v9  ;;  %2741 = vmatprep.subr.bf16.mxu1 %v5105_v26 }
 0xafc   :  { %2701 = vmatpush1.bf16.msra.mxu0 %v5107_v29  ;;  %2742 = vmatpush1.bf16.msra.mxu1 %v5109_v30 }
 0xafd   :  { %2702 = vmatprep.subr.bf16.mxu0 %v5115_v10  ;;  %2743 = vmatprep.subr.bf16.mxu1 %v5117_v13 }
 0xb00   :  { %2703 = vmatpush1.bf16.msra.mxu0 %v5119_v40  ;;  %2744 = vmatpush1.bf16.msra.mxu1 %v5121_v44 }
 0xb01   :  { %2704 = vmatprep.subr.bf16.mxu0 %v5125_v34  ;;  %2745 = vmatprep.subr.bf16.mxu1 %v5127_v39 }
 0xb04   :  { %2705 = vmatpush1.bf16.msra.mxu0 %v5131_v42  ;;  %2746 = vmatpush1.bf16.msra.mxu1 %v5133_v27 }
 0xb05   :  { %2810 = vmatprep.subr.bf16.mxu0 %v5043_v7  ;;  %2851 = vmatprep.subr.bf16.mxu1 %v5045_v22 }
 0xbba   :  { %v2604_v21 = vpop.f32.mrb[56].mxu0  ;;  %v2645_v50 = vpop.f32.mrb[88].mxu1 }
 0xbbb   :  { %v2652_v47 = vadd.f32 %v2604_v21, %v2566_v51  ;;  %v2654_v8 = vadd.f32 %v2645_v50, %v2568_v31  ;;  %v2606_v20 = vpop.f32.mrb[57].mxu0  ;;  %v2647_v0 = vpop.f32.mrb[89].mxu1 }
 0xbbc   :  { %v2653_v38 = vadd.f32 %v2606_v20, %v2567_v53  ;;  %v2655_v4 = vadd.f32 %v2647_v0, %v2569_v11  ;;  %v2608_v35 = vpop.f32.mrb[58].mxu0  ;;  %v2649_v3 = vpop.f32.mrb[90].mxu1 }
 0xbbd   :  { %v3654_v33 = vmul.f32 -1.442695, %v2652_v47  ;;  %v2609_v15 = vpop.f32.mrb[59].mxu0  ;;  %v2650_v45 = vpop.f32.mrb[91].mxu1  ;;  %v3656_v18 = vmul.f32 -1.442695, %v2654_v8 }
 0xbbe   :  { %v3655_v49 = vmul.f32 -1.442695, %v2653_v38  ;;  %v5723_v38 = vld [vmem:[#allocation23_spill] sm:$0xff]  ;;  %v5724_v35 = vld [vmem:[#allocation32_spill] sm:$0xff] }
 0xbbf   :  { %4107 = vpow2.f32 %v3654_v33  ;;  %v2687_v3 = vadd.f32 %v5261_v43, %v5724_v35  ;;  %v5725_v33 = vld [vmem:[#allocation24_spill] sm:$0xff] }
 0xbc0   :  { %4109 = vpow2.f32 %v3655_v49  ;;  %v2689_v15 = vadd.f32 %v5265_v19, %v5725_v33 }
 0xbc1   :  { %4111 = vtanh.f32 %v2655_v4  ;;  %v2688_v4 = vadd.f32 %v5253_v16, %v5723_v38 }
 0xbc2   :  { %4113 = vpow2.f32 %v3656_v18 }
 0xbc9   :  { %v4108_v46 = vpop.eup %4107 }
 0xbca   :  { %v2665_v54 = vadd.f32 1.0, %v4108_v46  ;;  %v4110_v48 = vpop.eup %4109 }
 0xbcb   :  { %v2666_v12 = vadd.f32 1.0, %v4110_v48  ;;  %v4112_v51 = vpop.eup %4111 }
 0xbcc   :  { %4115 = vrcp.f32 %v2665_v54  ;;  %v4114_v28 = vpop.eup %4113 }
 0xbcd   :  { %4117 = vrcp.f32 %v2666_v12  ;;  %v2667_v24 = vadd.f32 1.0, %v4114_v28 }
 0xbcf   :  { %4119 = vrcp.f32 %v2667_v24 }
 0xbd6   :  { %v4116_v31 = vpop.eup %4115 }
 0xbd7   :  { %v2676_v32 = vmul.f32 %v4116_v31, %v4112_v51  ;;  %v4118_v53 = vpop.eup %4117 }
 0xbd8   :  { %v2675_v11 = vmul.f32 %v4118_v53, %v5321_v23  ;;  %v5722_v23 = vld [vmem:[#allocation31_spill] sm:$0xff] }
 0xbd9   :  { %v4120_v50 = vpop.eup %4119  ;;  %v2686_v0 = vadd.f32 %v5249_v41, %v5722_v23 }
 0xbda   :  { %v5367_v21 = vadd.f32 %v2676_v32, %v2675_v11 }
 0xbdc   :  { %4121 = vtanh.f32 %v5367_v21 }
 0xbe6   :  { %v4122_v47 = vpop.eup %4121 }
 0xbe7   :  { %v2679_v8 = vmul.f32 %v4122_v47, %v4120_v50 }
 0xbe9   :  { %v2680_v20 = vpack.c.bf16 %v2679_v8, %v2679_v8 }
 0xbeb   :  { %2681 = vst [vmem:[#allocation3 + $0x8] sm:$0xf] %v2680_v20  ;;  %2723 = vmatmul.mubr.bf16.vlgmr.msra.gmra.mrb[60].mxu0 %v2680_v20  ;;  %2764 = vmatmul.mubr.bf16.vlgmr.msra.gmra.mrb[92].mxu1 %v2680_v20 }
 0xbec   :  { %2811 = vmatpush1.bf16.msra.mxu0 %v5047_v55  ;;  %2852 = vmatpush1.bf16.msra.mxu1 %v5049_v56 }
 0xbed   :  { %2812 = vmatprep.subr.bf16.mxu0 %v5055_v14  ;;  %2853 = vmatprep.subr.bf16.mxu1 %v5057_v37 }
 0xbee   :  { %2842 = vmatprep.mubr.bf16.mxu0 %v5671_v52  ;;  %2883 = vmatprep.mubr.bf16.mxu1 %v5671_v52 }
 0xbf0   :  { %2813 = vmatpush1.bf16.msra.mxu0 %v5059_v57  ;;  %2854 = vmatpush1.bf16.msra.mxu1 %v5061_v58 }
 0xbf1   :  { %2814 = vmatprep.subr.bf16.mxu0 %v5067_v17  ;;  %2855 = vmatprep.subr.bf16.mxu1 %v5069_v59 }
 0xbf4   :  { %2815 = vmatpush1.bf16.msra.mxu0 %v5071_v60  ;;  %2856 = vmatpush1.bf16.msra.mxu1 %v5073_v61 }
 0xbf5   :  { %2816 = vmatprep.subr.bf16.mxu0 %v5079_v62  ;;  %2857 = vmatprep.subr.bf16.mxu1 %v5081_v63 }
 0xbf8   :  { %2817 = vmatpush1.bf16.msra.mxu0 %v5083_v1  ;;  %2858 = vmatpush1.bf16.msra.mxu1 %v5085_v2 }
 0xbf9   :  { %2818 = vmatprep.subr.bf16.mxu0 %v5091_v5  ;;  %2859 = vmatprep.subr.bf16.mxu1 %v5093_v6 }
 0xbfc   :  { %2819 = vmatpush1.bf16.msra.mxu0 %v5095_v36  ;;  %2860 = vmatpush1.bf16.msra.mxu1 %v5097_v25 }
 0xbfd   :  { %2820 = vmatprep.subr.bf16.mxu0 %v5103_v9  ;;  %2861 = vmatprep.subr.bf16.mxu1 %v5105_v26 }
 0xc00   :  { %2821 = vmatpush1.bf16.msra.mxu0 %v5107_v29  ;;  %2862 = vmatpush1.bf16.msra.mxu1 %v5109_v30 }
 0xc01   :  { %2822 = vmatprep.subr.bf16.mxu0 %v5115_v10  ;;  %2863 = vmatprep.subr.bf16.mxu1 %v5117_v13 }
 0xc04   :  { %2823 = vmatpush1.bf16.msra.mxu0 %v5119_v40  ;;  %2864 = vmatpush1.bf16.msra.mxu1 %v5121_v44 }
 0xc05   :  { %2824 = vmatprep.subr.bf16.mxu0 %v5125_v34  ;;  %2865 = vmatprep.subr.bf16.mxu1 %v5127_v39 }
 0xc08   :  { %2825 = vmatpush1.bf16.msra.mxu0 %v5131_v42  ;;  %2866 = vmatpush1.bf16.msra.mxu1 %v5133_v27 }
 0xc09   :  { %2930 = vmatprep.subr.bf16.mxu0 %v5043_v7  ;;  %2971 = vmatprep.subr.bf16.mxu1 %v5045_v22 }
 0xcbe   :  { %v2724_v45 = vpop.f32.mrb[60].mxu0  ;;  %v2765_v49 = vpop.f32.mrb[92].mxu1 }
 0xcbf   :  { %v2772_v18 = vadd.f32 %v2724_v45, %v2686_v0  ;;  %v2774_v46 = vadd.f32 %v2765_v49, %v2688_v4  ;;  %v2726_v54 = vpop.f32.mrb[61].mxu0  ;;  %v2767_v48 = vpop.f32.mrb[93].mxu1 }
 0xcc0   :  { %v2773_v12 = vadd.f32 %v2726_v54, %v2687_v3  ;;  %v2775_v51 = vadd.f32 %v2767_v48, %v2689_v15  ;;  %v2728_v28 = vpop.f32.mrb[62].mxu0  ;;  %v2769_v31 = vpop.f32.mrb[94].mxu1 }
 0xcc1   :  { %v3657_v32 = vmul.f32 -1.442695, %v2772_v18  ;;  %v2729_v53 = vpop.f32.mrb[63].mxu0  ;;  %v2770_v24 = vpop.f32.mrb[95].mxu1  ;;  %v3659_v50 = vmul.f32 -1.442695, %v2774_v46 }
 0xcc2   :  { %v3658_v11 = vmul.f32 -1.442695, %v2773_v12  ;;  %v5462_v53 = vld [vmem:[#allocation12 + $0x100] ss:$16 sps:$4 sm:$0xff]   ;;  %v5465_v24 = vld [vmem:[#allocation12 + $0x108] ss:$16 sps:$4 sm:$0xff]  }
 0xcc3   :  { %4123 = vpow2.f32 %v3657_v32 }
 0xcc4   :  { %4125 = vpow2.f32 %v3658_v11  ;;  %v5468_v11 = vld [vmem:[#allocation12 + $0x124] ss:$16 sps:$4 sm:$0xff]  }
 0xcc5   :  { %4127 = vtanh.f32 %v2775_v51 }
 0xcc6   :  { %4129 = vpow2.f32 %v3659_v50  ;;  %v5471_v50 = vld [vmem:[#allocation12 + $0x12c] ss:$16 sps:$4 sm:$0xff]  }
 0xccd   :  { %v4124_v47 = vpop.eup %4123 }
 0xcce   :  { %v2785_v8 = vadd.f32 1.0, %v4124_v47  ;;  %v4126_v20 = vpop.eup %4125  ;;  %v5476_v47 = vld [vmem:[#allocation12 + $0x120] ss:$16 sps:$4 sm:$0xff]  }
 0xccf   :  { %v2786_v23 = vadd.f32 1.0, %v4126_v20  ;;  %v4128_v0 = vpop.eup %4127  ;;  %v5482_v20 = vld [vmem:[#allocation12 + $0x144] ss:$16 sps:$4 sm:$0xff]  }
 0xcd0   :  { %4131 = vrcp.f32 %v2785_v8  ;;  %v4130_v38 = vpop.eup %4129  ;;  %v5479_v8 = vld [vmem:[#allocation12 + $0x128] ss:$16 sps:$4 sm:$0xff]  }
 0xcd1   :  { %4133 = vrcp.f32 %v2786_v23  ;;  %v2787_v33 = vadd.f32 1.0, %v4130_v38  ;;  %v5485_v23 = vld [vmem:[#allocation12 + $0x14c] ss:$16 sps:$4 sm:$0xff]   ;;  %v5491_v38 = vld [vmem:[#allocation12 + $0x148] ss:$16 sps:$4 sm:$0xff]  }
 0xcd3   :  { %4135 = vrcp.f32 %v2787_v33  ;;  %v5503_v33 = vld [vmem:[#allocation12 + $0x168] ss:$16 sps:$4 sm:$0xff]  }
 0xcda   :  { %v4132_v4 = vpop.eup %4131 }
 0xcdb   :  { %v2796_v35 = vmul.f32 %v4132_v4, %v4128_v0  ;;  %v4134_v3 = vpop.eup %4133  ;;  %v5488_v0 = vld [vmem:[#allocation12 + $0x140] ss:$16 sps:$4 sm:$0xff]   ;;  %v5494_v4 = vld [vmem:[#allocation12 + $0x164] ss:$16 sps:$4 sm:$0xff]  }
 0xcdc   :  { %v2795_v15 = vmul.f32 %v4134_v3, %v5367_v21  ;;  %v5500_v3 = vld [vmem:[#allocation12 + $0x160] ss:$16 sps:$4 sm:$0xff]  }
 0xcdd   :  { %v4136_v49 = vpop.eup %4135 }
 0xcde   :  { %v5413_v45 = vadd.f32 %v2796_v35, %v2795_v15  ;;  %v5497_v35 = vld [vmem:[#allocation12 + $0x16c] ss:$16 sps:$4 sm:$0xff]   ;;  %v5506_v15 = vld [vmem:[#allocation12 + $0x184] ss:$16 sps:$4 sm:$0xff]  }
 0xce0   :  { %4137 = vtanh.f32 %v5413_v45 }
 0xcea   :  { %v4138_v18 = vpop.eup %4137 }
 0xceb   :  { %v2799_v46 = vmul.f32 %v4138_v18, %v4136_v49  ;;  %v5512_v49 = vld [vmem:[#allocation12 + $0x180] ss:$16 sps:$4 sm:$0xff]   ;;  %v5515_v18 = vld [vmem:[#allocation12 + $0x188] ss:$16 sps:$4 sm:$0xff]  }
 0xced   :  { %v2800_v54 = vpack.c.bf16 %v2799_v46, %v2799_v46  ;;  %v5518_v46 = vld [vmem:[#allocation12 + $0x1a4] ss:$16 sps:$4 sm:$0xff]  }
 0xcef   :  { %2801 = vst [vmem:[#allocation3 + $0xc] sm:$0xf] %v2800_v54  ;;  %2843 = vmatmul.mubr.bf16.vlgmr.msra.gmra.mrb[64].mxu0 %v2800_v54  ;;  %2884 = vmatmul.mubr.bf16.vlgmr.msra.gmra.mrb[96].mxu1 %v2800_v54  ;;  %v5521_v54 = vld [vmem:[#allocation12 + $0x1ac] ss:$16 sps:$4 sm:$0xff]  }
 0xcf0   :  { %2931 = vmatpush1.bf16.msra.mxu0 %v5047_v55  ;;  %2972 = vmatpush1.bf16.msra.mxu1 %v5049_v56  ;;  %v5726_v55 = vld [vmem:[#allocation33_spill] sm:$0xff] }
 0xcf1   :  { %2932 = vmatprep.subr.bf16.mxu0 %v5055_v14  ;;  %2973 = vmatprep.subr.bf16.mxu1 %v5057_v37  ;;  %v2806_v56 = vadd.f32 %v5249_v41, %v5726_v55  ;;  %v5727_v14 = vld [vmem:[#allocation25_spill] sm:$0xff]  ;;  %v5524_v55 = vld [vmem:[#allocation12 + $0x1a0] ss:$16 sps:$4 sm:$0xff]  }
 0xcf2   :  { %2962 = vmatprep.mubr.bf16.mxu0 %v5671_v52  ;;  %3003 = vmatprep.mubr.bf16.mxu1 %v5671_v52  ;;  %v2808_v37 = vadd.f32 %v5253_v16, %v5727_v14  ;;  %v5530_v14 = vld [vmem:[#allocation12 + $0x1c4] ss:$16 sps:$4 sm:$0xff]  }
 0xcf4   :  { %2933 = vmatpush1.bf16.msra.mxu0 %v5059_v57  ;;  %2974 = vmatpush1.bf16.msra.mxu1 %v5061_v58  ;;  %v5728_v57 = vld [vmem:[#allocation34_spill] sm:$0xff] }
 0xcf5   :  { %2934 = vmatprep.subr.bf16.mxu0 %v5067_v17  ;;  %2975 = vmatprep.subr.bf16.mxu1 %v5069_v59  ;;  %v2807_v58 = vadd.f32 %v5261_v43, %v5728_v57  ;;  %v5729_v17 = vld [vmem:[#allocation26_spill] sm:$0xff] }
 0xcf6   :  { %v2809_v59 = vadd.f32 %v5265_v19, %v5729_v17  ;;  %v5536_v57 = vld [vmem:[#allocation12 + $0x1c0] ss:$16 sps:$4 sm:$0xff]   ;;  %v5542_v17 = vld [vmem:[#allocation12 + $0x1e4] ss:$16 sps:$4 sm:$0xff]  }
 0xcf8   :  { %2935 = vmatpush1.bf16.msra.mxu0 %v5071_v60  ;;  %2976 = vmatpush1.bf16.msra.mxu1 %v5073_v61 }
 0xcf9   :  { %2936 = vmatprep.subr.bf16.mxu0 %v5079_v62  ;;  %2977 = vmatprep.subr.bf16.mxu1 %v5081_v63 }
 0xcfc   :  { %2937 = vmatpush1.bf16.msra.mxu0 %v5083_v1  ;;  %2978 = vmatpush1.bf16.msra.mxu1 %v5085_v2 }
 0xcfd   :  { %2938 = vmatprep.subr.bf16.mxu0 %v5091_v5  ;;  %2979 = vmatprep.subr.bf16.mxu1 %v5093_v6 }
 0xd00   :  { %2939 = vmatpush1.bf16.msra.mxu0 %v5095_v36  ;;  %2980 = vmatpush1.bf16.msra.mxu1 %v5097_v25 }
 0xd01   :  { %2940 = vmatprep.subr.bf16.mxu0 %v5103_v9  ;;  %2981 = vmatprep.subr.bf16.mxu1 %v5105_v26 }
 0xd04   :  { %2941 = vmatpush1.bf16.msra.mxu0 %v5107_v29  ;;  %2982 = vmatpush1.bf16.msra.mxu1 %v5109_v30 }
 0xd05   :  { %2942 = vmatprep.subr.bf16.mxu0 %v5115_v10  ;;  %2983 = vmatprep.subr.bf16.mxu1 %v5117_v13 }
 0xd08   :  { %2943 = vmatpush1.bf16.msra.mxu0 %v5119_v40  ;;  %2984 = vmatpush1.bf16.msra.mxu1 %v5121_v44 }
 0xd09   :  { %2944 = vmatprep.subr.bf16.mxu0 %v5125_v34  ;;  %2985 = vmatprep.subr.bf16.mxu1 %v5127_v39 }
 0xd0c   :  { %2945 = vmatpush1.bf16.msra.mxu0 %v5131_v42  ;;  %2986 = vmatpush1.bf16.msra.mxu1 %v5133_v27 }
 0xd0d   :  { %3050 = vmatprep.subr.bf16.mxu0 %v5043_v7  ;;  %3091 = vmatprep.subr.bf16.mxu1 %v5045_v22 }
 0xdc2   :  { %v2844_v60 = vpop.f32.mrb[64].mxu0  ;;  %v2885_v61 = vpop.f32.mrb[96].mxu1 }
 0xdc3   :  { %v2892_v62 = vadd.f32 %v2844_v60, %v2806_v56  ;;  %v2894_v63 = vadd.f32 %v2885_v61, %v2808_v37  ;;  %v2846_v1 = vpop.f32.mrb[65].mxu0  ;;  %v2887_v7 = vpop.f32.mrb[97].mxu1  ;;  %v5527_v56 = vld [vmem:[#allocation12 + $0x1a8] ss:$16 sps:$4 sm:$0xff]   ;;  %v5533_v37 = vld [vmem:[#allocation12 + $0x1cc] ss:$16 sps:$4 sm:$0xff]  }
 0xdc4   :  { %v2893_v2 = vadd.f32 %v2846_v1, %v2807_v58  ;;  %v2895_v22 = vadd.f32 %v2887_v7, %v2809_v59  ;;  %v2848_v5 = vpop.f32.mrb[66].mxu0  ;;  %v2889_v6 = vpop.f32.mrb[98].mxu1  ;;  %v5539_v58 = vld [vmem:[#allocation12 + $0x1c8] ss:$16 sps:$4 sm:$0xff]   ;;  %v5545_v59 = vld [vmem:[#allocation12 + $0x1ec] ss:$16 sps:$4 sm:$0xff]  }
 0xdc5   :  { %v3660_v36 = vmul.f32 -1.442695, %v2892_v62  ;;  %v2849_v25 = vpop.f32.mrb[67].mxu0  ;;  %v2890_v9 = vpop.f32.mrb[99].mxu1  ;;  %v3662_v29 = vmul.f32 -1.442695, %v2894_v63 }
 0xdc6   :  { %v3661_v26 = vmul.f32 -1.442695, %v2893_v2  ;;  %v5548_v60 = vld [vmem:[#allocation12 + $0x1e0] ss:$16 sps:$4 sm:$0xff]   ;;  %v5551_v61 = vld [vmem:[#allocation12 + $0x1e8] ss:$16 sps:$4 sm:$0xff]  }
 0xdc7   :  { %4139 = vpow2.f32 %v3660_v36  ;;  %v4265_v62 = vld [vmem:[#allocation12 + $0x104] ss:$16 sps:$4 sm:$0xff]   ;;  %v4266_v63 = vld [vmem:[#allocation12 + $0x10c] ss:$16 sps:$4 sm:$0xff]  }
 0xdc8   :  { %4141 = vpow2.f32 %v3661_v26  ;;  %v5730_v1 = vld [vmem:[#allocation35_spill] sm:$0xff]  ;;  %v5732_v5 = vld [vmem:[#allocation36_spill] sm:$0xff] }
 0xdc9   :  { %4143 = vtanh.f32 %v2895_v22  ;;  %v2926_v7 = vadd.f32 %v5249_v41, %v5730_v1  ;;  %v5731_v2 = vld [vmem:[#allocation27_spill] sm:$0xff]  ;;  %v2927_v6 = vadd.f32 %v5261_v43, %v5732_v5  ;;  %v5733_v36 = vld [vmem:[#allocation28_spill] sm:$0xff] }
 0xdca   :  { %4145 = vpow2.f32 %v3662_v29  ;;  %v2928_v22 = vadd.f32 %v5253_v16, %v5731_v2  ;;  %v2929_v25 = vadd.f32 %v5265_v19, %v5733_v36 }
 0xdd1   :  { %v4140_v30 = vpop.eup %4139 }
 0xdd2   :  { %v2905_v10 = vadd.f32 1.0, %v4140_v30  ;;  %v4142_v13 = vpop.eup %4141 }
 0xdd3   :  { %v2906_v40 = vadd.f32 1.0, %v4142_v13  ;;  %v4144_v44 = vpop.eup %4143 }
 0xdd4   :  { %4147 = vrcp.f32 %v2905_v10  ;;  %v4146_v34 = vpop.eup %4145 }
 0xdd5   :  { %4149 = vrcp.f32 %v2906_v40  ;;  %v2907_v21 = vadd.f32 1.0, %v4146_v34 }
 0xdd7   :  { %4151 = vrcp.f32 %v2907_v21 }
 0xdde   :  { %v4148_v39 = vpop.eup %4147 }
 0xddf   :  { %v2916_v42 = vmul.f32 %v4148_v39, %v4144_v44  ;;  %v4150_v27 = vpop.eup %4149 }
 0xde0   :  { %v2915_v48 = vmul.f32 %v4150_v27, %v5413_v45  ;;  %v5509_v45 = vld [vmem:[#allocation12 + $0x18c] ss:$16 sps:$4 sm:$0xff]  }
 0xde1   :  { %v4152_v51 = vpop.eup %4151 }
 0xde2   :  { %v5459_v12 = vadd.f32 %v2916_v42, %v2915_v48 }
 0xde4   :  { %4153 = vtanh.f32 %v5459_v12 }
 0xdee   :  { %v4154_v28 = vpop.eup %4153 }
 0xdef   :  { %v2919_v31 = vmul.f32 %v4154_v28, %v4152_v51 }
 0xdf1   :  { %v2920_v32 = vpack.c.bf16 %v2919_v31, %v2919_v31 }
 0xdf3   :  { %2921 = vst [vmem:[#allocation3 + $0x10] sm:$0xf] %v2920_v32  ;;  %2963 = vmatmul.mubr.bf16.vlgmr.msra.gmra.mrb[68].mxu0 %v2920_v32  ;;  %3004 = vmatmul.mubr.bf16.vlgmr.msra.gmra.mrb[100].mxu1 %v2920_v32 }
 0xdf4   :  { %3051 = vmatpush1.bf16.msra.mxu0 %v5462_v53  ;;  %3092 = vmatpush1.bf16.msra.mxu1 %v5465_v24 }
 0xdf5   :  { %3052 = vmatprep.subr.bf16.mxu0 %v5468_v11  ;;  %3093 = vmatprep.subr.bf16.mxu1 %v5471_v50 }
 0xdf6   :  { %3082 = vmatprep.mubr.bf16.mxu0 %v5671_v52  ;;  %3123 = vmatprep.mubr.bf16.mxu1 %v5671_v52 }
 0xdf8   :  { %3053 = vmatpush1.bf16.msra.mxu0 %v5476_v47  ;;  %3094 = vmatpush1.bf16.msra.mxu1 %v5479_v8 }
 0xdf9   :  { %3054 = vmatprep.subr.bf16.mxu0 %v5482_v20  ;;  %3095 = vmatprep.subr.bf16.mxu1 %v5485_v23 }
 0xdfc   :  { %3055 = vmatpush1.bf16.msra.mxu0 %v5488_v0  ;;  %3096 = vmatpush1.bf16.msra.mxu1 %v5491_v38 }
 0xdfd   :  { %3056 = vmatprep.subr.bf16.mxu0 %v5494_v4  ;;  %3097 = vmatprep.subr.bf16.mxu1 %v5497_v35 }
 0xe00   :  { %3057 = vmatpush1.bf16.msra.mxu0 %v5500_v3  ;;  %3098 = vmatpush1.bf16.msra.mxu1 %v5503_v33 }
 0xe01   :  { %3058 = vmatprep.subr.bf16.mxu0 %v5506_v15  ;;  %3099 = vmatprep.subr.bf16.mxu1 %v5509_v45 }
 0xe04   :  { %3059 = vmatpush1.bf16.msra.mxu0 %v5512_v49  ;;  %3100 = vmatpush1.bf16.msra.mxu1 %v5515_v18 }
 0xe05   :  { %3060 = vmatprep.subr.bf16.mxu0 %v5518_v46  ;;  %3101 = vmatprep.subr.bf16.mxu1 %v5521_v54 }
 0xe08   :  { %3061 = vmatpush1.bf16.msra.mxu0 %v5524_v55  ;;  %3102 = vmatpush1.bf16.msra.mxu1 %v5527_v56 }
 0xe09   :  { %3062 = vmatprep.subr.bf16.mxu0 %v5530_v14  ;;  %3103 = vmatprep.subr.bf16.mxu1 %v5533_v37 }
 0xe0c   :  { %3063 = vmatpush1.bf16.msra.mxu0 %v5536_v57  ;;  %3104 = vmatpush1.bf16.msra.mxu1 %v5539_v58 }
 0xe0d   :  { %3064 = vmatprep.subr.bf16.mxu0 %v5542_v17  ;;  %3105 = vmatprep.subr.bf16.mxu1 %v5545_v59 }
 0xe10   :  { %3065 = vmatpush1.bf16.msra.mxu0 %v5548_v60  ;;  %3106 = vmatpush1.bf16.msra.mxu1 %v5551_v61 }
 0xe11   :  { %3170 = vmatprep.subr.bf16.mxu0 %v4265_v62  ;;  %3211 = vmatprep.subr.bf16.mxu1 %v4266_v63 }
 0xec6   :  { %v2964_v9 = vpop.f32.mrb[68].mxu0  ;;  %v3005_v26 = vpop.f32.mrb[100].mxu1 }
 0xec7   :  { %v3012_v29 = vadd.f32 %v2964_v9, %v2926_v7  ;;  %v3014_v30 = vadd.f32 %v3005_v26, %v2928_v22  ;;  %v2966_v10 = vpop.f32.mrb[69].mxu0  ;;  %v3007_v13 = vpop.f32.mrb[101].mxu1 }
 0xec8   :  { %v3013_v40 = vadd.f32 %v2966_v10, %v2927_v6  ;;  %v3015_v44 = vadd.f32 %v3007_v13, %v2929_v25  ;;  %v2968_v34 = vpop.f32.mrb[70].mxu0  ;;  %v3009_v39 = vpop.f32.mrb[102].mxu1 }
 0xec9   :  { %v3663_v42 = vmul.f32 -1.442695, %v3012_v29  ;;  %v2969_v27 = vpop.f32.mrb[71].mxu0  ;;  %v3010_v21 = vpop.f32.mrb[103].mxu1  ;;  %v3665_v51 = vmul.f32 -1.442695, %v3014_v30 }
 0xeca   :  { %v3664_v48 = vmul.f32 -1.442695, %v3013_v40  ;;  %v3937_v27 = vld [vmem:[#allocation14 + $0x8] sm:$0xff]   ;;  %v3936_v21 = vld [vmem:[#allocation3] sm:$0xff]  }
 0xecb   :  { %4155 = vpow2.f32 %v3663_v42 }
 0xecc   :  { %4157 = vpow2.f32 %v3664_v48  ;;  %v3938_v48 = vld [vmem:[#allocation14 + $0x10] sm:$0xff]  }
 0xecd   :  { %4159 = vtanh.f32 %v3015_v44 }
 0xece   :  { %4161 = vpow2.f32 %v3665_v51  ;;  %v3939_v51 = vld [vmem:[#allocation14 + $0x18] sm:$0xff]  }
 0xed5   :  { %v4156_v28 = vpop.eup %4155 }
 0xed6   :  { %v3025_v31 = vadd.f32 1.0, %v4156_v28  ;;  %v4158_v32 = vpop.eup %4157  ;;  %v3940_v28 = vld [vmem:[#allocation14 + $0x20] sm:$0xff]  }
 0xed7   :  { %v3026_v62 = vadd.f32 1.0, %v4158_v32  ;;  %v4160_v63 = vpop.eup %4159  ;;  %v3942_v32 = vld [vmem:[#allocation14 + $0x30] sm:$0xff]  }
 0xed8   :  { %4163 = vrcp.f32 %v3025_v31  ;;  %v4162_v1 = vpop.eup %4161  ;;  %v3941_v31 = vld [vmem:[#allocation14 + $0x28] sm:$0xff]  }
 0xed9   :  { %4165 = vrcp.f32 %v3026_v62  ;;  %v3027_v5 = vadd.f32 1.0, %v4162_v1  ;;  %v3943_v62 = vld [vmem:[#allocation14 + $0x38] sm:$0xff]  }
 0xedb   :  { %4167 = vrcp.f32 %v3027_v5 }
 0xee2   :  { %v4164_v7 = vpop.eup %4163 }
 0xee3   :  { %v3036_v2 = vmul.f32 %v4164_v7, %v4160_v63  ;;  %v4166_v22 = vpop.eup %4165  ;;  %v3944_v63 = vld [vmem:[#allocation3 + $0x8] sm:$0xff]   ;;  %v5738_v7 = vld [vmem:[#allocation40_spill] sm:$0xff] }
 0xee4   :  { %v3035_v6 = vmul.f32 %v4166_v22, %v5459_v12  ;;  %v5734_v12 = vld [vmem:[#allocation37_spill] sm:$0xff] }
 0xee5   :  { %v4168_v25 = vpop.eup %4167  ;;  %v5739_v22 = vld [vmem:[#allocation41_spill] sm:$0xff] }
 0xee6   :  { %v5563_v36 = vadd.f32 %v3036_v2, %v3035_v6  ;;  %v3166_v2 = vadd.f32 %v5249_v41, %v5738_v7  ;;  %v3168_v5 = vadd.f32 %v5253_v16, %v5739_v22  ;;  %v5740_v6 = vld [vmem:[#allocation20_spill] sm:$0xff] }
 0xee8   :  { %4169 = vtanh.f32 %v5563_v36 }
 0xef2   :  { %v4170_v9 = vpop.eup %4169 }
 0xef3   :  { %v3039_v26 = vmul.f32 %v4170_v9, %v4168_v25  ;;  %v5741_v25 = vld [vmem:[#allocation42_spill] sm:$0xff] }
 0xef4   :  { %v3169_v9 = vadd.f32 %v5265_v19, %v5741_v25 }
 0xef5   :  { %v3040_v29 = vpack.c.bf16 %v3039_v26, %v3039_v26 }
 0xef7   :  { %3041 = vst [vmem:[#allocation3 + $0x14] sm:$0xf] %v3040_v29  ;;  %3083 = vmatmul.mubr.bf16.vlgmr.msra.gmra.mrb[72].mxu0 %v3040_v29  ;;  %3124 = vmatmul.mubr.bf16.vlgmr.msra.gmra.mrb[104].mxu1 %v3040_v29 }
 0xef8   :  { %3171 = vmatpush1.bf16.msra.mxu0 %v5462_v53  ;;  %3212 = vmatpush1.bf16.msra.mxu1 %v5465_v24  ;;  %v3046_v53 = vadd.f32 %v5249_v41, %v5734_v12  ;;  %v5735_v24 = vld [vmem:[#allocation29_spill] sm:$0xff] }
 0xef9   :  { %3172 = vmatprep.subr.bf16.mxu0 %v5468_v11  ;;  %3213 = vmatprep.subr.bf16.mxu1 %v5471_v50  ;;  %v3048_v11 = vadd.f32 %v5253_v16, %v5735_v24  ;;  %v5736_v50 = vld [vmem:[#allocation38_spill] sm:$0xff] }
 0xefa   :  { %3202 = vmatprep.mubr.bf16.mxu0 %v5671_v52  ;;  %3243 = vmatprep.mubr.bf16.mxu1 %v5671_v52  ;;  %v3935_v52 = vld [vmem:[#allocation14] sm:$0xff]  }
 0xefc   :  { %3173 = vmatpush1.bf16.msra.mxu0 %v5476_v47  ;;  %3214 = vmatpush1.bf16.msra.mxu1 %v5479_v8  ;;  %v3047_v47 = vadd.f32 %v5261_v43, %v5736_v50  ;;  %v5737_v8 = vld [vmem:[#allocation39_spill] sm:$0xff] }
 0xefd   :  { %3174 = vmatprep.subr.bf16.mxu0 %v5482_v20  ;;  %3215 = vmatprep.subr.bf16.mxu1 %v5485_v23  ;;  %v3049_v20 = vadd.f32 %v5265_v19, %v5737_v8 }
 0xefe   :  { %v3945_v1 = vld [vmem:[#allocation3 + $0x10] sm:$0xff]  }
 0xf00   :  { %3175 = vmatpush1.bf16.msra.mxu0 %v5488_v0  ;;  %3216 = vmatpush1.bf16.msra.mxu1 %v5491_v38 }
 0xf01   :  { %3176 = vmatprep.subr.bf16.mxu0 %v5494_v4  ;;  %3217 = vmatprep.subr.bf16.mxu1 %v5497_v35 }
 0xf04   :  { %3177 = vmatpush1.bf16.msra.mxu0 %v5500_v3  ;;  %3218 = vmatpush1.bf16.msra.mxu1 %v5503_v33 }
 0xf05   :  { %3178 = vmatprep.subr.bf16.mxu0 %v5506_v15  ;;  %3219 = vmatprep.subr.bf16.mxu1 %v5509_v45 }
 0xf08   :  { %3179 = vmatpush1.bf16.msra.mxu0 %v5512_v49  ;;  %3220 = vmatpush1.bf16.msra.mxu1 %v5515_v18 }
 0xf09   :  { %3180 = vmatprep.subr.bf16.mxu0 %v5518_v46  ;;  %3221 = vmatprep.subr.bf16.mxu1 %v5521_v54 }
 0xf0c   :  { %3181 = vmatpush1.bf16.msra.mxu0 %v5524_v55  ;;  %3222 = vmatpush1.bf16.msra.mxu1 %v5527_v56 }
 0xf0d   :  { %3182 = vmatprep.subr.bf16.mxu0 %v5530_v14  ;;  %3223 = vmatprep.subr.bf16.mxu1 %v5533_v37 }
 0xf10   :  { %3183 = vmatpush1.bf16.msra.mxu0 %v5536_v57  ;;  %3224 = vmatpush1.bf16.msra.mxu1 %v5539_v58 }
 0xf11   :  { %3184 = vmatprep.subr.bf16.mxu0 %v5542_v17  ;;  %3225 = vmatprep.subr.bf16.mxu1 %v5545_v59 }
 0xf14   :  { %3185 = vmatpush1.bf16.msra.mxu0 %v5548_v60  ;;  %3226 = vmatpush1.bf16.msra.mxu1 %v5551_v61 }
 0xf15   :  { %3697 = vmatprep.subr.bf16.mxu0 %v3935_v52 }
 0xfca   :  { %v3084_v23 = vpop.f32.mrb[72].mxu0  ;;  %v3125_v0 = vpop.f32.mrb[104].mxu1 }
 0xfcb   :  { %v3132_v38 = vadd.f32 %v3084_v23, %v3046_v53  ;;  %v3134_v4 = vadd.f32 %v3125_v0, %v3048_v11  ;;  %v3086_v35 = vpop.f32.mrb[73].mxu0  ;;  %v3127_v3 = vpop.f32.mrb[105].mxu1 }
 0xfcc   :  { %v3133_v33 = vadd.f32 %v3086_v35, %v3047_v47  ;;  %v3135_v15 = vadd.f32 %v3127_v3, %v3049_v20  ;;  %v3088_v45 = vpop.f32.mrb[74].mxu0  ;;  %v3129_v49 = vpop.f32.mrb[106].mxu1 }
 0xfcd   :  { %v3666_v18 = vmul.f32 -1.442695, %v3132_v38  ;;  %v3089_v46 = vpop.f32.mrb[75].mxu0  ;;  %v3130_v54 = vpop.f32.mrb[107].mxu1  ;;  %v3668_v56 = vmul.f32 -1.442695, %v3134_v4 }
 0xfce   :  { %v3667_v55 = vmul.f32 -1.442695, %v3133_v33 }
 0xfcf   :  { %4171 = vpow2.f32 %v3666_v18  ;;  %v3684_v18 = vld [vmem:[%s5640_s6] ss:$0 sm:$0xff]  ;;  %s4418_s6 = smov [#allocation15]  }
 0xfd0   :  { %4173 = vpow2.f32 %v3667_v55  ;;  %s3473_s20 = sshll.u32 %s4418_s6, 4  ;;  %s3474_s20 = int_to_ptr.vmem [resolvable:$true] %s3473_s20 }
 0xfd1   :  { %4175 = vtanh.f32 %v3135_v15  ;;  %s4377_s21 = scalar_lea.vmem %s3474_s20, 1024  ;;  %p4382_p13 = scmp.lt.s32.totalorder %s3474_s20, %s3474_s20 }
 0xfd2   :  { %4177 = vpow2.f32 %v3668_v56  ;;  %p4378_p12 = scmp.ne.s32.totalorder %s3474_s20, %s4377_s21  ;;  %p4383_p0 = scmp.lt.s32.totalorder %s4377_s21, %s4377_s21 }
 0xfd4   :  { %p4384_p1 = por %p4383_p0, %p4382_p13 }
 0xfd6   :  { %p4385_p2 = pnand %p4384_p1, %p4378_p12 }
 0xfd9   :  { %v4172_v14 = vpop.eup %4171 }
 0xfda   :  { %v3145_v37 = vadd.f32 1.0, %v4172_v14  ;;  %v4174_v57 = vpop.eup %4173 }
 0xfdb   :  { %v3146_v58 = vadd.f32 1.0, %v4174_v57  ;;  %v4176_v17 = vpop.eup %4175 }
 0xfdc   :  { %4179 = vrcp.f32 %v3145_v37  ;;  %v4178_v59 = vpop.eup %4177 }
 0xfdd   :  { %4181 = vrcp.f32 %v3146_v58  ;;  %v3147_v10 = vadd.f32 1.0, %v4178_v59 }
 0xfdf   :  { %4183 = vrcp.f32 %v3147_v10 }
 0xfe6   :  { %v4180_v60 = vpop.eup %4179 }
 0xfe7   :  { %v3156_v61 = vmul.f32 %v4180_v60, %v4176_v17  ;;  %v4182_v30 = vpop.eup %4181 }
 0xfe8   :  { %v3155_v13 = vmul.f32 %v4182_v30, %v5563_v36  ;;  %v3167_v36 = vadd.f32 %v5261_v43, %v5740_v6 }
 0xfe9   :  { %v4184_v44 = vpop.eup %4183 }
 0xfea   :  { %v5607_v40 = vadd.f32 %v3156_v61, %v3155_v13 }
 0xfec   :  { %4185 = vtanh.f32 %v5607_v40 }
 0xff6   :  { %v4186_v34 = vpop.eup %4185 }
 0xff7   :  { %v3159_v39 = vmul.f32 %v4186_v34, %v4184_v44 }
 0xff9   :  { %v3160_v42 = vpack.c.bf16 %v3159_v39, %v3159_v39 }
 0xffb   :  { %3161 = vst [vmem:[#allocation3 + $0x18] sm:$0xf] %v3160_v42  ;;  %3203 = vmatmul.mubr.bf16.vlgmr.msra.gmra.mrb[76].mxu0 %v3160_v42  ;;  %3244 = vmatmul.mubr.bf16.vlgmr.msra.gmra.mrb[108].mxu1 %v3160_v42 }
 0xffc   :  { %3698 = vmatpush3.bf16.msra.mxu0 %v3935_v52  ;;  %3713 = vmatprep.mubr.bf16.mxu0 %v3936_v21 }
 0xffd   :  { %3699 = vmatprep.subr.bf16.mxu0 %v3937_v27 }
0x1000   :  { %3700 = vmatpush3.bf16.msra.mxu0 %v3937_v27 }
0x1001   :  { %3701 = vmatprep.subr.bf16.mxu0 %v3938_v48 }
0x1004   :  { %3702 = vmatpush3.bf16.msra.mxu0 %v3938_v48 }
0x1005   :  { %3703 = vmatprep.subr.bf16.mxu0 %v3939_v51 }
0x1008   :  { %3704 = vmatpush3.bf16.msra.mxu0 %v3939_v51 }
0x1009   :  { %3705 = vmatprep.subr.bf16.mxu0 %v3940_v28 }
0x100c   :  { %3706 = vmatpush3.bf16.msra.mxu0 %v3940_v28 }
0x100d   :  { %3707 = vmatprep.subr.bf16.mxu0 %v3941_v31 }
0x1010   :  { %3708 = vmatpush3.bf16.msra.mxu0 %v3941_v31 }
0x1011   :  { %3709 = vmatprep.subr.bf16.mxu0 %v3942_v32 }
0x1014   :  { %3710 = vmatpush3.bf16.msra.mxu0 %v3942_v32 }
0x1015   :  { %3711 = vmatprep.subr.bf16.mxu0 %v3943_v62 }
0x1018   :  { %3712 = vmatpush3.bf16.msra.mxu0 %v3943_v62 }
0x101b   :  { %3714 = vmatmul.mubr.bf16.vlgmr.msra.gmra.mrb[80].mxu0 %v3944_v63 }
0x101c   :  { %3717 = vmatprep.mubr.bf16.mxu0 %v3945_v1 }
0x10ce   :  { %v3204_v26 = vpop.f32.mrb[76].mxu0  ;;  %v3245_v29 = vpop.f32.mrb[108].mxu1 }
0x10cf   :  { %v3252_v52 = vadd.f32 %v3204_v26, %v3166_v2  ;;  %v3254_v12 = vadd.f32 %v3245_v29, %v3168_v5  ;;  %v3206_v53 = vpop.f32.mrb[77].mxu0  ;;  %v3247_v24 = vpop.f32.mrb[109].mxu1 }
0x10d0   :  { %v3253_v11 = vadd.f32 %v3206_v53, %v3167_v36  ;;  %v3255_v50 = vadd.f32 %v3247_v24, %v3169_v9  ;;  %v3208_v47 = vpop.f32.mrb[78].mxu0  ;;  %v3249_v8 = vpop.f32.mrb[110].mxu1 }
0x10d1   :  { %v3669_v41 = vmul.f32 -1.442695, %v3252_v52  ;;  %v3209_v20 = vpop.f32.mrb[79].mxu0  ;;  %v3250_v23 = vpop.f32.mrb[111].mxu1  ;;  %v3671_v43 = vmul.f32 -1.442695, %v3254_v12 }
0x10d2   :  { %v3670_v16 = vmul.f32 -1.442695, %v3253_v11 }
0x10d3   :  { %4187 = vpow2.f32 %v3669_v41 }
0x10d4   :  { %4189 = vpow2.f32 %v3670_v16 }
0x10d5   :  { %4191 = vtanh.f32 %v3255_v50 }
0x10d6   :  { %4193 = vpow2.f32 %v3671_v43 }
0x10dd   :  { %v4188_v0 = vpop.eup %4187 }
0x10de   :  { %v3265_v38 = vadd.f32 1.0, %v4188_v0  ;;  %v4190_v19 = vpop.eup %4189 }
0x10df   :  { %v3266_v4 = vadd.f32 1.0, %v4190_v19  ;;  %v4192_v35 = vpop.eup %4191 }
0x10e0   :  { %4195 = vrcp.f32 %v3265_v38  ;;  %v4194_v3 = vpop.eup %4193 }
0x10e1   :  { %4197 = vrcp.f32 %v3266_v4  ;;  %v3267_v49 = vadd.f32 1.0, %v4194_v3 }
0x10e3   :  { %4199 = vrcp.f32 %v3267_v49 }
0x10ea   :  { %v4196_v33 = vpop.eup %4195 }
0x10eb   :  { %v3276_v15 = vmul.f32 %v4196_v33, %v4192_v35  ;;  %v4198_v45 = vpop.eup %4197 }
0x10ec   :  { %v3275_v46 = vmul.f32 %v4198_v45, %v5607_v40 }
0x10ed   :  { %v4200_v60 = vpop.eup %4199 }
0x10ee   :  { %v3715_v54 = vpop.f32.mrb[80].mxu0  ;;  %v3277_v55 = vadd.f32 %v3276_v15, %v3275_v46 }
0x10ef   :  { %v3454_v56 = vadd.f32 %v3715_v54, %v3684_v18  ;;  %v3414_v14 = vpop.f32.mrb[81].mxu0 }
0x10f0   :  { %v3452_v37 = vadd.f32 %v3684_v18, %v3414_v14  ;;  %v3716_v57 = vpop.f32.mrb[82].mxu0  ;;  %4201 = vtanh.f32 %v3277_v55 }
0x10f1   :  { %3462 = vst [vmem:[#allocation15 + $0x10] sm:$0xff] %v3454_v56  ;;  %v3455_v58 = vadd.f32 %v3716_v57, %v3684_v18  ;;  %v3417_v17 = vpop.f32.mrb[83].mxu0 }
0x10f2   :  { %3460 = vst [vmem:[#allocation15] sm:$0xff] %v3452_v37  ;;  %v3453_v59 = vadd.f32 %v3684_v18, %v3417_v17 }
0x10f3   :  { %3463 = vst [vmem:[#allocation15 + $0x18] sm:$0xff] %v3455_v58 }
0x10f4   :  { %3461 = vst [vmem:[#allocation15 + $0x8] sm:$0xff] %v3453_v59 }
0x10fa   :  { %v4202_v61 = vpop.eup %4201 }
0x10fb   :  { %v3279_v30 = vmul.f32 %v4202_v61, %v4200_v60 }
0x10fd   :  { %v3280_v10 = vpack.c.bf16 %v3279_v30, %v3279_v30 }
0x10ff   :  { %3281 = vst [vmem:[#allocation3 + $0x1c] sm:$0xf] %v3280_v10 }
0x1106   :  { %v3946_v13 = vld [vmem:[#allocation3 + $0x18] sm:$0xff]  }
0x1107   :  { %3718 = vmatmul.mubr.bf16.gmra.mrb[84].mxu0 %v3946_v13 }
0x11da   :  { %v3719_v40 = vpop.f32.mrb[84].mxu0 }
0x11db   :  { %v3458_v44 = vadd.f32 %v3719_v40, %v3684_v18  ;;  %v3430_v34 = vpop.f32.mrb[85].mxu0 }
0x11dc   :  { %v3456_v39 = vadd.f32 %v3684_v18, %v3430_v34  ;;  %v3720_v42 = vpop.f32.mrb[86].mxu0 }
0x11dd   :  { %3466 = vst [vmem:[#allocation15 + $0x30] sm:$0xff] %v3458_v44  ;;  %v3459_v27 = vadd.f32 %v3720_v42, %v3684_v18  ;;  %v3433_v21 = vpop.f32.mrb[87].mxu0 }
0x11de   :  { %3464 = vst [vmem:[#allocation15 + $0x20] sm:$0xff] %v3456_v39  ;;  %v3457_v48 = vadd.f32 %v3684_v18, %v3433_v21 }
0x11df   :  { %3467 = vst [vmem:[#allocation15 + $0x38] sm:$0xff] %v3459_v27 }
0x11e0   :  { %3465 = vst [vmem:[#allocation15 + $0x28] sm:$0xff] %v3457_v48 }
0x11e1   :  { %4388 = shalt.err (!%p4385_p2)
}
0x11e2   :  { %s4389_s24 = scalar_lea.hbm %s5641_s7, 1024 }
0x11e3   :  { %p4390_p3 = scmp.ne.s32.totalorder %s5641_s7, %s4389_s24  ;;  %p4393_p4 = scmp.lt.u32.totalorder %s4389_s24, %s5641_s7 }
0x11e5   :  { %p4395_p5 = pnand %p4393_p4, %p4390_p3 }
0x11e7   :  { %4398 = shalt.err (!%p4395_p5)
}
0x11e8   :  { %s4419_s28 = smov 128   ;;  %s4420_s0 = smov 8  }
0x11e9   :  { %3479 = dma.vmem_to_hbm [thread:$0]  %s3474_s20, 1024, %s5641_s7, [#allocation8], %s4419_s28, %s4419_s28, %s4420_s0  }
0x11ea   :  { %4405 = dma.done.wait [#allocation8], 1024  }
0x11eb   :  { %4406 = vsyncadd [#allocation8], 4294966272 }
0x11ec   :  { %3483 = vsyncpa [#allocation7], 1 }
0x11ed   :  { %3484 = vsyncpa [#allocation10], 1 }
0x11ee   :  { %3485 = vsyncpa [#allocation13], 1 }
0x11ef   :  { %3486 = vsyncpa [#allocation8], 1 }

</bundles_post_ra>
